<compile_context>
chip_gen: v7x
topology: tpu7x:2x2x1
jax: 0.10.0
libtpu: 0.0.40
codegen_flags: <defaults>
</compile_context>

<pallas_src>
import jax
import jax.numpy as jnp
import numpy as np
from jax import lax
from jax.experimental import pallas as pl
from jax.experimental.pallas import tpu as pltpu

EMB = 16          # embedding dim (encoder & decoder)
HID = 32          # LSTM hidden dim
SRC_VOCAB = 100   # encoder vocab
TRG_VOCAB = 128   # decoder vocab (= decoder.output_dim)


def _lstm_cell(x, h, c, wih, whh, b):
    """One LSTM cell step, PyTorch gate order (i, f, g, o).

    sigmoid / tanh are applied to the full (batch, 4H) vreg and the g-lanes are
    selected with an iota mask, so the EUP works on whole vregs instead of four
    32-lane sub-slices.
    """
    H = h.shape[-1]
    gates = (jnp.dot(x, wih, preferred_element_type=jnp.float32)
             + jnp.dot(h, whh, preferred_element_type=jnp.float32)
             + b)
    lane = jax.lax.broadcasted_iota(jnp.int32, gates.shape, 1)
    is_g = (lane >= 2 * H) & (lane < 3 * H)
    act = jnp.where(is_g, jnp.tanh(gates), jax.nn.sigmoid(gates))
    i = act[:, 0 * H:1 * H]
    f = act[:, 1 * H:2 * H]
    g = act[:, 2 * H:3 * H]
    o = act[:, 3 * H:4 * H]
    c_new = f * c + i * g
    h_new = o * jnp.tanh(c_new)
    return h_new, c_new


# ------------------------- fused encoder+decoder kernel ---------------------
def seq2seq_kernel(tf_ref,                         # SMEM scalar-prefetch (teacher mask)
                   src_emb_ref, trg_emb_ref, embt_ref,
                   e_wih_ref, e_whh_ref, e_b_ref,
                   d_wih_ref, d_whh_ref, d_b_ref, d_wout_ref, d_bout_ref,
                   out_ref):
    src_len, batch, emb = src_emb_ref.shape
    trg_len = trg_emb_ref.shape[0]
    hid = e_whh_ref.shape[0]
    vocab = d_wout_ref.shape[1]
    steps = trg_len - 1

    # Hoist all weight loads out of the time loops (loaded once into vregs).
    e_wih = e_wih_ref[...]; e_whh = e_whh_ref[...]; e_b = e_b_ref[...]
    d_wih = d_wih_ref[...]; d_whh = d_whh_ref[...]; d_b = d_b_ref[...]
    d_wout = d_wout_ref[...]; d_bout = d_bout_ref[...]
    embt = embt_ref[...]

    # ----------------------- encoder: carried (h, c) ------------------------
    def enc_body(t, hc):
        h, c = hc
        return _lstm_cell(src_emb_ref[t], h, c, e_wih, e_whh, e_b)

    h0 = jnp.zeros((batch, hid), jnp.float32)
    c0 = jnp.zeros((batch, hid), jnp.float32)
    h, c = lax.fori_loop(0, src_len, enc_body, (h0, c0), unroll=True)

    # outputs[0] stays zero (matches the PyTorch reference).
    out_ref[0] = jnp.zeros((batch, vocab), jnp.float32)

    # --------------------- decoder: carried (h, c, x) -----------------------
    def dec_logits(x, h, c):
        h2, c2 = _lstm_cell(x, h, c, d_wih, d_whh, d_b)
        logits = jnp.dot(h2, d_wout, preferred_element_type=jnp.float32) + d_bout
        return h2, c2, logits

    def greedy_embed(logits):
        # first-max index (matches torch.argmax tie-break), then one-hot @ table
        V = logits.shape[-1]
        lane = jax.lax.broadcasted_iota(jnp.int32, logits.shape, 1)
        mx = jnp.max(logits, axis=1, keepdims=True)
        idx = jnp.min(jnp.where(logits == mx, lane, V), axis=1, keepdims=True)
        onehot = (lane == idx).astype(jnp.float32)
        return jnp.dot(onehot, embt, preferred_element_type=jnp.float32)

    def dec_body(s, carry):
        h, c, x = carry
        h, c, logits = dec_logits(x, h, c)
        out_ref[s + 1] = logits                     # VMEM store; HBM flush once at end
        tf = tf_ref[s + 1].astype(jnp.float32)      # 1.0 -> teacher, 0.0 -> greedy
        x_next = tf * trg_emb_ref[s + 1] + (1.0 - tf) * greedy_embed(logits)
        return h, c, x_next

    x0 = trg_emb_ref[0]                             # embedding of trg[0]
    h, c, x = lax.fori_loop(0, steps - 1, dec_body, (h, c, x0), unroll=True)

    # Last decoder step: no next-input needed, so the greedy/embed work is skipped.
    _, _, logits = dec_logits(x, h, c)
    out_ref[steps] = logits


def seq2seq_forward(params, src, trg, tf_mask):
    # embedding lookups are glue (gathers), kept in plain JAX
    src_emb = jnp.take(params['enc_emb'], src, axis=0)   # (src_len, batch, emb)
    trg_emb = jnp.take(params['dec_emb'], trg, axis=0)   # (trg_len, batch, emb)

    src_len, batch, emb = src_emb.shape
    trg_len = trg_emb.shape[0]
    hid = params['enc_whh'].shape[0]
    vocab = params['dec_wout'].shape[1]

    def full(shape):
        return pl.BlockSpec(shape, lambda i, tf, _s=len(shape): (0,) * _s)

    return pl.pallas_call(
        seq2seq_kernel,
        out_shape=jax.ShapeDtypeStruct((trg_len, batch, vocab), jnp.float32),
        grid_spec=pltpu.PrefetchScalarGridSpec(
            num_scalar_prefetch=1,
            grid=(1,),
            in_specs=[
                full((src_len, batch, emb)),      # src_emb
                full((trg_len, batch, emb)),      # trg_emb
                full((vocab, emb)),               # decoder embedding table
                full((emb, 4 * hid)),             # enc_wih
                full((hid, 4 * hid)),             # enc_whh
                full((1, 4 * hid)),               # enc_b
                full((emb, 4 * hid)),             # dec_wih
                full((hid, 4 * hid)),             # dec_whh
                full((1, 4 * hid)),               # dec_b
                full((hid, vocab)),               # dec_wout
                full((1, vocab)),                 # dec_bout
            ],
            out_specs=full((trg_len, batch, vocab)),
        ),
        compiler_params=pltpu.CompilerParams(dimension_semantics=("arbitrary",)),
    )(tf_mask, src_emb, trg_emb, params['dec_emb'],
      params['enc_wih'], params['enc_whh'], params['enc_b'],
      params['dec_wih'], params['dec_whh'], params['dec_b'],
      params['dec_wout'], params['dec_bout'])


# --------------------------- pure-JAX reference -----------------------------
def _lstm_step_ref(x, h, c, wih, whh, b):
    gates = x @ wih + h @ whh + b
    H = h.shape[-1]
    i = jax.nn.sigmoid(gates[:, :H]); f = jax.nn.sigmoid(gates[:, H:2 * H])
    g = jnp.tanh(gates[:, 2 * H:3 * H]); o = jax.nn.sigmoid(gates[:, 3 * H:])
    c2 = f * c + i * g
    return o * jnp.tanh(c2), c2


def seq2seq_ref(params, src, trg, tf_mask):
    batch = src.shape[1]
    src_emb = params['enc_emb'][src]
    h = jnp.zeros((batch, HID), jnp.float32)
    c = jnp.zeros((batch, HID), jnp.float32)
    for t in range(src.shape[0]):
        h, c = _lstm_step_ref(src_emb[t], h, c,
                              params['enc_wih'], params['enc_whh'], params['enc_b'])
    trg_len = trg.shape[0]
    outputs = [jnp.zeros((batch, TRG_VOCAB), jnp.float32)]
    inp = trg[0]
    for t in range(1, trg_len):
        x = params['dec_emb'][inp]
        h, c = _lstm_step_ref(x, h, c,
                              params['dec_wih'], params['dec_whh'], params['dec_b'])
        logit = h @ params['dec_wout'] + params['dec_bout']
        outputs.append(logit)
        if t < trg_len - 1:
            top1 = jnp.argmax(logit, axis=1).astype(jnp.int32)
            inp = jnp.where(tf_mask[t] == 1, trg[t], top1)
    return jnp.stack(outputs, axis=0)


def init_params(key):
    ks = jax.random.split(key, 10)
    s = 0.1
    return {
        'enc_emb':  jax.random.normal(ks[0], (SRC_VOCAB, EMB), jnp.float32) * s,
        'enc_wih':  jax.random.normal(ks[1], (EMB, 4 * HID), jnp.float32) * s,
        'enc_whh':  jax.random.normal(ks[2], (HID, 4 * HID), jnp.float32) * s,
        'enc_b':    jax.random.normal(ks[3], (1, 4 * HID), jnp.float32) * s,
        'dec_emb':  jax.random.normal(ks[4], (TRG_VOCAB, EMB), jnp.float32) * s,
        'dec_wih':  jax.random.normal(ks[5], (EMB, 4 * HID), jnp.float32) * s,
        'dec_whh':  jax.random.normal(ks[6], (HID, 4 * HID), jnp.float32) * s,
        'dec_b':    jax.random.normal(ks[7], (1, 4 * HID), jnp.float32) * s,
        'dec_wout': jax.random.normal(ks[8], (HID, TRG_VOCAB), jnp.float32) * s,
        'dec_bout': jax.random.normal(ks[9], (1, TRG_VOCAB), jnp.float32) * s,
    }


if __name__ == "__main__":
    key = jax.random.PRNGKey(0)
    kp, ks, kt, kf = jax.random.split(key, 4)
    params = init_params(kp)

    SRC_LEN, TRG_LEN, BATCH = 8, 8, 2
    src = jax.random.randint(ks, (SRC_LEN, BATCH), 0, SRC_VOCAB, jnp.int32)
    trg = jax.random.randint(kt, (TRG_LEN, BATCH), 0, TRG_VOCAB, jnp.int32)
    # deterministic teacher-forcing decisions (ratio = 0.5); index t = decision at step t
    tf_mask = jax.random.bernoulli(kf, 0.5, (TRG_LEN - 1,)).astype(jnp.int32)

    out = seq2seq_forward(params, src, trg, tf_mask)
    out = jax.block_until_ready(out)
    assert out.shape == (TRG_LEN, BATCH, TRG_VOCAB)

    ref = seq2seq_ref(params, src, trg, tf_mask)
    np.testing.assert_allclose(np.asarray(out), np.asarray(ref), atol=1e-2, rtol=1e-2)

    print("KERNEL_OK")
</pallas_src>

<mosaic_0001>
module attributes {stable_mosaic.version = 11 : i64} {
  func.func @seq2seq_kernel(%arg0: i32, %arg1: memref<7xi32, #tpu.memory_space<smem>>, %arg2: memref<8x2x16xf32, #tpu.memory_space<vmem>>, %arg3: memref<8x2x16xf32, #tpu.memory_space<vmem>>, %arg4: memref<128x16xf32, #tpu.memory_space<vmem>>, %arg5: memref<16x128xf32, #tpu.memory_space<vmem>>, %arg6: memref<32x128xf32, #tpu.memory_space<vmem>>, %arg7: memref<1x128xf32, #tpu.memory_space<vmem>>, %arg8: memref<16x128xf32, #tpu.memory_space<vmem>>, %arg9: memref<32x128xf32, #tpu.memory_space<vmem>>, %arg10: memref<1x128xf32, #tpu.memory_space<vmem>>, %arg11: memref<32x128xf32, #tpu.memory_space<vmem>>, %arg12: memref<1x128xf32, #tpu.memory_space<vmem>>, %arg13: memref<8x2x128xf32, #tpu.memory_space<vmem>>) attributes {dimension_semantics = [#tpu.dimension_semantics<arbitrary>], iteration_bounds = array<i64: 1>, scalar_prefetch = 1 : i64, scratch_operands = 0 : i64, tpu.core_type = #tpu.core_type<tc>, window_params = [{pipeline_mode = #tpu.pipeline_mode<synchronous>, transform_indices = @transform_0, window_bounds = array<i64: 8, 2, 16>}, {pipeline_mode = #tpu.pipeline_mode<synchronous>, transform_indices = @transform_1, window_bounds = array<i64: 8, 2, 16>}, {pipeline_mode = #tpu.pipeline_mode<synchronous>, transform_indices = @transform_2, window_bounds = array<i64: 128, 16>}, {pipeline_mode = #tpu.pipeline_mode<synchronous>, transform_indices = @transform_3, window_bounds = array<i64: 16, 128>}, {pipeline_mode = #tpu.pipeline_mode<synchronous>, transform_indices = @transform_4, window_bounds = array<i64: 32, 128>}, {pipeline_mode = #tpu.pipeline_mode<synchronous>, transform_indices = @transform_5, window_bounds = array<i64: 1, 128>}, {pipeline_mode = #tpu.pipeline_mode<synchronous>, transform_indices = @transform_6, window_bounds = array<i64: 16, 128>}, {pipeline_mode = #tpu.pipeline_mode<synchronous>, transform_indices = @transform_7, window_bounds = array<i64: 32, 128>}, {pipeline_mode = #tpu.pipeline_mode<synchronous>, transform_indices = @transform_8, window_bounds = array<i64: 1, 128>}, {pipeline_mode = #tpu.pipeline_mode<synchronous>, transform_indices = @transform_9, window_bounds = array<i64: 32, 128>}, {pipeline_mode = #tpu.pipeline_mode<synchronous>, transform_indices = @transform_10, window_bounds = array<i64: 1, 128>}, {pipeline_mode = #tpu.pipeline_mode<synchronous>, transform_indices = @transform_11, window_bounds = array<i64: 8, 2, 128>}]} {
    %c0 = arith.constant 0 : index
    %c0_0 = arith.constant 0 : index
    %0 = vector.load %arg5[%c0, %c0_0] : memref<16x128xf32, #tpu.memory_space<vmem>>, vector<16x128xf32>
    %c0_1 = arith.constant 0 : index
    %c0_2 = arith.constant 0 : index
    %1 = vector.load %arg6[%c0_1, %c0_2] : memref<32x128xf32, #tpu.memory_space<vmem>>, vector<32x128xf32>
    %c0_3 = arith.constant 0 : index
    %c0_4 = arith.constant 0 : index
    %2 = vector.load %arg7[%c0_3, %c0_4] : memref<1x128xf32, #tpu.memory_space<vmem>>, vector<1x128xf32>
    %c0_5 = arith.constant 0 : index
    %c0_6 = arith.constant 0 : index
    %3 = vector.load %arg8[%c0_5, %c0_6] : memref<16x128xf32, #tpu.memory_space<vmem>>, vector<16x128xf32>
    %c0_7 = arith.constant 0 : index
    %c0_8 = arith.constant 0 : index
    %4 = vector.load %arg9[%c0_7, %c0_8] : memref<32x128xf32, #tpu.memory_space<vmem>>, vector<32x128xf32>
    %c0_9 = arith.constant 0 : index
    %c0_10 = arith.constant 0 : index
    %5 = vector.load %arg10[%c0_9, %c0_10] : memref<1x128xf32, #tpu.memory_space<vmem>>, vector<1x128xf32>
    %c0_11 = arith.constant 0 : index
    %c0_12 = arith.constant 0 : index
    %6 = vector.load %arg11[%c0_11, %c0_12] : memref<32x128xf32, #tpu.memory_space<vmem>>, vector<32x128xf32>
    %c0_13 = arith.constant 0 : index
    %c0_14 = arith.constant 0 : index
    %7 = vector.load %arg12[%c0_13, %c0_14] : memref<1x128xf32, #tpu.memory_space<vmem>>, vector<1x128xf32>
    %c0_15 = arith.constant 0 : index
    %c0_16 = arith.constant 0 : index
    %8 = vector.load %arg4[%c0_15, %c0_16] : memref<128x16xf32, #tpu.memory_space<vmem>>, vector<128x16xf32>
    %cst = arith.constant 0.000000e+00 : f32
    %9 = vector.broadcast %cst : f32 to vector<2x32xf32>
    %cst_17 = arith.constant 0.000000e+00 : f32
    %10 = vector.broadcast %cst_17 : f32 to vector<2x32xf32>
    %c0_i32 = arith.constant 0 : i32
    %11 = arith.index_cast %c0_i32 : i32 to index
    %c0_18 = arith.constant 0 : index
    %c0_19 = arith.constant 0 : index
    %12 = vector.load %arg2[%11, %c0_18, %c0_19] : memref<8x2x16xf32, #tpu.memory_space<vmem>>, vector<1x2x16xf32>
    %13 = vector.shape_cast %12 : vector<1x2x16xf32> to vector<2x16xf32>
    %cst_20 = arith.constant dense<0.000000e+00> : vector<2x128xf32>
    %14 = tpu.matmul %13, %0, %cst_20 {dimension_numbers = #tpu.dot_dimension_numbers<[1], [0], [0], [1], [0, 0, 1, 1], [], []>} : vector<2x16xf32>, vector<16x128xf32>, vector<2x128xf32> -> vector<2x128xf32>
    %cst_21 = arith.constant dense<0.000000e+00> : vector<2x128xf32>
    %15 = tpu.matmul %9, %1, %cst_21 {dimension_numbers = #tpu.dot_dimension_numbers<[1], [0], [0], [1], [0, 0, 1, 1], [], []>} : vector<2x32xf32>, vector<32x128xf32>, vector<2x128xf32> -> vector<2x128xf32>
    %16 = arith.addf %14, %15 : vector<2x128xf32>
    %17 = vector.broadcast %2 : vector<1x128xf32> to vector<2x128xf32>
    %18 = arith.addf %16, %17 : vector<2x128xf32>
    %19 = tpu.iota {dimensions = array<i32: 1>} : vector<2x128xi32>
    %c64_i32 = arith.constant 64 : i32
    %20 = vector.broadcast %c64_i32 : i32 to vector<2x128xi32>
    %21 = arith.cmpi sge, %19, %20 : vector<2x128xi32>
    %c96_i32 = arith.constant 96 : i32
    %22 = vector.broadcast %c96_i32 : i32 to vector<2x128xi32>
    %23 = arith.cmpi slt, %19, %22 : vector<2x128xi32>
    %24 = arith.andi %21, %23 : vector<2x128xi1>
    %25 = math.tanh %18 : vector<2x128xf32>
    %26 = arith.negf %18 : vector<2x128xf32>
    %27 = math.exp %26 : vector<2x128xf32>
    %cst_22 = arith.constant 1.000000e+00 : f32
    %28 = vector.broadcast %cst_22 : f32 to vector<2x128xf32>
    %29 = arith.addf %28, %27 : vector<2x128xf32>
    %30 = arith.divf %28, %29 : vector<2x128xf32>
    %31 = arith.select %24, %25, %30 : vector<2x128xi1>, vector<2x128xf32>
    %32 = vector.extract_strided_slice %31 {offsets = [0, 0], sizes = [2, 32], strides = [1, 1]} : vector<2x128xf32> to vector<2x32xf32>
    %33 = vector.extract_strided_slice %31 {offsets = [0, 32], sizes = [2, 32], strides = [1, 1]} : vector<2x128xf32> to vector<2x32xf32>
    %34 = vector.extract_strided_slice %31 {offsets = [0, 64], sizes = [2, 32], strides = [1, 1]} : vector<2x128xf32> to vector<2x32xf32>
    %35 = vector.extract_strided_slice %31 {offsets = [0, 96], sizes = [2, 32], strides = [1, 1]} : vector<2x128xf32> to vector<2x32xf32>
    %36 = arith.mulf %33, %10 : vector<2x32xf32>
    %37 = arith.mulf %32, %34 : vector<2x32xf32>
    %38 = arith.addf %36, %37 : vector<2x32xf32>
    %39 = math.tanh %38 : vector<2x32xf32>
    %40 = arith.mulf %35, %39 : vector<2x32xf32>
    %c1_i32 = arith.constant 1 : i32
    %41 = arith.index_cast %c1_i32 : i32 to index
    %c0_23 = arith.constant 0 : index
    %c0_24 = arith.constant 0 : index
    %42 = vector.load %arg2[%41, %c0_23, %c0_24] : memref<8x2x16xf32, #tpu.memory_space<vmem>>, vector<1x2x16xf32>
    %43 = vector.shape_cast %42 : vector<1x2x16xf32> to vector<2x16xf32>
    %cst_25 = arith.constant dense<0.000000e+00> : vector<2x128xf32>
    %44 = tpu.matmul %43, %0, %cst_25 {dimension_numbers = #tpu.dot_dimension_numbers<[1], [0], [0], [1], [0, 0, 1, 1], [], []>} : vector<2x16xf32>, vector<16x128xf32>, vector<2x128xf32> -> vector<2x128xf32>
    %cst_26 = arith.constant dense<0.000000e+00> : vector<2x128xf32>
    %45 = tpu.matmul %40, %1, %cst_26 {dimension_numbers = #tpu.dot_dimension_numbers<[1], [0], [0], [1], [0, 0, 1, 1], [], []>} : vector<2x32xf32>, vector<32x128xf32>, vector<2x128xf32> -> vector<2x128xf32>
    %46 = arith.addf %44, %45 : vector<2x128xf32>
    %47 = vector.broadcast %2 : vector<1x128xf32> to vector<2x128xf32>
    %48 = arith.addf %46, %47 : vector<2x128xf32>
    %49 = tpu.iota {dimensions = array<i32: 1>} : vector<2x128xi32>
    %c64_i32_27 = arith.constant 64 : i32
    %50 = vector.broadcast %c64_i32_27 : i32 to vector<2x128xi32>
    %51 = arith.cmpi sge, %49, %50 : vector<2x128xi32>
    %c96_i32_28 = arith.constant 96 : i32
    %52 = vector.broadcast %c96_i32_28 : i32 to vector<2x128xi32>
    %53 = arith.cmpi slt, %49, %52 : vector<2x128xi32>
    %54 = arith.andi %51, %53 : vector<2x128xi1>
    %55 = math.tanh %48 : vector<2x128xf32>
    %56 = arith.negf %48 : vector<2x128xf32>
    %57 = math.exp %56 : vector<2x128xf32>
    %cst_29 = arith.constant 1.000000e+00 : f32
    %58 = vector.broadcast %cst_29 : f32 to vector<2x128xf32>
    %59 = arith.addf %58, %57 : vector<2x128xf32>
    %60 = arith.divf %58, %59 : vector<2x128xf32>
    %61 = arith.select %54, %55, %60 : vector<2x128xi1>, vector<2x128xf32>
    %62 = vector.extract_strided_slice %61 {offsets = [0, 0], sizes = [2, 32], strides = [1, 1]} : vector<2x128xf32> to vector<2x32xf32>
    %63 = vector.extract_strided_slice %61 {offsets = [0, 32], sizes = [2, 32], strides = [1, 1]} : vector<2x128xf32> to vector<2x32xf32>
    %64 = vector.extract_strided_slice %61 {offsets = [0, 64], sizes = [2, 32], strides = [1, 1]} : vector<2x128xf32> to vector<2x32xf32>
    %65 = vector.extract_strided_slice %61 {offsets = [0, 96], sizes = [2, 32], strides = [1, 1]} : vector<2x128xf32> to vector<2x32xf32>
    %66 = arith.mulf %63, %38 : vector<2x32xf32>
    %67 = arith.mulf %62, %64 : vector<2x32xf32>
    %68 = arith.addf %66, %67 : vector<2x32xf32>
    %69 = math.tanh %68 : vector<2x32xf32>
    %70 = arith.mulf %65, %69 : vector<2x32xf32>
    %c2_i32 = arith.constant 2 : i32
    %71 = arith.index_cast %c2_i32 : i32 to index
    %c0_30 = arith.constant 0 : index
    %c0_31 = arith.constant 0 : index
    %72 = vector.load %arg2[%71, %c0_30, %c0_31] : memref<8x2x16xf32, #tpu.memory_space<vmem>>, vector<1x2x16xf32>
    %73 = vector.shape_cast %72 : vector<1x2x16xf32> to vector<2x16xf32>
    %cst_32 = arith.constant dense<0.000000e+00> : vector<2x128xf32>
    %74 = tpu.matmul %73, %0, %cst_32 {dimension_numbers = #tpu.dot_dimension_numbers<[1], [0], [0], [1], [0, 0, 1, 1], [], []>} : vector<2x16xf32>, vector<16x128xf32>, vector<2x128xf32> -> vector<2x128xf32>
    %cst_33 = arith.constant dense<0.000000e+00> : vector<2x128xf32>
    %75 = tpu.matmul %70, %1, %cst_33 {dimension_numbers = #tpu.dot_dimension_numbers<[1], [0], [0], [1], [0, 0, 1, 1], [], []>} : vector<2x32xf32>, vector<32x128xf32>, vector<2x128xf32> -> vector<2x128xf32>
    %76 = arith.addf %74, %75 : vector<2x128xf32>
    %77 = vector.broadcast %2 : vector<1x128xf32> to vector<2x128xf32>
    %78 = arith.addf %76, %77 : vector<2x128xf32>
    %79 = tpu.iota {dimensions = array<i32: 1>} : vector<2x128xi32>
    %c64_i32_34 = arith.constant 64 : i32
    %80 = vector.broadcast %c64_i32_34 : i32 to vector<2x128xi32>
    %81 = arith.cmpi sge, %79, %80 : vector<2x128xi32>
    %c96_i32_35 = arith.constant 96 : i32
    %82 = vector.broadcast %c96_i32_35 : i32 to vector<2x128xi32>
    %83 = arith.cmpi slt, %79, %82 : vector<2x128xi32>
    %84 = arith.andi %81, %83 : vector<2x128xi1>
    %85 = math.tanh %78 : vector<2x128xf32>
    %86 = arith.negf %78 : vector<2x128xf32>
    %87 = math.exp %86 : vector<2x128xf32>
    %cst_36 = arith.constant 1.000000e+00 : f32
    %88 = vector.broadcast %cst_36 : f32 to vector<2x128xf32>
    %89 = arith.addf %88, %87 : vector<2x128xf32>
    %90 = arith.divf %88, %89 : vector<2x128xf32>
    %91 = arith.select %84, %85, %90 : vector<2x128xi1>, vector<2x128xf32>
    %92 = vector.extract_strided_slice %91 {offsets = [0, 0], sizes = [2, 32], strides = [1, 1]} : vector<2x128xf32> to vector<2x32xf32>
    %93 = vector.extract_strided_slice %91 {offsets = [0, 32], sizes = [2, 32], strides = [1, 1]} : vector<2x128xf32> to vector<2x32xf32>
    %94 = vector.extract_strided_slice %91 {offsets = [0, 64], sizes = [2, 32], strides = [1, 1]} : vector<2x128xf32> to vector<2x32xf32>
    %95 = vector.extract_strided_slice %91 {offsets = [0, 96], sizes = [2, 32], strides = [1, 1]} : vector<2x128xf32> to vector<2x32xf32>
    %96 = arith.mulf %93, %68 : vector<2x32xf32>
    %97 = arith.mulf %92, %94 : vector<2x32xf32>
    %98 = arith.addf %96, %97 : vector<2x32xf32>
    %99 = math.tanh %98 : vector<2x32xf32>
    %100 = arith.mulf %95, %99 : vector<2x32xf32>
    %c3_i32 = arith.constant 3 : i32
    %101 = arith.index_cast %c3_i32 : i32 to index
    %c0_37 = arith.constant 0 : index
    %c0_38 = arith.constant 0 : index
    %102 = vector.load %arg2[%101, %c0_37, %c0_38] : memref<8x2x16xf32, #tpu.memory_space<vmem>>, vector<1x2x16xf32>
    %103 = vector.shape_cast %102 : vector<1x2x16xf32> to vector<2x16xf32>
    %cst_39 = arith.constant dense<0.000000e+00> : vector<2x128xf32>
    %104 = tpu.matmul %103, %0, %cst_39 {dimension_numbers = #tpu.dot_dimension_numbers<[1], [0], [0], [1], [0, 0, 1, 1], [], []>} : vector<2x16xf32>, vector<16x128xf32>, vector<2x128xf32> -> vector<2x128xf32>
    %cst_40 = arith.constant dense<0.000000e+00> : vector<2x128xf32>
    %105 = tpu.matmul %100, %1, %cst_40 {dimension_numbers = #tpu.dot_dimension_numbers<[1], [0], [0], [1], [0, 0, 1, 1], [], []>} : vector<2x32xf32>, vector<32x128xf32>, vector<2x128xf32> -> vector<2x128xf32>
    %106 = arith.addf %104, %105 : vector<2x128xf32>
    %107 = vector.broadcast %2 : vector<1x128xf32> to vector<2x128xf32>
    %108 = arith.addf %106, %107 : vector<2x128xf32>
    %109 = tpu.iota {dimensions = array<i32: 1>} : vector<2x128xi32>
    %c64_i32_41 = arith.constant 64 : i32
    %110 = vector.broadcast %c64_i32_41 : i32 to vector<2x128xi32>
    %111 = arith.cmpi sge, %109, %110 : vector<2x128xi32>
    %c96_i32_42 = arith.constant 96 : i32
    %112 = vector.broadcast %c96_i32_42 : i32 to vector<2x128xi32>
    %113 = arith.cmpi slt, %109, %112 : vector<2x128xi32>
    %114 = arith.andi %111, %113 : vector<2x128xi1>
    %115 = math.tanh %108 : vector<2x128xf32>
    %116 = arith.negf %108 : vector<2x128xf32>
    %117 = math.exp %116 : vector<2x128xf32>
    %cst_43 = arith.constant 1.000000e+00 : f32
    %118 = vector.broadcast %cst_43 : f32 to vector<2x128xf32>
    %119 = arith.addf %118, %117 : vector<2x128xf32>
    %120 = arith.divf %118, %119 : vector<2x128xf32>
    %121 = arith.select %114, %115, %120 : vector<2x128xi1>, vector<2x128xf32>
    %122 = vector.extract_strided_slice %121 {offsets = [0, 0], sizes = [2, 32], strides = [1, 1]} : vector<2x128xf32> to vector<2x32xf32>
    %123 = vector.extract_strided_slice %121 {offsets = [0, 32], sizes = [2, 32], strides = [1, 1]} : vector<2x128xf32> to vector<2x32xf32>
    %124 = vector.extract_strided_slice %121 {offsets = [0, 64], sizes = [2, 32], strides = [1, 1]} : vector<2x128xf32> to vector<2x32xf32>
    %125 = vector.extract_strided_slice %121 {offsets = [0, 96], sizes = [2, 32], strides = [1, 1]} : vector<2x128xf32> to vector<2x32xf32>
    %126 = arith.mulf %123, %98 : vector<2x32xf32>
    %127 = arith.mulf %122, %124 : vector<2x32xf32>
    %128 = arith.addf %126, %127 : vector<2x32xf32>
    %129 = math.tanh %128 : vector<2x32xf32>
    %130 = arith.mulf %125, %129 : vector<2x32xf32>
    %c4_i32 = arith.constant 4 : i32
    %131 = arith.index_cast %c4_i32 : i32 to index
    %c0_44 = arith.constant 0 : index
    %c0_45 = arith.constant 0 : index
    %132 = vector.load %arg2[%131, %c0_44, %c0_45] : memref<8x2x16xf32, #tpu.memory_space<vmem>>, vector<1x2x16xf32>
    %133 = vector.shape_cast %132 : vector<1x2x16xf32> to vector<2x16xf32>
    %cst_46 = arith.constant dense<0.000000e+00> : vector<2x128xf32>
    %134 = tpu.matmul %133, %0, %cst_46 {dimension_numbers = #tpu.dot_dimension_numbers<[1], [0], [0], [1], [0, 0, 1, 1], [], []>} : vector<2x16xf32>, vector<16x128xf32>, vector<2x128xf32> -> vector<2x128xf32>
    %cst_47 = arith.constant dense<0.000000e+00> : vector<2x128xf32>
    %135 = tpu.matmul %130, %1, %cst_47 {dimension_numbers = #tpu.dot_dimension_numbers<[1], [0], [0], [1], [0, 0, 1, 1], [], []>} : vector<2x32xf32>, vector<32x128xf32>, vector<2x128xf32> -> vector<2x128xf32>
    %136 = arith.addf %134, %135 : vector<2x128xf32>
    %137 = vector.broadcast %2 : vector<1x128xf32> to vector<2x128xf32>
    %138 = arith.addf %136, %137 : vector<2x128xf32>
    %139 = tpu.iota {dimensions = array<i32: 1>} : vector<2x128xi32>
    %c64_i32_48 = arith.constant 64 : i32
    %140 = vector.broadcast %c64_i32_48 : i32 to vector<2x128xi32>
    %141 = arith.cmpi sge, %139, %140 : vector<2x128xi32>
    %c96_i32_49 = arith.constant 96 : i32
    %142 = vector.broadcast %c96_i32_49 : i32 to vector<2x128xi32>
    %143 = arith.cmpi slt, %139, %142 : vector<2x128xi32>
    %144 = arith.andi %141, %143 : vector<2x128xi1>
    %145 = math.tanh %138 : vector<2x128xf32>
    %146 = arith.negf %138 : vector<2x128xf32>
    %147 = math.exp %146 : vector<2x128xf32>
    %cst_50 = arith.constant 1.000000e+00 : f32
    %148 = vector.broadcast %cst_50 : f32 to vector<2x128xf32>
    %149 = arith.addf %148, %147 : vector<2x128xf32>
    %150 = arith.divf %148, %149 : vector<2x128xf32>
    %151 = arith.select %144, %145, %150 : vector<2x128xi1>, vector<2x128xf32>
    %152 = vector.extract_strided_slice %151 {offsets = [0, 0], sizes = [2, 32], strides = [1, 1]} : vector<2x128xf32> to vector<2x32xf32>
    %153 = vector.extract_strided_slice %151 {offsets = [0, 32], sizes = [2, 32], strides = [1, 1]} : vector<2x128xf32> to vector<2x32xf32>
    %154 = vector.extract_strided_slice %151 {offsets = [0, 64], sizes = [2, 32], strides = [1, 1]} : vector<2x128xf32> to vector<2x32xf32>
    %155 = vector.extract_strided_slice %151 {offsets = [0, 96], sizes = [2, 32], strides = [1, 1]} : vector<2x128xf32> to vector<2x32xf32>
    %156 = arith.mulf %153, %128 : vector<2x32xf32>
    %157 = arith.mulf %152, %154 : vector<2x32xf32>
    %158 = arith.addf %156, %157 : vector<2x32xf32>
    %159 = math.tanh %158 : vector<2x32xf32>
    %160 = arith.mulf %155, %159 : vector<2x32xf32>
    %c5_i32 = arith.constant 5 : i32
    %161 = arith.index_cast %c5_i32 : i32 to index
    %c0_51 = arith.constant 0 : index
    %c0_52 = arith.constant 0 : index
    %162 = vector.load %arg2[%161, %c0_51, %c0_52] : memref<8x2x16xf32, #tpu.memory_space<vmem>>, vector<1x2x16xf32>
    %163 = vector.shape_cast %162 : vector<1x2x16xf32> to vector<2x16xf32>
    %cst_53 = arith.constant dense<0.000000e+00> : vector<2x128xf32>
    %164 = tpu.matmul %163, %0, %cst_53 {dimension_numbers = #tpu.dot_dimension_numbers<[1], [0], [0], [1], [0, 0, 1, 1], [], []>} : vector<2x16xf32>, vector<16x128xf32>, vector<2x128xf32> -> vector<2x128xf32>
    %cst_54 = arith.constant dense<0.000000e+00> : vector<2x128xf32>
    %165 = tpu.matmul %160, %1, %cst_54 {dimension_numbers = #tpu.dot_dimension_numbers<[1], [0], [0], [1], [0, 0, 1, 1], [], []>} : vector<2x32xf32>, vector<32x128xf32>, vector<2x128xf32> -> vector<2x128xf32>
    %166 = arith.addf %164, %165 : vector<2x128xf32>
    %167 = vector.broadcast %2 : vector<1x128xf32> to vector<2x128xf32>
    %168 = arith.addf %166, %167 : vector<2x128xf32>
    %169 = tpu.iota {dimensions = array<i32: 1>} : vector<2x128xi32>
    %c64_i32_55 = arith.constant 64 : i32
    %170 = vector.broadcast %c64_i32_55 : i32 to vector<2x128xi32>
    %171 = arith.cmpi sge, %169, %170 : vector<2x128xi32>
    %c96_i32_56 = arith.constant 96 : i32
    %172 = vector.broadcast %c96_i32_56 : i32 to vector<2x128xi32>
    %173 = arith.cmpi slt, %169, %172 : vector<2x128xi32>
    %174 = arith.andi %171, %173 : vector<2x128xi1>
    %175 = math.tanh %168 : vector<2x128xf32>
    %176 = arith.negf %168 : vector<2x128xf32>
    %177 = math.exp %176 : vector<2x128xf32>
    %cst_57 = arith.constant 1.000000e+00 : f32
    %178 = vector.broadcast %cst_57 : f32 to vector<2x128xf32>
    %179 = arith.addf %178, %177 : vector<2x128xf32>
    %180 = arith.divf %178, %179 : vector<2x128xf32>
    %181 = arith.select %174, %175, %180 : vector<2x128xi1>, vector<2x128xf32>
    %182 = vector.extract_strided_slice %181 {offsets = [0, 0], sizes = [2, 32], strides = [1, 1]} : vector<2x128xf32> to vector<2x32xf32>
    %183 = vector.extract_strided_slice %181 {offsets = [0, 32], sizes = [2, 32], strides = [1, 1]} : vector<2x128xf32> to vector<2x32xf32>
    %184 = vector.extract_strided_slice %181 {offsets = [0, 64], sizes = [2, 32], strides = [1, 1]} : vector<2x128xf32> to vector<2x32xf32>
    %185 = vector.extract_strided_slice %181 {offsets = [0, 96], sizes = [2, 32], strides = [1, 1]} : vector<2x128xf32> to vector<2x32xf32>
    %186 = arith.mulf %183, %158 : vector<2x32xf32>
    %187 = arith.mulf %182, %184 : vector<2x32xf32>
    %188 = arith.addf %186, %187 : vector<2x32xf32>
    %189 = math.tanh %188 : vector<2x32xf32>
    %190 = arith.mulf %185, %189 : vector<2x32xf32>
    %c6_i32 = arith.constant 6 : i32
    %191 = arith.index_cast %c6_i32 : i32 to index
    %c0_58 = arith.constant 0 : index
    %c0_59 = arith.constant 0 : index
    %192 = vector.load %arg2[%191, %c0_58, %c0_59] : memref<8x2x16xf32, #tpu.memory_space<vmem>>, vector<1x2x16xf32>
    %193 = vector.shape_cast %192 : vector<1x2x16xf32> to vector<2x16xf32>
    %cst_60 = arith.constant dense<0.000000e+00> : vector<2x128xf32>
    %194 = tpu.matmul %193, %0, %cst_60 {dimension_numbers = #tpu.dot_dimension_numbers<[1], [0], [0], [1], [0, 0, 1, 1], [], []>} : vector<2x16xf32>, vector<16x128xf32>, vector<2x128xf32> -> vector<2x128xf32>
    %cst_61 = arith.constant dense<0.000000e+00> : vector<2x128xf32>
    %195 = tpu.matmul %190, %1, %cst_61 {dimension_numbers = #tpu.dot_dimension_numbers<[1], [0], [0], [1], [0, 0, 1, 1], [], []>} : vector<2x32xf32>, vector<32x128xf32>, vector<2x128xf32> -> vector<2x128xf32>
    %196 = arith.addf %194, %195 : vector<2x128xf32>
    %197 = vector.broadcast %2 : vector<1x128xf32> to vector<2x128xf32>
    %198 = arith.addf %196, %197 : vector<2x128xf32>
    %199 = tpu.iota {dimensions = array<i32: 1>} : vector<2x128xi32>
    %c64_i32_62 = arith.constant 64 : i32
    %200 = vector.broadcast %c64_i32_62 : i32 to vector<2x128xi32>
    %201 = arith.cmpi sge, %199, %200 : vector<2x128xi32>
    %c96_i32_63 = arith.constant 96 : i32
    %202 = vector.broadcast %c96_i32_63 : i32 to vector<2x128xi32>
    %203 = arith.cmpi slt, %199, %202 : vector<2x128xi32>
    %204 = arith.andi %201, %203 : vector<2x128xi1>
    %205 = math.tanh %198 : vector<2x128xf32>
    %206 = arith.negf %198 : vector<2x128xf32>
    %207 = math.exp %206 : vector<2x128xf32>
    %cst_64 = arith.constant 1.000000e+00 : f32
    %208 = vector.broadcast %cst_64 : f32 to vector<2x128xf32>
    %209 = arith.addf %208, %207 : vector<2x128xf32>
    %210 = arith.divf %208, %209 : vector<2x128xf32>
    %211 = arith.select %204, %205, %210 : vector<2x128xi1>, vector<2x128xf32>
    %212 = vector.extract_strided_slice %211 {offsets = [0, 0], sizes = [2, 32], strides = [1, 1]} : vector<2x128xf32> to vector<2x32xf32>
    %213 = vector.extract_strided_slice %211 {offsets = [0, 32], sizes = [2, 32], strides = [1, 1]} : vector<2x128xf32> to vector<2x32xf32>
    %214 = vector.extract_strided_slice %211 {offsets = [0, 64], sizes = [2, 32], strides = [1, 1]} : vector<2x128xf32> to vector<2x32xf32>
    %215 = vector.extract_strided_slice %211 {offsets = [0, 96], sizes = [2, 32], strides = [1, 1]} : vector<2x128xf32> to vector<2x32xf32>
    %216 = arith.mulf %213, %188 : vector<2x32xf32>
    %217 = arith.mulf %212, %214 : vector<2x32xf32>
    %218 = arith.addf %216, %217 : vector<2x32xf32>
    %219 = math.tanh %218 : vector<2x32xf32>
    %220 = arith.mulf %215, %219 : vector<2x32xf32>
    %c7_i32 = arith.constant 7 : i32
    %221 = arith.index_cast %c7_i32 : i32 to index
    %c0_65 = arith.constant 0 : index
    %c0_66 = arith.constant 0 : index
    %222 = vector.load %arg2[%221, %c0_65, %c0_66] : memref<8x2x16xf32, #tpu.memory_space<vmem>>, vector<1x2x16xf32>
    %223 = vector.shape_cast %222 : vector<1x2x16xf32> to vector<2x16xf32>
    %cst_67 = arith.constant dense<0.000000e+00> : vector<2x128xf32>
    %224 = tpu.matmul %223, %0, %cst_67 {dimension_numbers = #tpu.dot_dimension_numbers<[1], [0], [0], [1], [0, 0, 1, 1], [], []>} : vector<2x16xf32>, vector<16x128xf32>, vector<2x128xf32> -> vector<2x128xf32>
    %cst_68 = arith.constant dense<0.000000e+00> : vector<2x128xf32>
    %225 = tpu.matmul %220, %1, %cst_68 {dimension_numbers = #tpu.dot_dimension_numbers<[1], [0], [0], [1], [0, 0, 1, 1], [], []>} : vector<2x32xf32>, vector<32x128xf32>, vector<2x128xf32> -> vector<2x128xf32>
    %226 = arith.addf %224, %225 : vector<2x128xf32>
    %227 = vector.broadcast %2 : vector<1x128xf32> to vector<2x128xf32>
    %228 = arith.addf %226, %227 : vector<2x128xf32>
    %229 = tpu.iota {dimensions = array<i32: 1>} : vector<2x128xi32>
    %c64_i32_69 = arith.constant 64 : i32
    %230 = vector.broadcast %c64_i32_69 : i32 to vector<2x128xi32>
    %231 = arith.cmpi sge, %229, %230 : vector<2x128xi32>
    %c96_i32_70 = arith.constant 96 : i32
    %232 = vector.broadcast %c96_i32_70 : i32 to vector<2x128xi32>
    %233 = arith.cmpi slt, %229, %232 : vector<2x128xi32>
    %234 = arith.andi %231, %233 : vector<2x128xi1>
    %235 = math.tanh %228 : vector<2x128xf32>
    %236 = arith.negf %228 : vector<2x128xf32>
    %237 = math.exp %236 : vector<2x128xf32>
    %cst_71 = arith.constant 1.000000e+00 : f32
    %238 = vector.broadcast %cst_71 : f32 to vector<2x128xf32>
    %239 = arith.addf %238, %237 : vector<2x128xf32>
    %240 = arith.divf %238, %239 : vector<2x128xf32>
    %241 = arith.select %234, %235, %240 : vector<2x128xi1>, vector<2x128xf32>
    %242 = vector.extract_strided_slice %241 {offsets = [0, 0], sizes = [2, 32], strides = [1, 1]} : vector<2x128xf32> to vector<2x32xf32>
    %243 = vector.extract_strided_slice %241 {offsets = [0, 32], sizes = [2, 32], strides = [1, 1]} : vector<2x128xf32> to vector<2x32xf32>
    %244 = vector.extract_strided_slice %241 {offsets = [0, 64], sizes = [2, 32], strides = [1, 1]} : vector<2x128xf32> to vector<2x32xf32>
    %245 = vector.extract_strided_slice %241 {offsets = [0, 96], sizes = [2, 32], strides = [1, 1]} : vector<2x128xf32> to vector<2x32xf32>
    %246 = arith.mulf %243, %218 : vector<2x32xf32>
    %247 = arith.mulf %242, %244 : vector<2x32xf32>
    %248 = arith.addf %246, %247 : vector<2x32xf32>
    %249 = math.tanh %248 : vector<2x32xf32>
    %250 = arith.mulf %245, %249 : vector<2x32xf32>
    %c8_i32 = arith.constant 8 : i32
    %cst_72 = arith.constant 0.000000e+00 : f32
    %251 = vector.broadcast %cst_72 : f32 to vector<2x128xf32>
    %c0_73 = arith.constant 0 : index
    %c0_74 = arith.constant 0 : index
    %c0_75 = arith.constant 0 : index
    %252 = vector.load %arg13[%c0_73, %c0_74, %c0_75] : memref<8x2x128xf32, #tpu.memory_space<vmem>>, vector<1x2x128xf32>
    %253 = vector.shape_cast %252 : vector<1x2x128xf32> to vector<2x128xf32>
    %254 = vector.shape_cast %251 : vector<2x128xf32> to vector<1x2x128xf32>
    tpu.vector_store %arg13[%c0_73, %c0_74, %c0_75], %254 {strides = array<i32>} : memref<8x2x128xf32, #tpu.memory_space<vmem>>, vector<1x2x128xf32>,
    %c0_76 = arith.constant 0 : index
    %c0_77 = arith.constant 0 : index
    %c0_78 = arith.constant 0 : index
    %255 = vector.load %arg3[%c0_76, %c0_77, %c0_78] : memref<8x2x16xf32, #tpu.memory_space<vmem>>, vector<1x2x16xf32>
    %256 = vector.shape_cast %255 : vector<1x2x16xf32> to vector<2x16xf32>
    %c0_i32_79 = arith.constant 0 : i32
    %cst_80 = arith.constant dense<0.000000e+00> : vector<2x128xf32>
    %257 = tpu.matmul %256, %3, %cst_80 {dimension_numbers = #tpu.dot_dimension_numbers<[1], [0], [0], [1], [0, 0, 1, 1], [], []>} : vector<2x16xf32>, vector<16x128xf32>, vector<2x128xf32> -> vector<2x128xf32>
    %cst_81 = arith.constant dense<0.000000e+00> : vector<2x128xf32>
    %258 = tpu.matmul %250, %4, %cst_81 {dimension_numbers = #tpu.dot_dimension_numbers<[1], [0], [0], [1], [0, 0, 1, 1], [], []>} : vector<2x32xf32>, vector<32x128xf32>, vector<2x128xf32> -> vector<2x128xf32>
    %259 = arith.addf %257, %258 : vector<2x128xf32>
    %260 = vector.broadcast %5 : vector<1x128xf32> to vector<2x128xf32>
    %261 = arith.addf %259, %260 : vector<2x128xf32>
    %262 = tpu.iota {dimensions = array<i32: 1>} : vector<2x128xi32>
    %c64_i32_82 = arith.constant 64 : i32
    %263 = vector.broadcast %c64_i32_82 : i32 to vector<2x128xi32>
    %264 = arith.cmpi sge, %262, %263 : vector<2x128xi32>
    %c96_i32_83 = arith.constant 96 : i32
    %265 = vector.broadcast %c96_i32_83 : i32 to vector<2x128xi32>
    %266 = arith.cmpi slt, %262, %265 : vector<2x128xi32>
    %267 = arith.andi %264, %266 : vector<2x128xi1>
    %268 = math.tanh %261 : vector<2x128xf32>
    %269 = arith.negf %261 : vector<2x128xf32>
    %270 = math.exp %269 : vector<2x128xf32>
    %cst_84 = arith.constant 1.000000e+00 : f32
    %271 = vector.broadcast %cst_84 : f32 to vector<2x128xf32>
    %272 = arith.addf %271, %270 : vector<2x128xf32>
    %273 = arith.divf %271, %272 : vector<2x128xf32>
    %274 = arith.select %267, %268, %273 : vector<2x128xi1>, vector<2x128xf32>
    %275 = vector.extract_strided_slice %274 {offsets = [0, 0], sizes = [2, 32], strides = [1, 1]} : vector<2x128xf32> to vector<2x32xf32>
    %276 = vector.extract_strided_slice %274 {offsets = [0, 32], sizes = [2, 32], strides = [1, 1]} : vector<2x128xf32> to vector<2x32xf32>
    %277 = vector.extract_strided_slice %274 {offsets = [0, 64], sizes = [2, 32], strides = [1, 1]} : vector<2x128xf32> to vector<2x32xf32>
    %278 = vector.extract_strided_slice %274 {offsets = [0, 96], sizes = [2, 32], strides = [1, 1]} : vector<2x128xf32> to vector<2x32xf32>
    %279 = arith.mulf %276, %248 : vector<2x32xf32>
    %280 = arith.mulf %275, %277 : vector<2x32xf32>
    %281 = arith.addf %279, %280 : vector<2x32xf32>
    %282 = math.tanh %281 : vector<2x32xf32>
    %283 = arith.mulf %278, %282 : vector<2x32xf32>
    %cst_85 = arith.constant dense<0.000000e+00> : vector<2x128xf32>
    %284 = tpu.matmul %283, %6, %cst_85 {dimension_numbers = #tpu.dot_dimension_numbers<[1], [0], [0], [1], [0, 0, 1, 1], [], []>} : vector<2x32xf32>, vector<32x128xf32>, vector<2x128xf32> -> vector<2x128xf32>
    %285 = vector.broadcast %7 : vector<1x128xf32> to vector<2x128xf32>
    %286 = arith.addf %284, %285 : vector<2x128xf32>
    %c1_i32_86 = arith.constant 1 : i32
    %287 = arith.addi %c0_i32_79, %c1_i32_86 : i32
    %288 = arith.index_cast %287 : i32 to index
    %c0_87 = arith.constant 0 : index
    %c0_88 = arith.constant 0 : index
    %289 = vector.load %arg13[%288, %c0_87, %c0_88] : memref<8x2x128xf32, #tpu.memory_space<vmem>>, vector<1x2x128xf32>
    %290 = vector.shape_cast %289 : vector<1x2x128xf32> to vector<2x128xf32>
    %291 = vector.shape_cast %286 : vector<2x128xf32> to vector<1x2x128xf32>
    tpu.vector_store %arg13[%288, %c0_87, %c0_88], %291 {strides = array<i32>} : memref<8x2x128xf32, #tpu.memory_space<vmem>>, vector<1x2x128xf32>,
    %c1_i32_89 = arith.constant 1 : i32
    %292 = arith.addi %c0_i32_79, %c1_i32_89 : i32
    %293 = arith.index_cast %292 : i32 to index
    %294 = memref.load %arg1[%293] : memref<7xi32, #tpu.memory_space<smem>>
    %295 = arith.sitofp %294 : i32 to f32
    %c1_i32_90 = arith.constant 1 : i32
    %296 = arith.addi %c0_i32_79, %c1_i32_90 : i32
    %297 = arith.index_cast %296 : i32 to index
    %c0_91 = arith.constant 0 : index
    %c0_92 = arith.constant 0 : index
    %298 = vector.load %arg3[%297, %c0_91, %c0_92] : memref<8x2x16xf32, #tpu.memory_space<vmem>>, vector<1x2x16xf32>
    %299 = vector.shape_cast %298 : vector<1x2x16xf32> to vector<2x16xf32>
    %300 = vector.broadcast %295 : f32 to vector<2x16xf32>
    %301 = arith.mulf %300, %299 : vector<2x16xf32>
    %cst_93 = arith.constant 1.000000e+00 : f32
    %302 = arith.subf %cst_93, %295 : f32
    %303 = tpu.iota {dimensions = array<i32: 1>} : vector<2x128xi32>
    %cst_94 = arith.constant dense<0xFF800000> : vector<2xf32>
    %304 = vector.multi_reduction <maximumf>, %286, %cst_94 [1] : vector<2x128xf32> to vector<2xf32>
    %305 = vector.shape_cast %304 : vector<2xf32> to vector<2x1xf32>
    %306 = vector.broadcast %305 : vector<2x1xf32> to vector<2x128xf32>
    %307 = arith.cmpf oeq, %286, %306 : vector<2x128xf32>
    %c128_i32 = arith.constant 128 : i32
    %308 = vector.broadcast %c128_i32 : i32 to vector<2x128xi32>
    %309 = arith.select %307, %303, %308 : vector<2x128xi1>, vector<2x128xi32>
    %cst_95 = arith.constant dense<2147483647> : vector<2xi32>
    %310 = vector.multi_reduction <minsi>, %309, %cst_95 [1] : vector<2x128xi32> to vector<2xi32>
    %311 = vector.shape_cast %310 : vector<2xi32> to vector<2x1xi32>
    %312 = vector.broadcast %311 : vector<2x1xi32> to vector<2x128xi32>
    %313 = arith.cmpi eq, %303, %312 : vector<2x128xi32>
    %314 = arith.extui %313 : vector<2x128xi1> to vector<2x128xi32>
    %315 = arith.sitofp %314 : vector<2x128xi32> to vector<2x128xf32>
    %cst_96 = arith.constant dense<0.000000e+00> : vector<2x16xf32>
    %316 = tpu.matmul %315, %8, %cst_96 {dimension_numbers = #tpu.dot_dimension_numbers<[1], [0], [0], [1], [0, 0, 1, 1], [], []>} : vector<2x128xf32>, vector<128x16xf32>, vector<2x16xf32> -> vector<2x16xf32>
    %317 = vector.broadcast %302 : f32 to vector<2x16xf32>
    %318 = arith.mulf %317, %316 : vector<2x16xf32>
    %319 = arith.addf %301, %318 : vector<2x16xf32>
    %c1_i32_97 = arith.constant 1 : i32
    %cst_98 = arith.constant dense<0.000000e+00> : vector<2x128xf32>
    %320 = tpu.matmul %319, %3, %cst_98 {dimension_numbers = #tpu.dot_dimension_numbers<[1], [0], [0], [1], [0, 0, 1, 1], [], []>} : vector<2x16xf32>, vector<16x128xf32>, vector<2x128xf32> -> vector<2x128xf32>
    %cst_99 = arith.constant dense<0.000000e+00> : vector<2x128xf32>
    %321 = tpu.matmul %283, %4, %cst_99 {dimension_numbers = #tpu.dot_dimension_numbers<[1], [0], [0], [1], [0, 0, 1, 1], [], []>} : vector<2x32xf32>, vector<32x128xf32>, vector<2x128xf32> -> vector<2x128xf32>
    %322 = arith.addf %320, %321 : vector<2x128xf32>
    %323 = vector.broadcast %5 : vector<1x128xf32> to vector<2x128xf32>
    %324 = arith.addf %322, %323 : vector<2x128xf32>
    %325 = tpu.iota {dimensions = array<i32: 1>} : vector<2x128xi32>
    %c64_i32_100 = arith.constant 64 : i32
    %326 = vector.broadcast %c64_i32_100 : i32 to vector<2x128xi32>
    %327 = arith.cmpi sge, %325, %326 : vector<2x128xi32>
    %c96_i32_101 = arith.constant 96 : i32
    %328 = vector.broadcast %c96_i32_101 : i32 to vector<2x128xi32>
    %329 = arith.cmpi slt, %325, %328 : vector<2x128xi32>
    %330 = arith.andi %327, %329 : vector<2x128xi1>
    %331 = math.tanh %324 : vector<2x128xf32>
    %332 = arith.negf %324 : vector<2x128xf32>
    %333 = math.exp %332 : vector<2x128xf32>
    %cst_102 = arith.constant 1.000000e+00 : f32
    %334 = vector.broadcast %cst_102 : f32 to vector<2x128xf32>
    %335 = arith.addf %334, %333 : vector<2x128xf32>
    %336 = arith.divf %334, %335 : vector<2x128xf32>
    %337 = arith.select %330, %331, %336 : vector<2x128xi1>, vector<2x128xf32>
    %338 = vector.extract_strided_slice %337 {offsets = [0, 0], sizes = [2, 32], strides = [1, 1]} : vector<2x128xf32> to vector<2x32xf32>
    %339 = vector.extract_strided_slice %337 {offsets = [0, 32], sizes = [2, 32], strides = [1, 1]} : vector<2x128xf32> to vector<2x32xf32>
    %340 = vector.extract_strided_slice %337 {offsets = [0, 64], sizes = [2, 32], strides = [1, 1]} : vector<2x128xf32> to vector<2x32xf32>
    %341 = vector.extract_strided_slice %337 {offsets = [0, 96], sizes = [2, 32], strides = [1, 1]} : vector<2x128xf32> to vector<2x32xf32>
    %342 = arith.mulf %339, %281 : vector<2x32xf32>
    %343 = arith.mulf %338, %340 : vector<2x32xf32>
    %344 = arith.addf %342, %343 : vector<2x32xf32>
    %345 = math.tanh %344 : vector<2x32xf32>
    %346 = arith.mulf %341, %345 : vector<2x32xf32>
    %cst_103 = arith.constant dense<0.000000e+00> : vector<2x128xf32>
    %347 = tpu.matmul %346, %6, %cst_103 {dimension_numbers = #tpu.dot_dimension_numbers<[1], [0], [0], [1], [0, 0, 1, 1], [], []>} : vector<2x32xf32>, vector<32x128xf32>, vector<2x128xf32> -> vector<2x128xf32>
    %348 = vector.broadcast %7 : vector<1x128xf32> to vector<2x128xf32>
    %349 = arith.addf %347, %348 : vector<2x128xf32>
    %c1_i32_104 = arith.constant 1 : i32
    %350 = arith.addi %c1_i32_97, %c1_i32_104 : i32
    %351 = arith.index_cast %350 : i32 to index
    %c0_105 = arith.constant 0 : index
    %c0_106 = arith.constant 0 : index
    %352 = vector.load %arg13[%351, %c0_105, %c0_106] : memref<8x2x128xf32, #tpu.memory_space<vmem>>, vector<1x2x128xf32>
    %353 = vector.shape_cast %352 : vector<1x2x128xf32> to vector<2x128xf32>
    %354 = vector.shape_cast %349 : vector<2x128xf32> to vector<1x2x128xf32>
    tpu.vector_store %arg13[%351, %c0_105, %c0_106], %354 {strides = array<i32>} : memref<8x2x128xf32, #tpu.memory_space<vmem>>, vector<1x2x128xf32>,
    %c1_i32_107 = arith.constant 1 : i32
    %355 = arith.addi %c1_i32_97, %c1_i32_107 : i32
    %356 = arith.index_cast %355 : i32 to index
    %357 = memref.load %arg1[%356] : memref<7xi32, #tpu.memory_space<smem>>
    %358 = arith.sitofp %357 : i32 to f32
    %c1_i32_108 = arith.constant 1 : i32
    %359 = arith.addi %c1_i32_97, %c1_i32_108 : i32
    %360 = arith.index_cast %359 : i32 to index
    %c0_109 = arith.constant 0 : index
    %c0_110 = arith.constant 0 : index
    %361 = vector.load %arg3[%360, %c0_109, %c0_110] : memref<8x2x16xf32, #tpu.memory_space<vmem>>, vector<1x2x16xf32>
    %362 = vector.shape_cast %361 : vector<1x2x16xf32> to vector<2x16xf32>
    %363 = vector.broadcast %358 : f32 to vector<2x16xf32>
    %364 = arith.mulf %363, %362 : vector<2x16xf32>
    %cst_111 = arith.constant 1.000000e+00 : f32
    %365 = arith.subf %cst_111, %358 : f32
    %366 = tpu.iota {dimensions = array<i32: 1>} : vector<2x128xi32>
    %cst_112 = arith.constant dense<0xFF800000> : vector<2xf32>
    %367 = vector.multi_reduction <maximumf>, %349, %cst_112 [1] : vector<2x128xf32> to vector<2xf32>
    %368 = vector.shape_cast %367 : vector<2xf32> to vector<2x1xf32>
    %369 = vector.broadcast %368 : vector<2x1xf32> to vector<2x128xf32>
    %370 = arith.cmpf oeq, %349, %369 : vector<2x128xf32>
    %c128_i32_113 = arith.constant 128 : i32
    %371 = vector.broadcast %c128_i32_113 : i32 to vector<2x128xi32>
    %372 = arith.select %370, %366, %371 : vector<2x128xi1>, vector<2x128xi32>
    %cst_114 = arith.constant dense<2147483647> : vector<2xi32>
    %373 = vector.multi_reduction <minsi>, %372, %cst_114 [1] : vector<2x128xi32> to vector<2xi32>
    %374 = vector.shape_cast %373 : vector<2xi32> to vector<2x1xi32>
    %375 = vector.broadcast %374 : vector<2x1xi32> to vector<2x128xi32>
    %376 = arith.cmpi eq, %366, %375 : vector<2x128xi32>
    %377 = arith.extui %376 : vector<2x128xi1> to vector<2x128xi32>
    %378 = arith.sitofp %377 : vector<2x128xi32> to vector<2x128xf32>
    %cst_115 = arith.constant dense<0.000000e+00> : vector<2x16xf32>
    %379 = tpu.matmul %378, %8, %cst_115 {dimension_numbers = #tpu.dot_dimension_numbers<[1], [0], [0], [1], [0, 0, 1, 1], [], []>} : vector<2x128xf32>, vector<128x16xf32>, vector<2x16xf32> -> vector<2x16xf32>
    %380 = vector.broadcast %365 : f32 to vector<2x16xf32>
    %381 = arith.mulf %380, %379 : vector<2x16xf32>
    %382 = arith.addf %364, %381 : vector<2x16xf32>
    %c2_i32_116 = arith.constant 2 : i32
    %cst_117 = arith.constant dense<0.000000e+00> : vector<2x128xf32>
    %383 = tpu.matmul %382, %3, %cst_117 {dimension_numbers = #tpu.dot_dimension_numbers<[1], [0], [0], [1], [0, 0, 1, 1], [], []>} : vector<2x16xf32>, vector<16x128xf32>, vector<2x128xf32> -> vector<2x128xf32>
    %cst_118 = arith.constant dense<0.000000e+00> : vector<2x128xf32>
    %384 = tpu.matmul %346, %4, %cst_118 {dimension_numbers = #tpu.dot_dimension_numbers<[1], [0], [0], [1], [0, 0, 1, 1], [], []>} : vector<2x32xf32>, vector<32x128xf32>, vector<2x128xf32> -> vector<2x128xf32>
    %385 = arith.addf %383, %384 : vector<2x128xf32>
    %386 = vector.broadcast %5 : vector<1x128xf32> to vector<2x128xf32>
    %387 = arith.addf %385, %386 : vector<2x128xf32>
    %388 = tpu.iota {dimensions = array<i32: 1>} : vector<2x128xi32>
    %c64_i32_119 = arith.constant 64 : i32
    %389 = vector.broadcast %c64_i32_119 : i32 to vector<2x128xi32>
    %390 = arith.cmpi sge, %388, %389 : vector<2x128xi32>
    %c96_i32_120 = arith.constant 96 : i32
    %391 = vector.broadcast %c96_i32_120 : i32 to vector<2x128xi32>
    %392 = arith.cmpi slt, %388, %391 : vector<2x128xi32>
    %393 = arith.andi %390, %392 : vector<2x128xi1>
    %394 = math.tanh %387 : vector<2x128xf32>
    %395 = arith.negf %387 : vector<2x128xf32>
    %396 = math.exp %395 : vector<2x128xf32>
    %cst_121 = arith.constant 1.000000e+00 : f32
    %397 = vector.broadcast %cst_121 : f32 to vector<2x128xf32>
    %398 = arith.addf %397, %396 : vector<2x128xf32>
    %399 = arith.divf %397, %398 : vector<2x128xf32>
    %400 = arith.select %393, %394, %399 : vector<2x128xi1>, vector<2x128xf32>
    %401 = vector.extract_strided_slice %400 {offsets = [0, 0], sizes = [2, 32], strides = [1, 1]} : vector<2x128xf32> to vector<2x32xf32>
    %402 = vector.extract_strided_slice %400 {offsets = [0, 32], sizes = [2, 32], strides = [1, 1]} : vector<2x128xf32> to vector<2x32xf32>
    %403 = vector.extract_strided_slice %400 {offsets = [0, 64], sizes = [2, 32], strides = [1, 1]} : vector<2x128xf32> to vector<2x32xf32>
    %404 = vector.extract_strided_slice %400 {offsets = [0, 96], sizes = [2, 32], strides = [1, 1]} : vector<2x128xf32> to vector<2x32xf32>
    %405 = arith.mulf %402, %344 : vector<2x32xf32>
    %406 = arith.mulf %401, %403 : vector<2x32xf32>
    %407 = arith.addf %405, %406 : vector<2x32xf32>
    %408 = math.tanh %407 : vector<2x32xf32>
    %409 = arith.mulf %404, %408 : vector<2x32xf32>
    %cst_122 = arith.constant dense<0.000000e+00> : vector<2x128xf32>
    %410 = tpu.matmul %409, %6, %cst_122 {dimension_numbers = #tpu.dot_dimension_numbers<[1], [0], [0], [1], [0, 0, 1, 1], [], []>} : vector<2x32xf32>, vector<32x128xf32>, vector<2x128xf32> -> vector<2x128xf32>
    %411 = vector.broadcast %7 : vector<1x128xf32> to vector<2x128xf32>
    %412 = arith.addf %410, %411 : vector<2x128xf32>
    %c1_i32_123 = arith.constant 1 : i32
    %413 = arith.addi %c2_i32_116, %c1_i32_123 : i32
    %414 = arith.index_cast %413 : i32 to index
    %c0_124 = arith.constant 0 : index
    %c0_125 = arith.constant 0 : index
    %415 = vector.load %arg13[%414, %c0_124, %c0_125] : memref<8x2x128xf32, #tpu.memory_space<vmem>>, vector<1x2x128xf32>
    %416 = vector.shape_cast %415 : vector<1x2x128xf32> to vector<2x128xf32>
    %417 = vector.shape_cast %412 : vector<2x128xf32> to vector<1x2x128xf32>
    tpu.vector_store %arg13[%414, %c0_124, %c0_125], %417 {strides = array<i32>} : memref<8x2x128xf32, #tpu.memory_space<vmem>>, vector<1x2x128xf32>,
    %c1_i32_126 = arith.constant 1 : i32
    %418 = arith.addi %c2_i32_116, %c1_i32_126 : i32
    %419 = arith.index_cast %418 : i32 to index
    %420 = memref.load %arg1[%419] : memref<7xi32, #tpu.memory_space<smem>>
    %421 = arith.sitofp %420 : i32 to f32
    %c1_i32_127 = arith.constant 1 : i32
    %422 = arith.addi %c2_i32_116, %c1_i32_127 : i32
    %423 = arith.index_cast %422 : i32 to index
    %c0_128 = arith.constant 0 : index
    %c0_129 = arith.constant 0 : index
    %424 = vector.load %arg3[%423, %c0_128, %c0_129] : memref<8x2x16xf32, #tpu.memory_space<vmem>>, vector<1x2x16xf32>
    %425 = vector.shape_cast %424 : vector<1x2x16xf32> to vector<2x16xf32>
    %426 = vector.broadcast %421 : f32 to vector<2x16xf32>
    %427 = arith.mulf %426, %425 : vector<2x16xf32>
    %cst_130 = arith.constant 1.000000e+00 : f32
    %428 = arith.subf %cst_130, %421 : f32
    %429 = tpu.iota {dimensions = array<i32: 1>} : vector<2x128xi32>
    %cst_131 = arith.constant dense<0xFF800000> : vector<2xf32>
    %430 = vector.multi_reduction <maximumf>, %412, %cst_131 [1] : vector<2x128xf32> to vector<2xf32>
    %431 = vector.shape_cast %430 : vector<2xf32> to vector<2x1xf32>
    %432 = vector.broadcast %431 : vector<2x1xf32> to vector<2x128xf32>
    %433 = arith.cmpf oeq, %412, %432 : vector<2x128xf32>
    %c128_i32_132 = arith.constant 128 : i32
    %434 = vector.broadcast %c128_i32_132 : i32 to vector<2x128xi32>
    %435 = arith.select %433, %429, %434 : vector<2x128xi1>, vector<2x128xi32>
    %cst_133 = arith.constant dense<2147483647> : vector<2xi32>
    %436 = vector.multi_reduction <minsi>, %435, %cst_133 [1] : vector<2x128xi32> to vector<2xi32>
    %437 = vector.shape_cast %436 : vector<2xi32> to vector<2x1xi32>
    %438 = vector.broadcast %437 : vector<2x1xi32> to vector<2x128xi32>
    %439 = arith.cmpi eq, %429, %438 : vector<2x128xi32>
    %440 = arith.extui %439 : vector<2x128xi1> to vector<2x128xi32>
    %441 = arith.sitofp %440 : vector<2x128xi32> to vector<2x128xf32>
    %cst_134 = arith.constant dense<0.000000e+00> : vector<2x16xf32>
    %442 = tpu.matmul %441, %8, %cst_134 {dimension_numbers = #tpu.dot_dimension_numbers<[1], [0], [0], [1], [0, 0, 1, 1], [], []>} : vector<2x128xf32>, vector<128x16xf32>, vector<2x16xf32> -> vector<2x16xf32>
    %443 = vector.broadcast %428 : f32 to vector<2x16xf32>
    %444 = arith.mulf %443, %442 : vector<2x16xf32>
    %445 = arith.addf %427, %444 : vector<2x16xf32>
    %c3_i32_135 = arith.constant 3 : i32
    %cst_136 = arith.constant dense<0.000000e+00> : vector<2x128xf32>
    %446 = tpu.matmul %445, %3, %cst_136 {dimension_numbers = #tpu.dot_dimension_numbers<[1], [0], [0], [1], [0, 0, 1, 1], [], []>} : vector<2x16xf32>, vector<16x128xf32>, vector<2x128xf32> -> vector<2x128xf32>
    %cst_137 = arith.constant dense<0.000000e+00> : vector<2x128xf32>
    %447 = tpu.matmul %409, %4, %cst_137 {dimension_numbers = #tpu.dot_dimension_numbers<[1], [0], [0], [1], [0, 0, 1, 1], [], []>} : vector<2x32xf32>, vector<32x128xf32>, vector<2x128xf32> -> vector<2x128xf32>
    %448 = arith.addf %446, %447 : vector<2x128xf32>
    %449 = vector.broadcast %5 : vector<1x128xf32> to vector<2x128xf32>
    %450 = arith.addf %448, %449 : vector<2x128xf32>
    %451 = tpu.iota {dimensions = array<i32: 1>} : vector<2x128xi32>
    %c64_i32_138 = arith.constant 64 : i32
    %452 = vector.broadcast %c64_i32_138 : i32 to vector<2x128xi32>
    %453 = arith.cmpi sge, %451, %452 : vector<2x128xi32>
    %c96_i32_139 = arith.constant 96 : i32
    %454 = vector.broadcast %c96_i32_139 : i32 to vector<2x128xi32>
    %455 = arith.cmpi slt, %451, %454 : vector<2x128xi32>
    %456 = arith.andi %453, %455 : vector<2x128xi1>
    %457 = math.tanh %450 : vector<2x128xf32>
    %458 = arith.negf %450 : vector<2x128xf32>
    %459 = math.exp %458 : vector<2x128xf32>
    %cst_140 = arith.constant 1.000000e+00 : f32
    %460 = vector.broadcast %cst_140 : f32 to vector<2x128xf32>
    %461 = arith.addf %460, %459 : vector<2x128xf32>
    %462 = arith.divf %460, %461 : vector<2x128xf32>
    %463 = arith.select %456, %457, %462 : vector<2x128xi1>, vector<2x128xf32>
    %464 = vector.extract_strided_slice %463 {offsets = [0, 0], sizes = [2, 32], strides = [1, 1]} : vector<2x128xf32> to vector<2x32xf32>
    %465 = vector.extract_strided_slice %463 {offsets = [0, 32], sizes = [2, 32], strides = [1, 1]} : vector<2x128xf32> to vector<2x32xf32>
    %466 = vector.extract_strided_slice %463 {offsets = [0, 64], sizes = [2, 32], strides = [1, 1]} : vector<2x128xf32> to vector<2x32xf32>
    %467 = vector.extract_strided_slice %463 {offsets = [0, 96], sizes = [2, 32], strides = [1, 1]} : vector<2x128xf32> to vector<2x32xf32>
    %468 = arith.mulf %465, %407 : vector<2x32xf32>
    %469 = arith.mulf %464, %466 : vector<2x32xf32>
    %470 = arith.addf %468, %469 : vector<2x32xf32>
    %471 = math.tanh %470 : vector<2x32xf32>
    %472 = arith.mulf %467, %471 : vector<2x32xf32>
    %cst_141 = arith.constant dense<0.000000e+00> : vector<2x128xf32>
    %473 = tpu.matmul %472, %6, %cst_141 {dimension_numbers = #tpu.dot_dimension_numbers<[1], [0], [0], [1], [0, 0, 1, 1], [], []>} : vector<2x32xf32>, vector<32x128xf32>, vector<2x128xf32> -> vector<2x128xf32>
    %474 = vector.broadcast %7 : vector<1x128xf32> to vector<2x128xf32>
    %475 = arith.addf %473, %474 : vector<2x128xf32>
    %c1_i32_142 = arith.constant 1 : i32
    %476 = arith.addi %c3_i32_135, %c1_i32_142 : i32
    %477 = arith.index_cast %476 : i32 to index
    %c0_143 = arith.constant 0 : index
    %c0_144 = arith.constant 0 : index
    %478 = vector.load %arg13[%477, %c0_143, %c0_144] : memref<8x2x128xf32, #tpu.memory_space<vmem>>, vector<1x2x128xf32>
    %479 = vector.shape_cast %478 : vector<1x2x128xf32> to vector<2x128xf32>
    %480 = vector.shape_cast %475 : vector<2x128xf32> to vector<1x2x128xf32>
    tpu.vector_store %arg13[%477, %c0_143, %c0_144], %480 {strides = array<i32>} : memref<8x2x128xf32, #tpu.memory_space<vmem>>, vector<1x2x128xf32>,
    %c1_i32_145 = arith.constant 1 : i32
    %481 = arith.addi %c3_i32_135, %c1_i32_145 : i32
    %482 = arith.index_cast %481 : i32 to index
    %483 = memref.load %arg1[%482] : memref<7xi32, #tpu.memory_space<smem>>
    %484 = arith.sitofp %483 : i32 to f32
    %c1_i32_146 = arith.constant 1 : i32
    %485 = arith.addi %c3_i32_135, %c1_i32_146 : i32
    %486 = arith.index_cast %485 : i32 to index
    %c0_147 = arith.constant 0 : index
    %c0_148 = arith.constant 0 : index
    %487 = vector.load %arg3[%486, %c0_147, %c0_148] : memref<8x2x16xf32, #tpu.memory_space<vmem>>, vector<1x2x16xf32>
    %488 = vector.shape_cast %487 : vector<1x2x16xf32> to vector<2x16xf32>
    %489 = vector.broadcast %484 : f32 to vector<2x16xf32>
    %490 = arith.mulf %489, %488 : vector<2x16xf32>
    %cst_149 = arith.constant 1.000000e+00 : f32
    %491 = arith.subf %cst_149, %484 : f32
    %492 = tpu.iota {dimensions = array<i32: 1>} : vector<2x128xi32>
    %cst_150 = arith.constant dense<0xFF800000> : vector<2xf32>
    %493 = vector.multi_reduction <maximumf>, %475, %cst_150 [1] : vector<2x128xf32> to vector<2xf32>
    %494 = vector.shape_cast %493 : vector<2xf32> to vector<2x1xf32>
    %495 = vector.broadcast %494 : vector<2x1xf32> to vector<2x128xf32>
    %496 = arith.cmpf oeq, %475, %495 : vector<2x128xf32>
    %c128_i32_151 = arith.constant 128 : i32
    %497 = vector.broadcast %c128_i32_151 : i32 to vector<2x128xi32>
    %498 = arith.select %496, %492, %497 : vector<2x128xi1>, vector<2x128xi32>
    %cst_152 = arith.constant dense<2147483647> : vector<2xi32>
    %499 = vector.multi_reduction <minsi>, %498, %cst_152 [1] : vector<2x128xi32> to vector<2xi32>
    %500 = vector.shape_cast %499 : vector<2xi32> to vector<2x1xi32>
    %501 = vector.broadcast %500 : vector<2x1xi32> to vector<2x128xi32>
    %502 = arith.cmpi eq, %492, %501 : vector<2x128xi32>
    %503 = arith.extui %502 : vector<2x128xi1> to vector<2x128xi32>
    %504 = arith.sitofp %503 : vector<2x128xi32> to vector<2x128xf32>
    %cst_153 = arith.constant dense<0.000000e+00> : vector<2x16xf32>
    %505 = tpu.matmul %504, %8, %cst_153 {dimension_numbers = #tpu.dot_dimension_numbers<[1], [0], [0], [1], [0, 0, 1, 1], [], []>} : vector<2x128xf32>, vector<128x16xf32>, vector<2x16xf32> -> vector<2x16xf32>
    %506 = vector.broadcast %491 : f32 to vector<2x16xf32>
    %507 = arith.mulf %506, %505 : vector<2x16xf32>
    %508 = arith.addf %490, %507 : vector<2x16xf32>
    %c4_i32_154 = arith.constant 4 : i32
    %cst_155 = arith.constant dense<0.000000e+00> : vector<2x128xf32>
    %509 = tpu.matmul %508, %3, %cst_155 {dimension_numbers = #tpu.dot_dimension_numbers<[1], [0], [0], [1], [0, 0, 1, 1], [], []>} : vector<2x16xf32>, vector<16x128xf32>, vector<2x128xf32> -> vector<2x128xf32>
    %cst_156 = arith.constant dense<0.000000e+00> : vector<2x128xf32>
    %510 = tpu.matmul %472, %4, %cst_156 {dimension_numbers = #tpu.dot_dimension_numbers<[1], [0], [0], [1], [0, 0, 1, 1], [], []>} : vector<2x32xf32>, vector<32x128xf32>, vector<2x128xf32> -> vector<2x128xf32>
    %511 = arith.addf %509, %510 : vector<2x128xf32>
    %512 = vector.broadcast %5 : vector<1x128xf32> to vector<2x128xf32>
    %513 = arith.addf %511, %512 : vector<2x128xf32>
    %514 = tpu.iota {dimensions = array<i32: 1>} : vector<2x128xi32>
    %c64_i32_157 = arith.constant 64 : i32
    %515 = vector.broadcast %c64_i32_157 : i32 to vector<2x128xi32>
    %516 = arith.cmpi sge, %514, %515 : vector<2x128xi32>
    %c96_i32_158 = arith.constant 96 : i32
    %517 = vector.broadcast %c96_i32_158 : i32 to vector<2x128xi32>
    %518 = arith.cmpi slt, %514, %517 : vector<2x128xi32>
    %519 = arith.andi %516, %518 : vector<2x128xi1>
    %520 = math.tanh %513 : vector<2x128xf32>
    %521 = arith.negf %513 : vector<2x128xf32>
    %522 = math.exp %521 : vector<2x128xf32>
    %cst_159 = arith.constant 1.000000e+00 : f32
    %523 = vector.broadcast %cst_159 : f32 to vector<2x128xf32>
    %524 = arith.addf %523, %522 : vector<2x128xf32>
    %525 = arith.divf %523, %524 : vector<2x128xf32>
    %526 = arith.select %519, %520, %525 : vector<2x128xi1>, vector<2x128xf32>
    %527 = vector.extract_strided_slice %526 {offsets = [0, 0], sizes = [2, 32], strides = [1, 1]} : vector<2x128xf32> to vector<2x32xf32>
    %528 = vector.extract_strided_slice %526 {offsets = [0, 32], sizes = [2, 32], strides = [1, 1]} : vector<2x128xf32> to vector<2x32xf32>
    %529 = vector.extract_strided_slice %526 {offsets = [0, 64], sizes = [2, 32], strides = [1, 1]} : vector<2x128xf32> to vector<2x32xf32>
    %530 = vector.extract_strided_slice %526 {offsets = [0, 96], sizes = [2, 32], strides = [1, 1]} : vector<2x128xf32> to vector<2x32xf32>
    %531 = arith.mulf %528, %470 : vector<2x32xf32>
    %532 = arith.mulf %527, %529 : vector<2x32xf32>
    %533 = arith.addf %531, %532 : vector<2x32xf32>
    %534 = math.tanh %533 : vector<2x32xf32>
    %535 = arith.mulf %530, %534 : vector<2x32xf32>
    %cst_160 = arith.constant dense<0.000000e+00> : vector<2x128xf32>
    %536 = tpu.matmul %535, %6, %cst_160 {dimension_numbers = #tpu.dot_dimension_numbers<[1], [0], [0], [1], [0, 0, 1, 1], [], []>} : vector<2x32xf32>, vector<32x128xf32>, vector<2x128xf32> -> vector<2x128xf32>
    %537 = vector.broadcast %7 : vector<1x128xf32> to vector<2x128xf32>
    %538 = arith.addf %536, %537 : vector<2x128xf32>
    %c1_i32_161 = arith.constant 1 : i32
    %539 = arith.addi %c4_i32_154, %c1_i32_161 : i32
    %540 = arith.index_cast %539 : i32 to index
    %c0_162 = arith.constant 0 : index
    %c0_163 = arith.constant 0 : index
    %541 = vector.load %arg13[%540, %c0_162, %c0_163] : memref<8x2x128xf32, #tpu.memory_space<vmem>>, vector<1x2x128xf32>
    %542 = vector.shape_cast %541 : vector<1x2x128xf32> to vector<2x128xf32>
    %543 = vector.shape_cast %538 : vector<2x128xf32> to vector<1x2x128xf32>
    tpu.vector_store %arg13[%540, %c0_162, %c0_163], %543 {strides = array<i32>} : memref<8x2x128xf32, #tpu.memory_space<vmem>>, vector<1x2x128xf32>,
    %c1_i32_164 = arith.constant 1 : i32
    %544 = arith.addi %c4_i32_154, %c1_i32_164 : i32
    %545 = arith.index_cast %544 : i32 to index
    %546 = memref.load %arg1[%545] : memref<7xi32, #tpu.memory_space<smem>>
    %547 = arith.sitofp %546 : i32 to f32
    %c1_i32_165 = arith.constant 1 : i32
    %548 = arith.addi %c4_i32_154, %c1_i32_165 : i32
    %549 = arith.index_cast %548 : i32 to index
    %c0_166 = arith.constant 0 : index
    %c0_167 = arith.constant 0 : index
    %550 = vector.load %arg3[%549, %c0_166, %c0_167] : memref<8x2x16xf32, #tpu.memory_space<vmem>>, vector<1x2x16xf32>
    %551 = vector.shape_cast %550 : vector<1x2x16xf32> to vector<2x16xf32>
    %552 = vector.broadcast %547 : f32 to vector<2x16xf32>
    %553 = arith.mulf %552, %551 : vector<2x16xf32>
    %cst_168 = arith.constant 1.000000e+00 : f32
    %554 = arith.subf %cst_168, %547 : f32
    %555 = tpu.iota {dimensions = array<i32: 1>} : vector<2x128xi32>
    %cst_169 = arith.constant dense<0xFF800000> : vector<2xf32>
    %556 = vector.multi_reduction <maximumf>, %538, %cst_169 [1] : vector<2x128xf32> to vector<2xf32>
    %557 = vector.shape_cast %556 : vector<2xf32> to vector<2x1xf32>
    %558 = vector.broadcast %557 : vector<2x1xf32> to vector<2x128xf32>
    %559 = arith.cmpf oeq, %538, %558 : vector<2x128xf32>
    %c128_i32_170 = arith.constant 128 : i32
    %560 = vector.broadcast %c128_i32_170 : i32 to vector<2x128xi32>
    %561 = arith.select %559, %555, %560 : vector<2x128xi1>, vector<2x128xi32>
    %cst_171 = arith.constant dense<2147483647> : vector<2xi32>
    %562 = vector.multi_reduction <minsi>, %561, %cst_171 [1] : vector<2x128xi32> to vector<2xi32>
    %563 = vector.shape_cast %562 : vector<2xi32> to vector<2x1xi32>
    %564 = vector.broadcast %563 : vector<2x1xi32> to vector<2x128xi32>
    %565 = arith.cmpi eq, %555, %564 : vector<2x128xi32>
    %566 = arith.extui %565 : vector<2x128xi1> to vector<2x128xi32>
    %567 = arith.sitofp %566 : vector<2x128xi32> to vector<2x128xf32>
    %cst_172 = arith.constant dense<0.000000e+00> : vector<2x16xf32>
    %568 = tpu.matmul %567, %8, %cst_172 {dimension_numbers = #tpu.dot_dimension_numbers<[1], [0], [0], [1], [0, 0, 1, 1], [], []>} : vector<2x128xf32>, vector<128x16xf32>, vector<2x16xf32> -> vector<2x16xf32>
    %569 = vector.broadcast %554 : f32 to vector<2x16xf32>
    %570 = arith.mulf %569, %568 : vector<2x16xf32>
    %571 = arith.addf %553, %570 : vector<2x16xf32>
    %c5_i32_173 = arith.constant 5 : i32
    %cst_174 = arith.constant dense<0.000000e+00> : vector<2x128xf32>
    %572 = tpu.matmul %571, %3, %cst_174 {dimension_numbers = #tpu.dot_dimension_numbers<[1], [0], [0], [1], [0, 0, 1, 1], [], []>} : vector<2x16xf32>, vector<16x128xf32>, vector<2x128xf32> -> vector<2x128xf32>
    %cst_175 = arith.constant dense<0.000000e+00> : vector<2x128xf32>
    %573 = tpu.matmul %535, %4, %cst_175 {dimension_numbers = #tpu.dot_dimension_numbers<[1], [0], [0], [1], [0, 0, 1, 1], [], []>} : vector<2x32xf32>, vector<32x128xf32>, vector<2x128xf32> -> vector<2x128xf32>
    %574 = arith.addf %572, %573 : vector<2x128xf32>
    %575 = vector.broadcast %5 : vector<1x128xf32> to vector<2x128xf32>
    %576 = arith.addf %574, %575 : vector<2x128xf32>
    %577 = tpu.iota {dimensions = array<i32: 1>} : vector<2x128xi32>
    %c64_i32_176 = arith.constant 64 : i32
    %578 = vector.broadcast %c64_i32_176 : i32 to vector<2x128xi32>
    %579 = arith.cmpi sge, %577, %578 : vector<2x128xi32>
    %c96_i32_177 = arith.constant 96 : i32
    %580 = vector.broadcast %c96_i32_177 : i32 to vector<2x128xi32>
    %581 = arith.cmpi slt, %577, %580 : vector<2x128xi32>
    %582 = arith.andi %579, %581 : vector<2x128xi1>
    %583 = math.tanh %576 : vector<2x128xf32>
    %584 = arith.negf %576 : vector<2x128xf32>
    %585 = math.exp %584 : vector<2x128xf32>
    %cst_178 = arith.constant 1.000000e+00 : f32
    %586 = vector.broadcast %cst_178 : f32 to vector<2x128xf32>
    %587 = arith.addf %586, %585 : vector<2x128xf32>
    %588 = arith.divf %586, %587 : vector<2x128xf32>
    %589 = arith.select %582, %583, %588 : vector<2x128xi1>, vector<2x128xf32>
    %590 = vector.extract_strided_slice %589 {offsets = [0, 0], sizes = [2, 32], strides = [1, 1]} : vector<2x128xf32> to vector<2x32xf32>
    %591 = vector.extract_strided_slice %589 {offsets = [0, 32], sizes = [2, 32], strides = [1, 1]} : vector<2x128xf32> to vector<2x32xf32>
    %592 = vector.extract_strided_slice %589 {offsets = [0, 64], sizes = [2, 32], strides = [1, 1]} : vector<2x128xf32> to vector<2x32xf32>
    %593 = vector.extract_strided_slice %589 {offsets = [0, 96], sizes = [2, 32], strides = [1, 1]} : vector<2x128xf32> to vector<2x32xf32>
    %594 = arith.mulf %591, %533 : vector<2x32xf32>
    %595 = arith.mulf %590, %592 : vector<2x32xf32>
    %596 = arith.addf %594, %595 : vector<2x32xf32>
    %597 = math.tanh %596 : vector<2x32xf32>
    %598 = arith.mulf %593, %597 : vector<2x32xf32>
    %cst_179 = arith.constant dense<0.000000e+00> : vector<2x128xf32>
    %599 = tpu.matmul %598, %6, %cst_179 {dimension_numbers = #tpu.dot_dimension_numbers<[1], [0], [0], [1], [0, 0, 1, 1], [], []>} : vector<2x32xf32>, vector<32x128xf32>, vector<2x128xf32> -> vector<2x128xf32>
    %600 = vector.broadcast %7 : vector<1x128xf32> to vector<2x128xf32>
    %601 = arith.addf %599, %600 : vector<2x128xf32>
    %c1_i32_180 = arith.constant 1 : i32
    %602 = arith.addi %c5_i32_173, %c1_i32_180 : i32
    %603 = arith.index_cast %602 : i32 to index
    %c0_181 = arith.constant 0 : index
    %c0_182 = arith.constant 0 : index
    %604 = vector.load %arg13[%603, %c0_181, %c0_182] : memref<8x2x128xf32, #tpu.memory_space<vmem>>, vector<1x2x128xf32>
    %605 = vector.shape_cast %604 : vector<1x2x128xf32> to vector<2x128xf32>
    %606 = vector.shape_cast %601 : vector<2x128xf32> to vector<1x2x128xf32>
    tpu.vector_store %arg13[%603, %c0_181, %c0_182], %606 {strides = array<i32>} : memref<8x2x128xf32, #tpu.memory_space<vmem>>, vector<1x2x128xf32>,
    %c1_i32_183 = arith.constant 1 : i32
    %607 = arith.addi %c5_i32_173, %c1_i32_183 : i32
    %608 = arith.index_cast %607 : i32 to index
    %609 = memref.load %arg1[%608] : memref<7xi32, #tpu.memory_space<smem>>
    %610 = arith.sitofp %609 : i32 to f32
    %c1_i32_184 = arith.constant 1 : i32
    %611 = arith.addi %c5_i32_173, %c1_i32_184 : i32
    %612 = arith.index_cast %611 : i32 to index
    %c0_185 = arith.constant 0 : index
    %c0_186 = arith.constant 0 : index
    %613 = vector.load %arg3[%612, %c0_185, %c0_186] : memref<8x2x16xf32, #tpu.memory_space<vmem>>, vector<1x2x16xf32>
    %614 = vector.shape_cast %613 : vector<1x2x16xf32> to vector<2x16xf32>
    %615 = vector.broadcast %610 : f32 to vector<2x16xf32>
    %616 = arith.mulf %615, %614 : vector<2x16xf32>
    %cst_187 = arith.constant 1.000000e+00 : f32
    %617 = arith.subf %cst_187, %610 : f32
    %618 = tpu.iota {dimensions = array<i32: 1>} : vector<2x128xi32>
    %cst_188 = arith.constant dense<0xFF800000> : vector<2xf32>
    %619 = vector.multi_reduction <maximumf>, %601, %cst_188 [1] : vector<2x128xf32> to vector<2xf32>
    %620 = vector.shape_cast %619 : vector<2xf32> to vector<2x1xf32>
    %621 = vector.broadcast %620 : vector<2x1xf32> to vector<2x128xf32>
    %622 = arith.cmpf oeq, %601, %621 : vector<2x128xf32>
    %c128_i32_189 = arith.constant 128 : i32
    %623 = vector.broadcast %c128_i32_189 : i32 to vector<2x128xi32>
    %624 = arith.select %622, %618, %623 : vector<2x128xi1>, vector<2x128xi32>
    %cst_190 = arith.constant dense<2147483647> : vector<2xi32>
    %625 = vector.multi_reduction <minsi>, %624, %cst_190 [1] : vector<2x128xi32> to vector<2xi32>
    %626 = vector.shape_cast %625 : vector<2xi32> to vector<2x1xi32>
    %627 = vector.broadcast %626 : vector<2x1xi32> to vector<2x128xi32>
    %628 = arith.cmpi eq, %618, %627 : vector<2x128xi32>
    %629 = arith.extui %628 : vector<2x128xi1> to vector<2x128xi32>
    %630 = arith.sitofp %629 : vector<2x128xi32> to vector<2x128xf32>
    %cst_191 = arith.constant dense<0.000000e+00> : vector<2x16xf32>
    %631 = tpu.matmul %630, %8, %cst_191 {dimension_numbers = #tpu.dot_dimension_numbers<[1], [0], [0], [1], [0, 0, 1, 1], [], []>} : vector<2x128xf32>, vector<128x16xf32>, vector<2x16xf32> -> vector<2x16xf32>
    %632 = vector.broadcast %617 : f32 to vector<2x16xf32>
    %633 = arith.mulf %632, %631 : vector<2x16xf32>
    %634 = arith.addf %616, %633 : vector<2x16xf32>
    %c6_i32_192 = arith.constant 6 : i32
    %cst_193 = arith.constant dense<0.000000e+00> : vector<2x128xf32>
    %635 = tpu.matmul %634, %3, %cst_193 {dimension_numbers = #tpu.dot_dimension_numbers<[1], [0], [0], [1], [0, 0, 1, 1], [], []>} : vector<2x16xf32>, vector<16x128xf32>, vector<2x128xf32> -> vector<2x128xf32>
    %cst_194 = arith.constant dense<0.000000e+00> : vector<2x128xf32>
    %636 = tpu.matmul %598, %4, %cst_194 {dimension_numbers = #tpu.dot_dimension_numbers<[1], [0], [0], [1], [0, 0, 1, 1], [], []>} : vector<2x32xf32>, vector<32x128xf32>, vector<2x128xf32> -> vector<2x128xf32>
    %637 = arith.addf %635, %636 : vector<2x128xf32>
    %638 = vector.broadcast %5 : vector<1x128xf32> to vector<2x128xf32>
    %639 = arith.addf %637, %638 : vector<2x128xf32>
    %640 = tpu.iota {dimensions = array<i32: 1>} : vector<2x128xi32>
    %c64_i32_195 = arith.constant 64 : i32
    %641 = vector.broadcast %c64_i32_195 : i32 to vector<2x128xi32>
    %642 = arith.cmpi sge, %640, %641 : vector<2x128xi32>
    %c96_i32_196 = arith.constant 96 : i32
    %643 = vector.broadcast %c96_i32_196 : i32 to vector<2x128xi32>
    %644 = arith.cmpi slt, %640, %643 : vector<2x128xi32>
    %645 = arith.andi %642, %644 : vector<2x128xi1>
    %646 = math.tanh %639 : vector<2x128xf32>
    %647 = arith.negf %639 : vector<2x128xf32>
    %648 = math.exp %647 : vector<2x128xf32>
    %cst_197 = arith.constant 1.000000e+00 : f32
    %649 = vector.broadcast %cst_197 : f32 to vector<2x128xf32>
    %650 = arith.addf %649, %648 : vector<2x128xf32>
    %651 = arith.divf %649, %650 : vector<2x128xf32>
    %652 = arith.select %645, %646, %651 : vector<2x128xi1>, vector<2x128xf32>
    %653 = vector.extract_strided_slice %652 {offsets = [0, 0], sizes = [2, 32], strides = [1, 1]} : vector<2x128xf32> to vector<2x32xf32>
    %654 = vector.extract_strided_slice %652 {offsets = [0, 32], sizes = [2, 32], strides = [1, 1]} : vector<2x128xf32> to vector<2x32xf32>
    %655 = vector.extract_strided_slice %652 {offsets = [0, 64], sizes = [2, 32], strides = [1, 1]} : vector<2x128xf32> to vector<2x32xf32>
    %656 = vector.extract_strided_slice %652 {offsets = [0, 96], sizes = [2, 32], strides = [1, 1]} : vector<2x128xf32> to vector<2x32xf32>
    %657 = arith.mulf %654, %596 : vector<2x32xf32>
    %658 = arith.mulf %653, %655 : vector<2x32xf32>
    %659 = arith.addf %657, %658 : vector<2x32xf32>
    %660 = math.tanh %659 : vector<2x32xf32>
    %661 = arith.mulf %656, %660 : vector<2x32xf32>
    %cst_198 = arith.constant dense<0.000000e+00> : vector<2x128xf32>
    %662 = tpu.matmul %661, %6, %cst_198 {dimension_numbers = #tpu.dot_dimension_numbers<[1], [0], [0], [1], [0, 0, 1, 1], [], []>} : vector<2x32xf32>, vector<32x128xf32>, vector<2x128xf32> -> vector<2x128xf32>
    %663 = vector.broadcast %7 : vector<1x128xf32> to vector<2x128xf32>
    %664 = arith.addf %662, %663 : vector<2x128xf32>
    %c7 = arith.constant 7 : index
    %c0_199 = arith.constant 0 : index
    %c0_200 = arith.constant 0 : index
    %665 = vector.load %arg13[%c7, %c0_199, %c0_200] : memref<8x2x128xf32, #tpu.memory_space<vmem>>, vector<1x2x128xf32>
    %666 = vector.shape_cast %665 : vector<1x2x128xf32> to vector<2x128xf32>
    %667 = vector.shape_cast %664 : vector<2x128xf32> to vector<1x2x128xf32>
    tpu.vector_store %arg13[%c7, %c0_199, %c0_200], %667 {strides = array<i32>} : memref<8x2x128xf32, #tpu.memory_space<vmem>>, vector<1x2x128xf32>,
    return
  }
  func.func @transform_0(%arg0: i32, %arg1: memref<7xi32, #tpu.memory_space<smem>>) -> (i32, i32, i32) {
    %c0_i32 = arith.constant 0 : i32
    %c0_i32_0 = arith.constant 0 : i32
    %c0_i32_1 = arith.constant 0 : i32
    %c0_i32_2 = arith.constant 0 : i32
    return %c0_i32, %c0_i32_0, %c0_i32_1 : i32, i32, i32
  }
  func.func @transform_1(%arg0: i32, %arg1: memref<7xi32, #tpu.memory_space<smem>>) -> (i32, i32, i32) {
    %c0_i32 = arith.constant 0 : i32
    %c0_i32_0 = arith.constant 0 : i32
    %c0_i32_1 = arith.constant 0 : i32
    %c0_i32_2 = arith.constant 0 : i32
    return %c0_i32, %c0_i32_0, %c0_i32_1 : i32, i32, i32
  }
  func.func @transform_2(%arg0: i32, %arg1: memref<7xi32, #tpu.memory_space<smem>>) -> (i32, i32) {
    %c0_i32 = arith.constant 0 : i32
    %c0_i32_0 = arith.constant 0 : i32
    %c0_i32_1 = arith.constant 0 : i32
    return %c0_i32, %c0_i32_0 : i32, i32
  }
  func.func @transform_3(%arg0: i32, %arg1: memref<7xi32, #tpu.memory_space<smem>>) -> (i32, i32) {
    %c0_i32 = arith.constant 0 : i32
    %c0_i32_0 = arith.constant 0 : i32
    %c0_i32_1 = arith.constant 0 : i32
    return %c0_i32, %c0_i32_0 : i32, i32
  }
  func.func @transform_4(%arg0: i32, %arg1: memref<7xi32, #tpu.memory_space<smem>>) -> (i32, i32) {
    %c0_i32 = arith.constant 0 : i32
    %c0_i32_0 = arith.constant 0 : i32
    %c0_i32_1 = arith.constant 0 : i32
    return %c0_i32, %c0_i32_0 : i32, i32
  }
  func.func @transform_5(%arg0: i32, %arg1: memref<7xi32, #tpu.memory_space<smem>>) -> (i32, i32) {
    %c0_i32 = arith.constant 0 : i32
    %c0_i32_0 = arith.constant 0 : i32
    %c0_i32_1 = arith.constant 0 : i32
    return %c0_i32, %c0_i32_0 : i32, i32
  }
  func.func @transform_6(%arg0: i32, %arg1: memref<7xi32, #tpu.memory_space<smem>>) -> (i32, i32) {
    %c0_i32 = arith.constant 0 : i32
    %c0_i32_0 = arith.constant 0 : i32
    %c0_i32_1 = arith.constant 0 : i32
    return %c0_i32, %c0_i32_0 : i32, i32
  }
  func.func @transform_7(%arg0: i32, %arg1: memref<7xi32, #tpu.memory_space<smem>>) -> (i32, i32) {
    %c0_i32 = arith.constant 0 : i32
    %c0_i32_0 = arith.constant 0 : i32
    %c0_i32_1 = arith.constant 0 : i32
    return %c0_i32, %c0_i32_0 : i32, i32
  }
  func.func @transform_8(%arg0: i32, %arg1: memref<7xi32, #tpu.memory_space<smem>>) -> (i32, i32) {
    %c0_i32 = arith.constant 0 : i32
    %c0_i32_0 = arith.constant 0 : i32
    %c0_i32_1 = arith.constant 0 : i32
    return %c0_i32, %c0_i32_0 : i32, i32
  }
  func.func @transform_9(%arg0: i32, %arg1: memref<7xi32, #tpu.memory_space<smem>>) -> (i32, i32) {
    %c0_i32 = arith.constant 0 : i32
    %c0_i32_0 = arith.constant 0 : i32
    %c0_i32_1 = arith.constant 0 : i32
    return %c0_i32, %c0_i32_0 : i32, i32
  }
  func.func @transform_10(%arg0: i32, %arg1: memref<7xi32, #tpu.memory_space<smem>>) -> (i32, i32) {
    %c0_i32 = arith.constant 0 : i32
    %c0_i32_0 = arith.constant 0 : i32
    %c0_i32_1 = arith.constant 0 : i32
    return %c0_i32, %c0_i32_0 : i32, i32
  }
  func.func @transform_11(%arg0: i32, %arg1: memref<7xi32, #tpu.memory_space<smem>>) -> (i32, i32, i32) {
    %c0_i32 = arith.constant 0 : i32
    %c0_i32_0 = arith.constant 0 : i32
    %c0_i32_1 = arith.constant 0 : i32
    %c0_i32_2 = arith.constant 0 : i32
    return %c0_i32, %c0_i32_0, %c0_i32_1 : i32, i32, i32
  }
}

</mosaic_0001>

<bundles_post_ra>
// kernel: tpu_custom_call.1
= control target key start
LH: loop header
LB: loop body
LE: loop exit
PB: predicated region body
PF: predicated region fallthrough
CT: control target
= control target key end

     0   :  { %s6073_s0 = inlined_call_operand.hbm [shape: s32[7], index: 0, kind: input, shape index: {}]   ;;  %s6074_s1 = inlined_call_operand.vmem [shape: f32[8,2,16], index: 1, kind: input, shape index: {}]   ;;  %s6075_s2 = inlined_call_operand.vmem [shape: f32[8,2,16], index: 2, kind: input, shape index: {}]   ;;  %s6076_s3 = inlined_call_operand.vmem [shape: f32[128,16], index: 3, kind: input, shape index: {}]   ;;  %s6077_s4 = inlined_call_operand.vmem [shape: f32[16,128], index: 4, kind: input, shape index: {}]   ;;  %s6078_s5 = inlined_call_operand.vmem [shape: f32[32,128], index: 5, kind: input, shape index: {}]   ;;  %s6079_s6 = inlined_call_operand.vmem [shape: f32[1,128], index: 6, kind: input, shape index: {}]   ;;  %s6080_s7 = inlined_call_operand.vmem [shape: f32[16,128], index: 7, kind: input, shape index: {}]   ;;  %s6081_s8 = inlined_call_operand.vmem [shape: f32[32,128], index: 8, kind: input, shape index: {}]   ;;  %s6082_s9 = inlined_call_operand.vmem [shape: f32[1,128], index: 9, kind: input, shape index: {}]   ;;  %s6083_s10 = inlined_call_operand.vmem [shape: f32[32,128], index: 10, kind: input, shape index: {}]   ;;  %s6084_s11 = inlined_call_operand.vmem [shape: f32[1,128], index: 11, kind: input, shape index: {}]   ;;  %s6085_s12 = inlined_call_operand.hbm [shape: f32[8,2,128], index: 12, kind: output, shape index: {}]  }
   0x1   :  { %s5224_s23 = scalar_lea.hbm %s6073_s0, 16 }
   0x2   :  { %p5225_p0 = scmp.ne.s32.totalorder %s6073_s0, %s5224_s23  ;;  %p5228_p1 = scmp.lt.u32.totalorder %s5224_s23, %s6073_s0 }
   0x4   :  { %p5230_p2 = pnand %p5228_p1, %p5225_p0 }
   0x6   :  { %5233 = shalt.err (!%p5230_p2)  }
   0x7   :  { %s5260_s28 = smov [#allocation3]  }
   0x8   :  { %18 = dma.hbm_to_smem %s6073_s0, 16, %s5260_s28, [#allocation2] }
   0x9   :  { %5256 = dma.done.wait [#allocation2], 16 }
   0xa   :  { %5257 = vsyncadd [#allocation2], 4294967280 }
   0xb   :  { %20 = sfence }
   0xc   :  { %v46_v0 = vld [vmem:[%s6078_s5] sm:$0xff]  ;;  %v47_v1 = vld [vmem:[%s6078_s5 + $0x8] sm:$0xff]  ;;  %v5261_v3 = vmov 0.0|0.0   ;;  %v48_v6 = vld [vmem:[%s6078_s5 + $0x10] sm:$0xff]  ;;  %v5262_v8 = vmov 0.0   ;;  %vm5263_vm0 = vmmov 0  }
   0xd   :  { %v44_v2 = vld [vmem:[%s6077_s4] sm:$0xff]  ;;  %4772 = vmatprep.subr.bf16.mxu0 %v5261_v3  ;;  %v5356_v4 = vpack.c.bf16 %v47_v1, %v46_v0  ;;  %4778 = vmatprep.subr.bf16.mxu1 %v5261_v3  ;;  %v45_v5 = vld [vmem:[%s6077_s4 + $0x8] sm:$0xff]  ;;  %v49_v7 = vld [vmem:[%s6078_s5 + $0x18] sm:$0xff]  ;;  %1497 = vst [vmem:[#allocation4] sm:$0x3] %v5262_v8 }
   0xe   :  { %v5369_v9 = vpack.c.bf16 %v45_v5, %v44_v2  ;;  %4230 = vmatprep.mubr.msk.f32.mxu1 %vm5263_vm0, %v5262_v8  ;;  %4223 = vmatprep.mubr.msk.f32.mxu0 %vm5263_vm0, %v5262_v8 }
   0xf   :  { %21 = vsyncpa [#allocation5], 0  ;;  %4774 = vmatpush3.bf16.msra.mxu0 %v5356_v4  ;;  %v5376_v10 = vpack.c.bf16 %v49_v7, %v48_v6  ;;  %v79_v11 = vld [vmem:[%s6074_s1] sm:$0x3]  ;;  %vm154_vm1 = vcmask 130048   ;;  %v235_v21 = vlaneseq  ;;  %s5265_s26 = smov 32  }
  0x10   :  { %4775 = vmatprep.subr.bf16.mxu0 %v5261_v3  ;;  %4780 = vmatpush3.bf16.msra.mxu1 %v5369_v9  ;;  %v5401_v14 = vld [vmem:[%s6079_s6] ss:$0 sm:$0xff]  ;;  %s5264_s6 = smov 64   ;;  %v3876_v33 = vld [vmem:[%s6074_s1 + $0x2] sm:$0x3]  ;;  %vm80_vm5 = vcmask 261120  }
  0x11   :  { %4781 = vmatprep.subr.bf16.mxu1 %v5261_v3  ;;  %v5404_v23 = vand.u32 127, %v235_v21  ;;  %v3880_v55 = vld [vmem:[%s6074_s1 + $0x4] sm:$0x3]  ;;  %vm1769_vm6 = vcmask 1041408   ;;  %s3926_s0 = sld [smem:[#allocation3 + $0x3]]  ;;  %s3942_s24 = sld [smem:[#allocation3 + $0x5]] }
  0x13   :  { %4777 = vmatpush3.bf16.msra.mxu0 %v5376_v10  ;;  %4231 = vmatmul.mubr.msk.f32.vlgmr.msra.gmra.mrb[0].mxu1 %vm154_vm1, %v79_v11  ;;  %vm237_vm2 = vcmp.ge.s32.totalorder %v5404_v23, 64  ;;  %vm238_vm3 = vcmp.lt.s32.totalorder %v5404_v23, 96 }
  0x14   :  { %4783 = vmatpush3.bf16.msra.mxu1 %v5356_v4  ;;  %4787 = vmatprep.subr.bf16.mxu0 %v5261_v3  ;;  %vm5408_vm4 = vmand %vm237_vm2, %vm238_vm3 }
  0x15   :  { %4784 = vmatprep.subr.bf16.mxu1 %v5261_v3  ;;  %4241 = vmatprep.mubr.msk.f32.mxu1 %vm5263_vm0, %v5262_v8 }
  0x16   :  { %4224 = vmatmul.mubr.f32.vlgmr.msra.gmra.mrb[0].mxu0 %v5262_v8 }
  0x17   :  { %4789 = vmatpush3.bf16.msra.mxu0 %v5369_v9  ;;  %4248 = vmatprep.mubr.msk.f32.mxu0 %vm5263_vm0, %v5262_v8  ;;  %s2462_s19 = scvt.s32.f32 %s3926_s0  ;;  %s3160_s25 = scvt.s32.f32 %s3942_s24 }
  0x18   :  { %4786 = vmatpush3.bf16.msra.mxu1 %v5376_v10  ;;  %4790 = vmatprep.subr.bf16.mxu0 %v5261_v3 }
  0x19   :  { %4796 = vmatprep.subr.bf16.mxu1 %v5261_v3  ;;  %s2467_s20 = ssub.f32 1.0, %s2462_s19 }
  0x1a   :  { %4249 = vmatmul.mubr.msk.f32.vlgmr.msra.gmra.mrb[2].mxu0 %vm154_vm1, %v3876_v33  ;;  %s3165_s27 = ssub.f32 1.0, %s3160_s25 }
  0x1b   :  { %4792 = vmatpush3.bf16.msra.mxu0 %v5356_v4  ;;  %4259 = vmatprep.mubr.msk.f32.mxu0 %vm5263_vm0, %v5262_v8 }
  0x1c   :  { %4793 = vmatprep.subr.bf16.mxu0 %v5261_v3 }
  0x1f   :  { %4795 = vmatpush3.bf16.msra.mxu0 %v5376_v10 }
  0x20   :  { %4805 = vmatprep.subr.bf16.mxu0 %v5261_v3 }
  0xe6   :  { %v224_v12 = vpop.f32.mrb[0].mxu1 }
  0xe7   :  { %v4232_v13 = vpop.f32.mrb[1].mxu1 }
  0xe9   :  { %v150_v15 = vpop.f32.mrb[0].mxu0 }
  0xea   :  { %v225_v16 = vadd.f32 %v224_v12, %v150_v15  ;;  %v4225_v17 = vpop.f32.mrb[1].mxu0 }
  0xec   :  { %v234_v18 = vadd.f32 %v5401_v14, %v225_v16 }
  0xed   :  { %v411_v37 = vpop.f32.mrb[2].mxu0 }
  0xee   :  { %v3875_v19 = vmul.f32 -1.442695, %v234_v18  ;;  %v4250_v38 = vpop.f32.mrb[3].mxu0 }
  0xf0   :  { %5102 = vpow2.f32 %v3875_v19  ;;  %v3884_v19 = vld [vmem:[%s6074_s1 + $0x6] sm:$0x3] }
  0xf1   :  { %5104 = vtanh.f32 %v234_v18 }
  0xfa   :  { %v5103_v20 = vpop.eup %5102 }
  0xfb   :  { %v244_v22 = vadd.f32 1.0, %v5103_v20  ;;  %v5105_v25 = vpop.eup %5104 }
  0xfd   :  { %5106 = vrcp.f32 %v244_v22 }
 0x107   :  { %v5107_v26 = vpop.eup %5106 }
 0x108   :  { %v247_v27 = vsel %vm5408_vm4, %v5105_v25, %v5107_v26 }
 0x109   :  { %250 = vrot.lane.b32.xlu0 %v247_v27, %s5264_s6  ;;  %v248_v30 = vmul.f32 0.0, %v247_v27 }
 0x17b   :  { %v251_v28 = vpop.permute.xlu0 %250 }
 0x17c   :  { %v253_v29 = vmul.f32 %v251_v28, %v247_v27 }
 0x17e   :  { %255 = vrot.lane.b32.xlu0 %v253_v29, %s5265_s26 }
 0x1f0   :  { %v256_v31 = vpop.permute.xlu0 %255 }
 0x1f1   :  { %v258_v32 = vadd.f32 %v256_v31, %v248_v30 }
 0x1f3   :  { %5108 = vtanh.f32 %v258_v32 }
 0x1fd   :  { %v5109_v34 = vpop.eup %5108 }
 0x1fe   :  { %261 = vrot.lane.b32.xlu1 %v5109_v34, %s5264_s6 }
 0x270   :  { %v262_v35 = vpop.permute.xlu1 %261 }
 0x271   :  { %v264_v36 = vmul.f32 %v262_v35, %v247_v27 }
 0x273   :  { %268 = vrot.lane.b32.xlu1 %v264_v36, %s5265_s26 }
 0x2e5   :  { %v269_v39 = vpop.permute.xlu1 %268 }
 0x2e6   :  { %4242 = vmatmul.mubr.msk.f32.vlgmr.msra.gmra.mrb[2].mxu1 %vm80_vm5, %v269_v39 }
 0x2e7   :  { %4798 = vmatpush3.bf16.msra.mxu1 %v5369_v9  ;;  %4266 = vmatprep.mubr.msk.f32.mxu1 %vm5263_vm0, %v5262_v8 }
 0x2e8   :  { %4799 = vmatprep.subr.bf16.mxu1 %v5261_v3 }
 0x2ea   :  { %4267 = vmatmul.mubr.msk.f32.vlgmr.msra.gmra.mrb[4].mxu1 %vm154_vm1, %v3880_v55 }
 0x2eb   :  { %4801 = vmatpush3.bf16.msra.mxu1 %v5356_v4  ;;  %4277 = vmatprep.mubr.msk.f32.mxu1 %vm5263_vm0, %v5262_v8 }
 0x2ec   :  { %4802 = vmatprep.subr.bf16.mxu1 %v5261_v3 }
 0x2ef   :  { %4804 = vmatpush3.bf16.msra.mxu1 %v5376_v10 }
 0x2f0   :  { %4814 = vmatprep.subr.bf16.mxu1 %v5261_v3 }
 0x3b9   :  { %v338_v40 = vpop.f32.mrb[2].mxu1 }
 0x3ba   :  { %v412_v41 = vadd.f32 %v411_v37, %v338_v40  ;;  %v4243_v42 = vpop.f32.mrb[3].mxu1 }
 0x3bc   :  { %v415_v43 = vadd.f32 %v5401_v14, %v412_v41 }
 0x3bd   :  { %v587_v59 = vpop.f32.mrb[4].mxu1 }
 0x3be   :  { %v3879_v44 = vmul.f32 -1.442695, %v415_v43  ;;  %v4268_v60 = vpop.f32.mrb[5].mxu1 }
 0x3c0   :  { %5110 = vpow2.f32 %v3879_v44 }
 0x3c1   :  { %5112 = vtanh.f32 %v415_v43  ;;  %v3888_v43 = vld [vmem:[%s6074_s1 + $0x8] sm:$0x3] }
 0x3ca   :  { %v5111_v45 = vpop.eup %5110 }
 0x3cb   :  { %v420_v46 = vadd.f32 1.0, %v5111_v45  ;;  %v5113_v47 = vpop.eup %5112 }
 0x3cd   :  { %5114 = vrcp.f32 %v420_v46 }
 0x3d7   :  { %v5115_v48 = vpop.eup %5114 }
 0x3d8   :  { %v423_v49 = vsel %vm5408_vm4, %v5113_v47, %v5115_v48 }
 0x3d9   :  { %426 = vrot.lane.b32.xlu0 %v423_v49, %s5264_s6  ;;  %v424_v52 = vmul.f32 %v423_v49, %v258_v32 }
 0x44b   :  { %v427_v50 = vpop.permute.xlu0 %426 }
 0x44c   :  { %v429_v51 = vmul.f32 %v427_v50, %v423_v49 }
 0x44e   :  { %431 = vrot.lane.b32.xlu1 %v429_v51, %s5265_s26 }
 0x4c0   :  { %v432_v53 = vpop.permute.xlu1 %431 }
 0x4c1   :  { %v434_v54 = vadd.f32 %v432_v53, %v424_v52 }
 0x4c3   :  { %5116 = vtanh.f32 %v434_v54 }
 0x4cd   :  { %v5117_v56 = vpop.eup %5116 }
 0x4ce   :  { %437 = vrot.lane.b32.xlu0 %v5117_v56, %s5264_s6 }
 0x540   :  { %v438_v57 = vpop.permute.xlu0 %437 }
 0x541   :  { %v440_v58 = vmul.f32 %v438_v57, %v423_v49 }
 0x543   :  { %444 = vrot.lane.b32.xlu1 %v440_v58, %s5265_s26 }
 0x5b5   :  { %v445_v61 = vpop.permute.xlu1 %444 }
 0x5b6   :  { %4260 = vmatmul.mubr.msk.f32.vlgmr.msra.gmra.mrb[4].mxu0 %vm80_vm5, %v445_v61 }
 0x5b7   :  { %4807 = vmatpush3.bf16.msra.mxu0 %v5369_v9  ;;  %4284 = vmatprep.mubr.msk.f32.mxu0 %vm5263_vm0, %v5262_v8 }
 0x5b8   :  { %4808 = vmatprep.subr.bf16.mxu0 %v5261_v3 }
 0x5ba   :  { %4285 = vmatmul.mubr.msk.f32.vlgmr.msra.gmra.mrb[6].mxu0 %vm154_vm1, %v3884_v19 }
 0x5bb   :  { %4810 = vmatpush3.bf16.msra.mxu0 %v5356_v4  ;;  %4295 = vmatprep.mubr.msk.f32.mxu0 %vm5263_vm0, %v5262_v8 }
 0x5bc   :  { %4811 = vmatprep.subr.bf16.mxu0 %v5261_v3 }
 0x5bf   :  { %4813 = vmatpush3.bf16.msra.mxu0 %v5376_v10 }
 0x5c0   :  { %4823 = vmatprep.subr.bf16.mxu0 %v5261_v3 }
 0x689   :  { %v514_v62 = vpop.f32.mrb[4].mxu0 }
 0x68a   :  { %v588_v63 = vadd.f32 %v587_v59, %v514_v62  ;;  %v4261_v0 = vpop.f32.mrb[5].mxu0 }
 0x68c   :  { %v591_v1 = vadd.f32 %v5401_v14, %v588_v63 }
 0x68d   :  { %v763_v25 = vpop.f32.mrb[6].mxu0 }
 0x68e   :  { %v3883_v2 = vmul.f32 -1.442695, %v591_v1  ;;  %v4286_v26 = vpop.f32.mrb[7].mxu0 }
 0x690   :  { %5118 = vpow2.f32 %v3883_v2 }
 0x691   :  { %5120 = vtanh.f32 %v591_v1  ;;  %v3892_v1 = vld [vmem:[%s6074_s1 + $0xa] sm:$0x3] }
 0x69a   :  { %v5119_v5 = vpop.eup %5118 }
 0x69b   :  { %v596_v6 = vadd.f32 1.0, %v5119_v5  ;;  %v5121_v7 = vpop.eup %5120 }
 0x69d   :  { %5122 = vrcp.f32 %v596_v6 }
 0x6a7   :  { %v5123_v11 = vpop.eup %5122 }
 0x6a8   :  { %v599_v12 = vsel %vm5408_vm4, %v5121_v7, %v5123_v11 }
 0x6a9   :  { %602 = vrot.lane.b32.xlu0 %v599_v12, %s5264_s6  ;;  %v600_v16 = vmul.f32 %v599_v12, %v434_v54 }
 0x71b   :  { %v603_v13 = vpop.permute.xlu0 %602 }
 0x71c   :  { %v605_v15 = vmul.f32 %v603_v13, %v599_v12 }
 0x71e   :  { %607 = vrot.lane.b32.xlu1 %v605_v15, %s5265_s26 }
 0x790   :  { %v608_v17 = vpop.permute.xlu1 %607 }
 0x791   :  { %v610_v18 = vadd.f32 %v608_v17, %v600_v16 }
 0x793   :  { %5124 = vtanh.f32 %v610_v18 }
 0x79d   :  { %v5125_v20 = vpop.eup %5124 }
 0x79e   :  { %613 = vrot.lane.b32.xlu0 %v5125_v20, %s5264_s6 }
 0x810   :  { %v614_v21 = vpop.permute.xlu0 %613 }
 0x811   :  { %v616_v22 = vmul.f32 %v614_v21, %v599_v12 }
 0x813   :  { %620 = vrot.lane.b32.xlu1 %v616_v22, %s5265_s26 }
 0x885   :  { %v621_v27 = vpop.permute.xlu1 %620 }
 0x886   :  { %4278 = vmatmul.mubr.msk.f32.vlgmr.msra.gmra.mrb[6].mxu1 %vm80_vm5, %v621_v27 }
 0x887   :  { %4816 = vmatpush3.bf16.msra.mxu1 %v5369_v9  ;;  %4302 = vmatprep.mubr.msk.f32.mxu1 %vm5263_vm0, %v5262_v8 }
 0x888   :  { %4817 = vmatprep.subr.bf16.mxu1 %v5261_v3 }
 0x88a   :  { %4303 = vmatmul.mubr.msk.f32.vlgmr.msra.gmra.mrb[8].mxu1 %vm154_vm1, %v3888_v43 }
 0x88b   :  { %4819 = vmatpush3.bf16.msra.mxu1 %v5356_v4  ;;  %4313 = vmatprep.mubr.msk.f32.mxu1 %vm5263_vm0, %v5262_v8 }
 0x88c   :  { %4820 = vmatprep.subr.bf16.mxu1 %v5261_v3 }
 0x88f   :  { %4822 = vmatpush3.bf16.msra.mxu1 %v5376_v10 }
 0x890   :  { %4832 = vmatprep.subr.bf16.mxu1 %v5261_v3 }
 0x959   :  { %v690_v28 = vpop.f32.mrb[6].mxu1 }
 0x95a   :  { %v764_v29 = vadd.f32 %v763_v25, %v690_v28  ;;  %v4279_v30 = vpop.f32.mrb[7].mxu1 }
 0x95c   :  { %v767_v31 = vadd.f32 %v5401_v14, %v764_v29 }
 0x95d   :  { %v939_v47 = vpop.f32.mrb[8].mxu1 }
 0x95e   :  { %v3887_v32 = vmul.f32 -1.442695, %v767_v31  ;;  %v4304_v48 = vpop.f32.mrb[9].mxu1 }
 0x960   :  { %5126 = vpow2.f32 %v3887_v32 }
 0x961   :  { %5128 = vtanh.f32 %v767_v31  ;;  %v3896_v31 = vld [vmem:[%s6074_s1 + $0xc] sm:$0x3] }
 0x96a   :  { %v5127_v33 = vpop.eup %5126 }
 0x96b   :  { %v772_v34 = vadd.f32 1.0, %v5127_v33  ;;  %v5129_v35 = vpop.eup %5128 }
 0x96d   :  { %5130 = vrcp.f32 %v772_v34 }
 0x977   :  { %v5131_v36 = vpop.eup %5130 }
 0x978   :  { %v775_v37 = vsel %vm5408_vm4, %v5129_v35, %v5131_v36 }
 0x979   :  { %778 = vrot.lane.b32.xlu0 %v775_v37, %s5264_s6  ;;  %v776_v40 = vmul.f32 %v775_v37, %v610_v18 }
 0x9eb   :  { %v779_v38 = vpop.permute.xlu0 %778 }
 0x9ec   :  { %v781_v39 = vmul.f32 %v779_v38, %v775_v37 }
 0x9ee   :  { %783 = vrot.lane.b32.xlu1 %v781_v39, %s5265_s26 }
 0xa60   :  { %v784_v41 = vpop.permute.xlu1 %783 }
 0xa61   :  { %v786_v42 = vadd.f32 %v784_v41, %v776_v40 }
 0xa63   :  { %5132 = vtanh.f32 %v786_v42 }
 0xa6d   :  { %v5133_v44 = vpop.eup %5132 }
 0xa6e   :  { %789 = vrot.lane.b32.xlu0 %v5133_v44, %s5264_s6 }
 0xae0   :  { %v790_v45 = vpop.permute.xlu0 %789 }
 0xae1   :  { %v792_v46 = vmul.f32 %v790_v45, %v775_v37 }
 0xae3   :  { %796 = vrot.lane.b32.xlu1 %v792_v46, %s5265_s26 }
 0xb55   :  { %v797_v49 = vpop.permute.xlu1 %796 }
 0xb56   :  { %4296 = vmatmul.mubr.msk.f32.vlgmr.msra.gmra.mrb[8].mxu0 %vm80_vm5, %v797_v49 }
 0xb57   :  { %4825 = vmatpush3.bf16.msra.mxu0 %v5369_v9  ;;  %4320 = vmatprep.mubr.msk.f32.mxu0 %vm5263_vm0, %v5262_v8 }
 0xb58   :  { %4826 = vmatprep.subr.bf16.mxu0 %v5261_v3 }
 0xb5a   :  { %4321 = vmatmul.mubr.msk.f32.vlgmr.msra.gmra.mrb[10].mxu0 %vm154_vm1, %v3892_v1 }
 0xb5b   :  { %4828 = vmatpush3.bf16.msra.mxu0 %v5356_v4  ;;  %4331 = vmatprep.mubr.msk.f32.mxu0 %vm5263_vm0, %v5262_v8 }
 0xb5c   :  { %4829 = vmatprep.subr.bf16.mxu0 %v5261_v3 }
 0xb5f   :  { %4831 = vmatpush3.bf16.msra.mxu0 %v5376_v10 }
 0xb60   :  { %4841 = vmatprep.subr.bf16.mxu0 %v5261_v3 }
 0xc29   :  { %v866_v50 = vpop.f32.mrb[8].mxu0 }
 0xc2a   :  { %v940_v51 = vadd.f32 %v939_v47, %v866_v50  ;;  %v4297_v52 = vpop.f32.mrb[9].mxu0  ;;  %v3900_v50 = vld [vmem:[%s6074_s1 + $0xe] sm:$0x3] }
 0xc2c   :  { %v943_v53 = vadd.f32 %v5401_v14, %v940_v51 }
 0xc2d   :  { %v1115_v7 = vpop.f32.mrb[10].mxu0 }
 0xc2e   :  { %v3891_v54 = vmul.f32 -1.442695, %v943_v53  ;;  %v4322_v11 = vpop.f32.mrb[11].mxu0 }
 0xc30   :  { %5134 = vpow2.f32 %v3891_v54 }
 0xc31   :  { %5136 = vtanh.f32 %v943_v53 }
 0xc3a   :  { %v5135_v55 = vpop.eup %5134 }
 0xc3b   :  { %v948_v56 = vadd.f32 1.0, %v5135_v55  ;;  %v5137_v57 = vpop.eup %5136 }
 0xc3d   :  { %5138 = vrcp.f32 %v948_v56 }
 0xc47   :  { %v5139_v58 = vpop.eup %5138 }
 0xc48   :  { %v951_v59 = vsel %vm5408_vm4, %v5137_v57, %v5139_v58 }
 0xc49   :  { %954 = vrot.lane.b32.xlu0 %v951_v59, %s5264_s6  ;;  %v952_v62 = vmul.f32 %v951_v59, %v786_v42 }
 0xcbb   :  { %v955_v60 = vpop.permute.xlu0 %954 }
 0xcbc   :  { %v957_v61 = vmul.f32 %v955_v60, %v951_v59 }
 0xcbe   :  { %959 = vrot.lane.b32.xlu1 %v957_v61, %s5265_s26 }
 0xd30   :  { %v960_v63 = vpop.permute.xlu1 %959 }
 0xd31   :  { %v962_v0 = vadd.f32 %v960_v63, %v952_v62 }
 0xd33   :  { %5140 = vtanh.f32 %v962_v0 }
 0xd3d   :  { %v5141_v2 = vpop.eup %5140 }
 0xd3e   :  { %965 = vrot.lane.b32.xlu0 %v5141_v2, %s5264_s6 }
 0xdb0   :  { %v966_v5 = vpop.permute.xlu0 %965 }
 0xdb1   :  { %v968_v6 = vmul.f32 %v966_v5, %v951_v59 }
 0xdb3   :  { %972 = vrot.lane.b32.xlu1 %v968_v6, %s5265_s26 }
 0xe25   :  { %v973_v12 = vpop.permute.xlu1 %972 }
 0xe26   :  { %4314 = vmatmul.mubr.msk.f32.vlgmr.msra.gmra.mrb[10].mxu1 %vm80_vm5, %v973_v12  ;;  %v53_v12 = vld [vmem:[%s6081_s8] sm:$0xff] }
 0xe27   :  { %4834 = vmatpush3.bf16.msra.mxu1 %v5369_v9  ;;  %4338 = vmatprep.mubr.msk.f32.mxu1 %vm5263_vm0, %v5262_v8 }
 0xe28   :  { %4835 = vmatprep.subr.bf16.mxu1 %v5261_v3 }
 0xe2a   :  { %4339 = vmatmul.mubr.msk.f32.vlgmr.msra.gmra.mrb[12].mxu1 %vm154_vm1, %v3896_v31  ;;  %v5608_v31 = vld [vmem:[%s6082_s9] ss:$0 sm:$0xff] }
 0xe2b   :  { %4837 = vmatpush3.bf16.msra.mxu1 %v5356_v4  ;;  %4349 = vmatprep.mubr.msk.f32.mxu1 %vm5263_vm0, %v5262_v8 }
 0xe2c   :  { %4838 = vmatprep.subr.bf16.mxu1 %v5261_v3 }
 0xe2f   :  { %4840 = vmatpush3.bf16.msra.mxu1 %v5376_v10 }
 0xe30   :  { %4850 = vmatprep.subr.bf16.mxu1 %v5261_v3 }
 0xef9   :  { %v1042_v13 = vpop.f32.mrb[10].mxu1 }
 0xefa   :  { %v1116_v15 = vadd.f32 %v1115_v7, %v1042_v13  ;;  %v4315_v16 = vpop.f32.mrb[11].mxu1  ;;  %v54_v13 = vld [vmem:[%s6081_s8 + $0x8] sm:$0xff] }
 0xefb   :  { %v5573_v16 = vpack.c.bf16 %v54_v13, %v53_v12  ;;  %v67_v12 = vld [vmem:[%s6076_s3 + $0x20] sm:$0xff]  ;;  %v68_v13 = vld [vmem:[%s6076_s3 + $0x28] sm:$0xff] }
 0xefc   :  { %v1119_v17 = vadd.f32 %v5401_v14, %v1116_v15  ;;  %v51_v15 = vld [vmem:[%s6080_s7] sm:$0xff] }
 0xefd   :  { %v1291_v35 = vpop.f32.mrb[12].mxu1 }
 0xefe   :  { %v3895_v18 = vmul.f32 -1.442695, %v1119_v17  ;;  %v4340_v36 = vpop.f32.mrb[13].mxu1 }
 0xf00   :  { %5142 = vpow2.f32 %v3895_v18  ;;  %v55_v18 = vld [vmem:[%s6081_s8 + $0x10] sm:$0xff] }
 0xf01   :  { %5144 = vtanh.f32 %v1119_v17  ;;  %v52_v17 = vld [vmem:[%s6080_s7 + $0x8] sm:$0xff] }
 0xf0a   :  { %v5143_v19 = vpop.eup %5142 }
 0xf0b   :  { %v1124_v20 = vadd.f32 1.0, %v5143_v19  ;;  %v5145_v21 = vpop.eup %5144  ;;  %v56_v19 = vld [vmem:[%s6081_s8 + $0x18] sm:$0xff]  ;;  %s3918_s8 = sld [smem:[#allocation3 + $0x2]] }
 0xf0d   :  { %5146 = vrcp.f32 %v1124_v20  ;;  %v5584_v20 = vpack.c.bf16 %v52_v17, %v51_v15  ;;  %v5688_v15 = vpack.c.bf16 %v68_v13, %v67_v12  ;;  %v69_v17 = vld [vmem:[%s6076_s3 + $0x30] sm:$0xff] }
 0xf11   :  { %s2113_s15 = scvt.s32.f32 %s3918_s8 }
 0xf13   :  { %s2118_s16 = ssub.f32 1.0, %s2113_s15 }
 0xf17   :  { %v5147_v22 = vpop.eup %5146 }
 0xf18   :  { %v1127_v25 = vsel %vm5408_vm4, %v5145_v21, %v5147_v22  ;;  %v5587_v21 = vpack.c.bf16 %v56_v19, %v55_v18  ;;  %v1498_v22 = vld [vmem:[%s6075_s2] sm:$0x3]  ;;  %v70_v18 = vld [vmem:[%s6076_s3 + $0x38] sm:$0xff] }
 0xf19   :  { %1130 = vrot.lane.b32.xlu0 %v1127_v25, %s5264_s6  ;;  %v1128_v28 = vmul.f32 %v1127_v25, %v962_v0  ;;  %v5698_v19 = vpack.c.bf16 %v70_v18, %v69_v17 }
 0xf8b   :  { %v1131_v26 = vpop.permute.xlu0 %1130 }
 0xf8c   :  { %v1133_v27 = vmul.f32 %v1131_v26, %v1127_v25 }
 0xf8e   :  { %1135 = vrot.lane.b32.xlu1 %v1133_v27, %s5265_s26 }
0x1000   :  { %v1136_v29 = vpop.permute.xlu1 %1135 }
0x1001   :  { %v1138_v30 = vadd.f32 %v1136_v29, %v1128_v28 }
0x1003   :  { %5148 = vtanh.f32 %v1138_v30 }
0x100d   :  { %v5149_v32 = vpop.eup %5148 }
0x100e   :  { %1141 = vrot.lane.b32.xlu0 %v5149_v32, %s5264_s6 }
0x1080   :  { %v1142_v33 = vpop.permute.xlu0 %1141 }
0x1081   :  { %v1144_v34 = vmul.f32 %v1142_v33, %v1127_v25 }
0x1083   :  { %1148 = vrot.lane.b32.xlu1 %v1144_v34, %s5265_s26 }
0x10f5   :  { %v1149_v37 = vpop.permute.xlu1 %1148 }
0x10f6   :  { %4332 = vmatmul.mubr.msk.f32.vlgmr.msra.gmra.mrb[12].mxu0 %vm80_vm5, %v1149_v37 }
0x10f7   :  { %4843 = vmatpush3.bf16.msra.mxu0 %v5369_v9  ;;  %4356 = vmatprep.mubr.msk.f32.mxu0 %vm5263_vm0, %v5262_v8 }
0x10f8   :  { %4844 = vmatprep.subr.bf16.mxu0 %v5261_v3 }
0x10fa   :  { %4357 = vmatmul.mubr.msk.f32.vlgmr.msra.gmra.mrb[14].mxu0 %vm154_vm1, %v3900_v50 }
0x10fb   :  { %4367 = vmatprep.mubr.msk.f32.mxu0 %vm5263_vm0, %v5262_v8  ;;  %4846 = vmatpush3.bf16.msra.mxu0 %v5573_v16 }
0x10fc   :  { %4847 = vmatprep.subr.bf16.mxu0 %v5261_v3 }
0x10ff   :  { %4849 = vmatpush3.bf16.msra.mxu0 %v5587_v21 }
0x1100   :  { %4859 = vmatprep.subr.bf16.mxu0 %v5261_v3 }
0x11c9   :  { %v1218_v4 = vpop.f32.mrb[12].mxu0 }
0x11ca   :  { %v1292_v10 = vadd.f32 %v1291_v35, %v1218_v4  ;;  %v4333_v38 = vpop.f32.mrb[13].mxu0 }
0x11cc   :  { %v1295_v39 = vadd.f32 %v5401_v14, %v1292_v10 }
0x11cd   :  { %v1467_v54 = vpop.f32.mrb[14].mxu0 }
0x11ce   :  { %v3899_v40 = vmul.f32 -1.442695, %v1295_v39  ;;  %v4358_v55 = vpop.f32.mrb[15].mxu0 }
0x11d0   :  { %5150 = vpow2.f32 %v3899_v40 }
0x11d1   :  { %5152 = vtanh.f32 %v1295_v39 }
0x11da   :  { %v5151_v41 = vpop.eup %5150 }
0x11db   :  { %v1300_v42 = vadd.f32 1.0, %v5151_v41  ;;  %v5153_v43 = vpop.eup %5152 }
0x11dd   :  { %5154 = vrcp.f32 %v1300_v42 }
0x11e7   :  { %v5155_v44 = vpop.eup %5154 }
0x11e8   :  { %v1303_v9 = vsel %vm5408_vm4, %v5153_v43, %v5155_v44 }
0x11e9   :  { %1306 = vrot.lane.b32.xlu0 %v1303_v9, %s5264_s6  ;;  %v1304_v47 = vmul.f32 %v1303_v9, %v1138_v30 }
0x125b   :  { %v1307_v45 = vpop.permute.xlu0 %1306 }
0x125c   :  { %v1309_v46 = vmul.f32 %v1307_v45, %v1303_v9  ;;  %v59_v45 = vld [vmem:[%s6083_s10 + $0x8] sm:$0xff] }
0x125e   :  { %1311 = vrot.lane.b32.xlu1 %v1309_v46, %s5265_s26  ;;  %v60_v46 = vld [vmem:[%s6083_s10 + $0x10] sm:$0xff] }
0x12d0   :  { %v1312_v48 = vpop.permute.xlu1 %1311 }
0x12d1   :  { %v1314_v49 = vadd.f32 %v1312_v48, %v1304_v47  ;;  %v61_v48 = vld [vmem:[%s6083_s10 + $0x18] sm:$0xff] }
0x12d3   :  { %5156 = vtanh.f32 %v1314_v49 }
0x12dd   :  { %v5157_v51 = vpop.eup %5156 }
0x12de   :  { %1317 = vrot.lane.b32.xlu0 %v5157_v51, %s5264_s6 }
0x1350   :  { %v1318_v52 = vpop.permute.xlu0 %1317 }
0x1351   :  { %v1320_v53 = vmul.f32 %v1318_v52, %v1303_v9  ;;  %v58_v9 = vld [vmem:[%s6083_s10] sm:$0xff]  ;;  %s3934_s10 = sld [smem:[#allocation3 + $0x4]] }
0x1352   :  { %v5627_v47 = vpack.c.bf16 %v59_v45, %v58_v9  ;;  %v5266_v9 = vmov 1.0   ;;  %v3911_v45 = vld [vmem:[%s6075_s2 + $0x2] sm:$0x3] }
0x1353   :  { %1324 = vrot.lane.b32.xlu1 %v1320_v53, %s5265_s26 }
0x1357   :  { %s2811_s22 = scvt.s32.f32 %s3934_s10 }
0x1359   :  { %s2816_s23 = ssub.f32 1.0, %s2811_s22 }
0x13c5   :  { %v1325_v56 = vpop.permute.xlu1 %1324 }
0x13c6   :  { %4350 = vmatmul.mubr.msk.f32.vlgmr.msra.gmra.mrb[14].mxu1 %vm80_vm5, %v1325_v56 }
0x13c7   :  { %4374 = vmatprep.mubr.msk.f32.mxu1 %vm5263_vm0, %v5262_v8  ;;  %4852 = vmatpush3.bf16.msra.mxu1 %v5584_v20 }
0x13c8   :  { %4853 = vmatprep.subr.bf16.mxu1 %v5261_v3 }
0x13ca   :  { %4375 = vmatmul.mubr.msk.f32.vlgmr.msra.gmra.mrb[16].mxu1 %vm154_vm1, %v1498_v22  ;;  %v71_v22 = vld [vmem:[%s6076_s3 + $0x40] sm:$0xff] }
0x13cb   :  { %4385 = vmatprep.mubr.msk.f32.mxu1 %vm5263_vm0, %v5262_v8  ;;  %4855 = vmatpush3.bf16.msra.mxu1 %v5627_v47 }
0x13cc   :  { %4856 = vmatprep.subr.bf16.mxu1 %v5261_v3 }
0x1499   :  { %v1394_v57 = vpop.f32.mrb[14].mxu1 }
0x149a   :  { %v1468_v58 = vadd.f32 %v1467_v54, %v1394_v57  ;;  %v4351_v59 = vpop.f32.mrb[15].mxu1  ;;  %v5655_v54 = vld [vmem:[%s6084_s11] ss:$0 sm:$0xff] }
0x149c   :  { %v1471_v60 = vadd.f32 %v5401_v14, %v1468_v58 }
0x149d   :  { %v1643_v28 = vpop.f32.mrb[16].mxu1 }
0x149e   :  { %v3903_v61 = vmul.f32 -1.442695, %v1471_v60  ;;  %v4376_v29 = vpop.f32.mrb[17].mxu1 }
0x14a0   :  { %5158 = vpow2.f32 %v3903_v61 }
0x14a1   :  { %5160 = vtanh.f32 %v1471_v60 }
0x14aa   :  { %v5159_v62 = vpop.eup %5158 }
0x14ab   :  { %v1476_v63 = vadd.f32 1.0, %v5159_v62  ;;  %v5161_v0 = vpop.eup %5160 }
0x14ad   :  { %5162 = vrcp.f32 %v1476_v63 }
0x14b7   :  { %v5163_v1 = vpop.eup %5162 }
0x14b8   :  { %v1479_v2 = vsel %vm5408_vm4, %v5161_v0, %v5163_v1 }
0x14b9   :  { %1482 = vrot.lane.b32.xlu0 %v1479_v2, %s5264_s6  ;;  %v1480_v7 = vmul.f32 %v1479_v2, %v1314_v49  ;;  %v5633_v49 = vpack.c.bf16 %v61_v48, %v60_v46 }
0x14bb   :  { %4858 = vmatpush3.bf16.msra.mxu1 %v5633_v49 }
0x14bc   :  { %4883 = vmatprep.subr.bf16.mxu1 %v5261_v3 }
0x152b   :  { %v1483_v5 = vpop.permute.xlu0 %1482 }
0x152c   :  { %v1485_v6 = vmul.f32 %v1483_v5, %v1479_v2  ;;  %v64_v5 = vld [vmem:[%s6076_s3 + $0x8] sm:$0xff] }
0x152e   :  { %1487 = vrot.lane.b32.xlu1 %v1485_v6, %s5265_s26  ;;  %v65_v6 = vld [vmem:[%s6076_s3 + $0x10] sm:$0xff] }
0x15a0   :  { %v1488_v11 = vpop.permute.xlu1 %1487 }
0x15a1   :  { %v1490_v14 = vadd.f32 %v1488_v11, %v1480_v7  ;;  %v66_v11 = vld [vmem:[%s6076_s3 + $0x18] sm:$0xff] }
0x15a3   :  { %5164 = vtanh.f32 %v1490_v14 }
0x15ad   :  { %v5165_v25 = vpop.eup %5164 }
0x15ae   :  { %1493 = vrot.lane.b32.xlu0 %v5165_v25, %s5264_s6  ;;  %v72_v25 = vld [vmem:[%s6076_s3 + $0x48] sm:$0xff] }
0x1620   :  { %v1494_v26 = vpop.permute.xlu0 %1493 }
0x1621   :  { %v1496_v27 = vmul.f32 %v1494_v26, %v1479_v2  ;;  %v63_v2 = vld [vmem:[%s6076_s3] sm:$0xff]  ;;  %v5708_v26 = vpack.c.bf16 %v72_v25, %v71_v22 }
0x1622   :  { %v5672_v7 = vpack.c.bf16 %v64_v5, %v63_v2 }
0x1623   :  { %1500 = vrot.lane.b32.xlu1 %v1496_v27, %s5265_s26  ;;  %v73_v27 = vld [vmem:[%s6076_s3 + $0x50] sm:$0xff] }
0x1695   :  { %v1501_v30 = vpop.permute.xlu1 %1500 }
0x1696   :  { %4368 = vmatmul.mubr.msk.f32.vlgmr.msra.gmra.mrb[16].mxu0 %vm80_vm5, %v1501_v30  ;;  %v75_v30 = vld [vmem:[%s6076_s3 + $0x60] sm:$0xff] }
0x1697   :  { %4420 = vmatprep.mubr.msk.f32.mxu0 %vm5263_vm0, %v5262_v8  ;;  %4861 = vmatpush3.bf16.msra.mxu0 %v5672_v7 }
0x1698   :  { %4862 = vmatprep.subr.bf16.mxu0 %v5261_v3 }
0x1769   :  { %v1570_v32 = vpop.f32.mrb[16].mxu0 }
0x176a   :  { %v1644_v33 = vadd.f32 %v1643_v28, %v1570_v32  ;;  %v4369_v34 = vpop.f32.mrb[17].mxu0  ;;  %v74_v28 = vld [vmem:[%s6076_s3 + $0x58] sm:$0xff]  ;;  %v76_v32 = vld [vmem:[%s6076_s3 + $0x68] sm:$0xff] }
0x176b   :  { %v5718_v29 = vpack.c.bf16 %v74_v28, %v73_v27 }
0x176c   :  { %v1653_v35 = vadd.f32 %v5608_v31, %v1644_v33  ;;  %v5728_v33 = vpack.c.bf16 %v76_v32, %v75_v30 }
0x176e   :  { %v3907_v36 = vmul.f32 -1.442695, %v1653_v35 }
0x1770   :  { %5166 = vpow2.f32 %v3907_v36 }
0x1771   :  { %5168 = vtanh.f32 %v1653_v35 }
0x177a   :  { %v5167_v37 = vpop.eup %5166 }
0x177b   :  { %v1658_v4 = vadd.f32 1.0, %v5167_v37  ;;  %v5169_v10 = vpop.eup %5168 }
0x177d   :  { %5170 = vrcp.f32 %v1658_v4  ;;  %v77_v4 = vld [vmem:[%s6076_s3 + $0x70] sm:$0xff] }
0x1787   :  { %v5171_v38 = vpop.eup %5170 }
0x1788   :  { %v1661_v39 = vsel %vm5408_vm4, %v5169_v10, %v5171_v38  ;;  %v78_v10 = vld [vmem:[%s6076_s3 + $0x78] sm:$0xff]  ;;  %s3910_s3 = sld [smem:[#allocation3 + $0x1]] }
0x1789   :  { %1664 = vrot.lane.b32.xlu0 %v1661_v39, %s5264_s6  ;;  %v1662_v42 = vmul.f32 %v1661_v39, %v1490_v14  ;;  %v5678_v14 = vpack.c.bf16 %v66_v11, %v65_v6  ;;  %v5739_v38 = vpack.c.bf16 %v78_v10, %v77_v4 }
0x178b   :  { %4864 = vmatpush3.bf16.msra.mxu0 %v5678_v14 }
0x178c   :  { %4865 = vmatprep.subr.bf16.mxu0 %v5261_v3 }
0x178e   :  { %s1763_s30 = scvt.s32.f32 %s3910_s3 }
0x178f   :  { %4867 = vmatpush3.bf16.msra.mxu0 %v5688_v15 }
0x1790   :  { %4868 = vmatprep.subr.bf16.mxu0 %v5261_v3  ;;  %s1768_s13 = ssub.f32 1.0, %s1763_s30  ;;  %v1766_v46 = vstv %s1763_s30 }
0x1792   :  { %v1863_v48 = vstv %s1768_s13 }
0x1793   :  { %4870 = vmatpush3.bf16.msra.mxu0 %v5698_v19 }
0x1794   :  { %4871 = vmatprep.subr.bf16.mxu0 %v5261_v3 }
0x1797   :  { %4873 = vmatpush3.bf16.msra.mxu0 %v5708_v26 }
0x1798   :  { %4874 = vmatprep.subr.bf16.mxu0 %v5261_v3 }
0x179b   :  { %4876 = vmatpush3.bf16.msra.mxu0 %v5718_v29 }
0x179c   :  { %4877 = vmatprep.subr.bf16.mxu0 %v5261_v3 }
0x179f   :  { %4879 = vmatpush3.bf16.msra.mxu0 %v5728_v33 }
0x17a0   :  { %4880 = vmatprep.subr.bf16.mxu0 %v5261_v3 }
0x17a3   :  { %4882 = vmatpush3.bf16.msra.mxu0 %v5739_v38 }
0x17a4   :  { %4922 = vmatprep.subr.bf16.mxu0 %v5261_v3 }
0x17fb   :  { %v1665_v40 = vpop.permute.xlu0 %1664 }
0x17fc   :  { %v1667_v41 = vmul.f32 %v1665_v40, %v1661_v39 }
0x17fe   :  { %1669 = vrot.lane.b32.xlu1 %v1667_v41, %s5265_s26 }
0x1870   :  { %v1670_v43 = vpop.permute.xlu1 %1669 }
0x1871   :  { %v5615_v44 = vadd.f32 %v1670_v43, %v1662_v42 }
0x1873   :  { %5172 = vtanh.f32 %v5615_v44 }
0x187d   :  { %v5173_v50 = vpop.eup %5172 }
0x187e   :  { %1675 = vrot.lane.b32.xlu0 %v5173_v50, %s5264_s6  ;;  %v1767_v50 = vmul.f32 %v3911_v45, %v1766_v46 }
0x18f0   :  { %v1676_v51 = vpop.permute.xlu0 %1675 }
0x18f1   :  { %v1678_v52 = vmul.f32 %v1676_v51, %v1661_v39 }
0x18f3   :  { %1686 = vrot.lane.b32.xlu1 %v1678_v52, %s5265_s26 }
0x1965   :  { %v1687_v53 = vpop.permute.xlu1 %1686 }
0x1966   :  { %4386 = vmatmul.mubr.msk.f32.vlgmr.msra.gmra.mrb[18].mxu1 %vm80_vm5, %v1687_v53 }
0x1967   :  { %4885 = vmatpush3.bf16.msra.mxu1 %v5573_v16  ;;  %4431 = vmatprep.mubr.msk.f32.mxu1 %vm5263_vm0, %v5262_v8 }
0x1968   :  { %4886 = vmatprep.subr.bf16.mxu1 %v5261_v3 }
0x196b   :  { %4888 = vmatpush3.bf16.msra.mxu1 %v5587_v21 }
0x196c   :  { %4889 = vmatprep.subr.bf16.mxu1 %v5261_v3 }
0x196e   :  { %4432 = vmatmul.mubr.msk.f32.vlgmr.msra.gmra.mrb[20].mxu1 %vm80_vm5, %v1687_v53 }
0x196f   :  { %4891 = vmatpush3.bf16.msra.mxu1 %v5584_v20  ;;  %4438 = vmatprep.mubr.msk.f32.mxu1 %vm5263_vm0, %v5262_v8 }
0x1970   :  { %4892 = vmatprep.subr.bf16.mxu1 %v5261_v3 }
0x1a39   :  { %v1756_v55 = vpop.f32.mrb[18].mxu1 }
0x1a3a   :  { %v1757_v56 = vadd.f32 %v5655_v54, %v1756_v55  ;;  %v4387_v57 = vpop.f32.mrb[19].mxu1 }
0x1a3c   :  { %1761 = vst [vmem:[#allocation4 + $0x2] sm:$0x3] %v1757_v56  ;;  %v1770_v58 = vsel %vm1769_vm6, %v1757_v56, -inf }
0x1a3d   :  { %1771 = vmax.xlane.f32.xlu0 %v1770_v58 }
0x1a41   :  { %v5659_v59 = vpop.f32.mrb[20].mxu1 }
0x1a42   :  { %v4433_v60 = vpop.f32.mrb[21].mxu1 }
0x1aca   :  { %v1772_v61 = vpop.xlane.xlu0 %1771 }
0x1acb   :  { %vm1773_vm7 = vcmp.eq.f32.partialorder %v1757_v56, %v1772_v61 }
0x1acc   :  { %v1774_v62 = vsel %vm1773_vm7, %v5404_v23, 128 }
0x1acd   :  { %v1775_v63 = vsel %vm1769_vm6, %v1774_v62, 2147483647 }
0x1ace   :  { %v1777_v0 = vshra.s32 %v1775_v63, 16  ;;  %v1776_v34 = vand.u32 65535, %v1775_v63 }
0x1ad0   :  { %v1779_v1 = vcvt.s32.f32 %v1777_v0  ;;  %v1778_v36 = vcvt.s32.f32 %v1776_v34 }
0x1ad2   :  { %1780 = vmin.xlane.f32.xlu1 %v1779_v1 }
0x1b5f   :  { %v1781_v35 = vpop.xlane.xlu1 %1780 }
0x1b60   :  { %vm1782_vm8 = vcmp.eq.f32.partialorder %v1779_v1, %v1781_v35  ;;  %v1787_v39 = vcvt.f32.s32 %v1781_v35 }
0x1b61   :  { %v1783_v37 = vsel %vm1782_vm8, %v1778_v36, inf }
0x1b62   :  { %1784 = vmin.xlane.f32.xlu0 %v1783_v37  ;;  %v1788_v41 = vshll.u32 %v1787_v39, 16 }
0x1bef   :  { %v1785_v40 = vpop.xlane.xlu0 %1784 }
0x1bf0   :  { %v1786_v42 = vcvt.f32.s32 %v1785_v40 }
0x1bf2   :  { %v1789_v43 = vadd.s32 %v1788_v41, %v1786_v42 }
0x1bf4   :  { %vm1790_vm9 = vcmp.eq.s32.totalorder %v5404_v23, %v1789_v43 }
0x1bf5   :  { %4421 = vmatmul.mubr.msk.f32.vlgmr.msra.gmra.mrb[18].mxu0 %vm1790_vm9, %v5266_v9 }
0x1bf6   :  { %4924 = vmatpush3.bf16.msra.mxu0 %v5573_v16  ;;  %4495 = vmatprep.mubr.msk.f32.mxu0 %vm5263_vm0, %v5262_v8 }
0x1bf7   :  { %4925 = vmatprep.subr.bf16.mxu0 %v5261_v3 }
0x1bfa   :  { %4927 = vmatpush3.bf16.msra.mxu0 %v5587_v21 }
0x1bfb   :  { %4928 = vmatprep.subr.bf16.mxu0 %v5261_v3 }
0x1cc8   :  { %v1859_v51 = vpop.f32.mrb[18].mxu0 }
0x1cc9   :  { %v1864_v52 = vmul.f32 %v1863_v48, %v1859_v51  ;;  %v4422_v53 = vpop.f32.mrb[19].mxu0  ;;  %v2116_v51 = vstv %s2113_s15 }
0x1ccb   :  { %v1865_v55 = vadd.f32 %v1864_v52, %v1767_v50  ;;  %v3919_v50 = vld [vmem:[%s6075_s2 + $0x4] sm:$0x3]  ;;  %v2212_v52 = vstv %s2118_s16 }
0x1ccc   :  { %v2117_v53 = vmul.f32 %v3919_v50, %v2116_v51 }
0x1ccd   :  { %4439 = vmatmul.mubr.msk.f32.vlgmr.msra.gmra.mrb[22].mxu1 %vm154_vm1, %v1865_v55 }
0x1cce   :  { %4894 = vmatpush3.bf16.msra.mxu1 %v5627_v47  ;;  %4449 = vmatprep.mubr.msk.f32.mxu1 %vm5263_vm0, %v5262_v8 }
0x1ccf   :  { %4895 = vmatprep.subr.bf16.mxu1 %v5261_v3 }
0x1cd2   :  { %4897 = vmatpush3.bf16.msra.mxu1 %v5633_v49 }
0x1cd3   :  { %4898 = vmatprep.subr.bf16.mxu1 %v5261_v3 }
0x1da0   :  { %v2005_v56 = vpop.f32.mrb[22].mxu1 }
0x1da1   :  { %v2006_v57 = vadd.f32 %v2005_v56, %v5659_v59  ;;  %v4440_v58 = vpop.f32.mrb[23].mxu1 }
0x1da3   :  { %v2009_v60 = vadd.f32 %v5608_v31, %v2006_v57 }
0x1da5   :  { %v3916_v61 = vmul.f32 -1.442695, %v2009_v60 }
0x1da7   :  { %5174 = vpow2.f32 %v3916_v61 }
0x1da8   :  { %5176 = vtanh.f32 %v2009_v60 }
0x1db1   :  { %v5175_v62 = vpop.eup %5174 }
0x1db2   :  { %v2014_v63 = vadd.f32 1.0, %v5175_v62  ;;  %v5177_v0 = vpop.eup %5176 }
0x1db4   :  { %5178 = vrcp.f32 %v2014_v63 }
0x1dbe   :  { %v5179_v1 = vpop.eup %5178 }
0x1dbf   :  { %v2017_v2 = vsel %vm5408_vm4, %v5177_v0, %v5179_v1 }
0x1dc0   :  { %2020 = vrot.lane.b32.xlu0 %v2017_v2, %s5264_s6  ;;  %v2018_v59 = vmul.f32 %v2017_v2, %v5615_v44 }
0x1e32   :  { %v2021_v5 = vpop.permute.xlu0 %2020 }
0x1e33   :  { %v2023_v6 = vmul.f32 %v2021_v5, %v2017_v2 }
0x1e35   :  { %2025 = vrot.lane.b32.xlu1 %v2023_v6, %s5265_s26 }
0x1ea7   :  { %v2026_v11 = vpop.permute.xlu1 %2025 }
0x1ea8   :  { %v5768_v12 = vadd.f32 %v2026_v11, %v2018_v59 }
0x1eaa   :  { %5180 = vtanh.f32 %v5768_v12 }
0x1eb4   :  { %v5181_v13 = vpop.eup %5180 }
0x1eb5   :  { %2031 = vrot.lane.b32.xlu1 %v5181_v13, %s5264_s6 }
0x1f27   :  { %v2032_v17 = vpop.permute.xlu1 %2031 }
0x1f28   :  { %v2034_v18 = vmul.f32 %v2032_v17, %v2017_v2 }
0x1f2a   :  { %2036 = vrot.lane.b32.xlu0 %v2034_v18, %s5265_s26 }
0x1f9c   :  { %v2037_v22 = vpop.permute.xlu0 %2036 }
0x1f9d   :  { %4450 = vmatmul.mubr.msk.f32.vlgmr.msra.gmra.mrb[24].mxu1 %vm80_vm5, %v2037_v22  ;;  %4496 = vmatmul.mubr.msk.f32.vlgmr.msra.gmra.mrb[20].mxu0 %vm80_vm5, %v2037_v22 }
0x1f9e   :  { %4900 = vmatpush3.bf16.msra.mxu1 %v5672_v7  ;;  %4484 = vmatprep.mubr.msk.f32.mxu1 %vm5263_vm0, %v5262_v8 }
0x1f9f   :  { %4901 = vmatprep.subr.bf16.mxu1 %v5261_v3  ;;  %4930 = vmatpush3.bf16.msra.mxu0 %v5584_v20 }
0x1fa0   :  { %4502 = vmatprep.mubr.msk.f32.mxu0 %vm5263_vm0, %v5262_v8  ;;  %4931 = vmatprep.subr.bf16.mxu0 %v5261_v3 }
0x1fa2   :  { %4903 = vmatpush3.bf16.msra.mxu1 %v5678_v14 }
0x1fa3   :  { %4904 = vmatprep.subr.bf16.mxu1 %v5261_v3 }
0x1fa6   :  { %4906 = vmatpush3.bf16.msra.mxu1 %v5688_v15 }
0x1fa7   :  { %4907 = vmatprep.subr.bf16.mxu1 %v5261_v3 }
0x1faa   :  { %4909 = vmatpush3.bf16.msra.mxu1 %v5698_v19 }
0x1fab   :  { %4910 = vmatprep.subr.bf16.mxu1 %v5261_v3 }
0x1fae   :  { %4912 = vmatpush3.bf16.msra.mxu1 %v5708_v26 }
0x1faf   :  { %4913 = vmatprep.subr.bf16.mxu1 %v5261_v3 }
0x1fb2   :  { %4915 = vmatpush3.bf16.msra.mxu1 %v5718_v29 }
0x1fb3   :  { %4916 = vmatprep.subr.bf16.mxu1 %v5261_v3 }
0x1fb6   :  { %4918 = vmatpush3.bf16.msra.mxu1 %v5728_v33 }
0x1fb7   :  { %4919 = vmatprep.subr.bf16.mxu1 %v5261_v3 }
0x1fba   :  { %4921 = vmatpush3.bf16.msra.mxu1 %v5739_v38 }
0x1fbb   :  { %4961 = vmatprep.subr.bf16.mxu1 %v5261_v3 }
0x2070   :  { %v2106_v44 = vpop.f32.mrb[24].mxu1  ;;  %v2281_v25 = vpop.f32.mrb[20].mxu0 }
0x2071   :  { %v2107_v27 = vadd.f32 %v5655_v54, %v2106_v44  ;;  %v4451_v28 = vpop.f32.mrb[25].mxu1  ;;  %v4497_v30 = vpop.f32.mrb[21].mxu0 }
0x2073   :  { %2111 = vst [vmem:[#allocation4 + $0x4] sm:$0x3] %v2107_v27  ;;  %v2119_v32 = vsel %vm1769_vm6, %v2107_v27, -inf }
0x2074   :  { %2120 = vmax.xlane.f32.xlu1 %v2119_v32 }
0x2101   :  { %v2121_v34 = vpop.xlane.xlu1 %2120 }
0x2102   :  { %vm2122_vm10 = vcmp.eq.f32.partialorder %v2107_v27, %v2121_v34 }
0x2103   :  { %v2123_v35 = vsel %vm2122_vm10, %v5404_v23, 128 }
0x2104   :  { %v2124_v36 = vsel %vm1769_vm6, %v2123_v35, 2147483647 }
0x2105   :  { %v2126_v37 = vshra.s32 %v2124_v36, 16  ;;  %v2125_v10 = vand.u32 65535, %v2124_v36 }
0x2107   :  { %v2128_v4 = vcvt.s32.f32 %v2126_v37  ;;  %v2127_v40 = vcvt.s32.f32 %v2125_v10 }
0x2109   :  { %2129 = vmin.xlane.f32.xlu0 %v2128_v4 }
0x2196   :  { %v2130_v39 = vpop.xlane.xlu0 %2129 }
0x2197   :  { %vm2131_vm11 = vcmp.eq.f32.partialorder %v2128_v4, %v2130_v39  ;;  %v2136_v42 = vcvt.f32.s32 %v2130_v39 }
0x2198   :  { %v2132_v41 = vsel %vm2131_vm11, %v2127_v40, inf }
0x2199   :  { %2133 = vmin.xlane.f32.xlu0 %v2132_v41  ;;  %v2137_v45 = vshll.u32 %v2136_v42, 16 }
0x2226   :  { %v2134_v43 = vpop.xlane.xlu0 %2133 }
0x2227   :  { %v2135_v46 = vcvt.f32.s32 %v2134_v43 }
0x2229   :  { %v2138_v48 = vadd.s32 %v2137_v45, %v2135_v46 }
0x222b   :  { %vm2139_vm12 = vcmp.eq.s32.totalorder %v5404_v23, %v2138_v48 }
0x222c   :  { %4485 = vmatmul.mubr.msk.f32.vlgmr.msra.gmra.mrb[26].mxu1 %vm2139_vm12, %v5266_v9 }
0x222d   :  { %4963 = vmatpush3.bf16.msra.mxu1 %v5573_v16  ;;  %4559 = vmatprep.mubr.msk.f32.mxu1 %vm5263_vm0, %v5262_v8 }
0x222e   :  { %4964 = vmatprep.subr.bf16.mxu1 %v5261_v3 }
0x2231   :  { %4966 = vmatpush3.bf16.msra.mxu1 %v5587_v21 }
0x2232   :  { %4967 = vmatprep.subr.bf16.mxu1 %v5261_v3 }
0x22ff   :  { %v2208_v55 = vpop.f32.mrb[26].mxu1 }
0x2300   :  { %v2213_v56 = vmul.f32 %v2212_v52, %v2208_v55  ;;  %v4486_v57 = vpop.f32.mrb[27].mxu1  ;;  %v2465_v55 = vstv %s2462_s19 }
0x2302   :  { %v2214_v58 = vadd.f32 %v2213_v56, %v2117_v53  ;;  %v3927_v53 = vld [vmem:[%s6075_s2 + $0x6] sm:$0x3]  ;;  %v2561_v56 = vstv %s2467_s20 }
0x2303   :  { %v2466_v57 = vmul.f32 %v3927_v53, %v2465_v55 }
0x2304   :  { %4503 = vmatmul.mubr.msk.f32.vlgmr.msra.gmra.mrb[22].mxu0 %vm154_vm1, %v2214_v58 }
0x2305   :  { %4933 = vmatpush3.bf16.msra.mxu0 %v5627_v47  ;;  %4513 = vmatprep.mubr.msk.f32.mxu0 %vm5263_vm0, %v5262_v8 }
0x2306   :  { %4934 = vmatprep.subr.bf16.mxu0 %v5261_v3 }
0x2309   :  { %4936 = vmatpush3.bf16.msra.mxu0 %v5633_v49 }
0x230a   :  { %4937 = vmatprep.subr.bf16.mxu0 %v5261_v3 }
0x23d7   :  { %v2354_v60 = vpop.f32.mrb[22].mxu0 }
0x23d8   :  { %v2355_v61 = vadd.f32 %v2354_v60, %v2281_v25  ;;  %v4504_v62 = vpop.f32.mrb[23].mxu0 }
0x23da   :  { %v2358_v63 = vadd.f32 %v5608_v31, %v2355_v61 }
0x23dc   :  { %v3924_v0 = vmul.f32 -1.442695, %v2358_v63 }
0x23de   :  { %5182 = vpow2.f32 %v3924_v0 }
0x23df   :  { %5184 = vtanh.f32 %v2358_v63 }
0x23e8   :  { %v5183_v1 = vpop.eup %5182 }
0x23e9   :  { %v2363_v2 = vadd.f32 1.0, %v5183_v1  ;;  %v5185_v5 = vpop.eup %5184 }
0x23eb   :  { %5186 = vrcp.f32 %v2363_v2 }
0x23f5   :  { %v5187_v6 = vpop.eup %5186 }
0x23f6   :  { %v2366_v59 = vsel %vm5408_vm4, %v5185_v5, %v5187_v6 }
0x23f7   :  { %2369 = vrot.lane.b32.xlu1 %v2366_v59, %s5264_s6  ;;  %v2367_v17 = vmul.f32 %v2366_v59, %v5768_v12 }
0x2469   :  { %v2370_v11 = vpop.permute.xlu1 %2369 }
0x246a   :  { %v2372_v13 = vmul.f32 %v2370_v11, %v2366_v59 }
0x246c   :  { %2374 = vrot.lane.b32.xlu0 %v2372_v13, %s5265_s26 }
0x24de   :  { %v2375_v18 = vpop.permute.xlu0 %2374 }
0x24df   :  { %v5825_v22 = vadd.f32 %v2375_v18, %v2367_v17 }
0x24e1   :  { %5188 = vtanh.f32 %v5825_v22 }
0x24eb   :  { %v5189_v44 = vpop.eup %5188 }
0x24ec   :  { %2380 = vrot.lane.b32.xlu1 %v5189_v44, %s5264_s6 }
0x255e   :  { %v2381_v25 = vpop.permute.xlu1 %2380 }
0x255f   :  { %v2383_v27 = vmul.f32 %v2381_v25, %v2366_v59 }
0x2561   :  { %2385 = vrot.lane.b32.xlu1 %v2383_v27, %s5265_s26 }
0x25d3   :  { %v2386_v28 = vpop.permute.xlu1 %2385 }
0x25d4   :  { %4514 = vmatmul.mubr.msk.f32.vlgmr.msra.gmra.mrb[24].mxu0 %vm80_vm5, %v2386_v28  ;;  %4560 = vmatmul.mubr.msk.f32.vlgmr.msra.gmra.mrb[28].mxu1 %vm80_vm5, %v2386_v28 }
0x25d5   :  { %4939 = vmatpush3.bf16.msra.mxu0 %v5672_v7  ;;  %4548 = vmatprep.mubr.msk.f32.mxu0 %vm5263_vm0, %v5262_v8 }
0x25d6   :  { %4940 = vmatprep.subr.bf16.mxu0 %v5261_v3  ;;  %4969 = vmatpush3.bf16.msra.mxu1 %v5584_v20 }
0x25d7   :  { %4566 = vmatprep.mubr.msk.f32.mxu1 %vm5263_vm0, %v5262_v8  ;;  %4970 = vmatprep.subr.bf16.mxu1 %v5261_v3 }
0x25d9   :  { %4942 = vmatpush3.bf16.msra.mxu0 %v5678_v14 }
0x25da   :  { %4943 = vmatprep.subr.bf16.mxu0 %v5261_v3 }
0x25dd   :  { %4945 = vmatpush3.bf16.msra.mxu0 %v5688_v15 }
0x25de   :  { %4946 = vmatprep.subr.bf16.mxu0 %v5261_v3 }
0x25e1   :  { %4948 = vmatpush3.bf16.msra.mxu0 %v5698_v19 }
0x25e2   :  { %4949 = vmatprep.subr.bf16.mxu0 %v5261_v3 }
0x25e5   :  { %4951 = vmatpush3.bf16.msra.mxu0 %v5708_v26 }
0x25e6   :  { %4952 = vmatprep.subr.bf16.mxu0 %v5261_v3 }
0x25e9   :  { %4954 = vmatpush3.bf16.msra.mxu0 %v5718_v29 }
0x25ea   :  { %4955 = vmatprep.subr.bf16.mxu0 %v5261_v3 }
0x25ed   :  { %4957 = vmatpush3.bf16.msra.mxu0 %v5728_v33 }
0x25ee   :  { %4958 = vmatprep.subr.bf16.mxu0 %v5261_v3 }
0x25f1   :  { %4960 = vmatpush3.bf16.msra.mxu0 %v5739_v38 }
0x25f2   :  { %5000 = vmatprep.subr.bf16.mxu0 %v5261_v3 }
0x26a7   :  { %v2455_v12 = vpop.f32.mrb[24].mxu0  ;;  %v2630_v30 = vpop.f32.mrb[28].mxu1 }
0x26a8   :  { %v2456_v32 = vadd.f32 %v5655_v54, %v2455_v12  ;;  %v4515_v34 = vpop.f32.mrb[25].mxu0  ;;  %v4561_v35 = vpop.f32.mrb[29].mxu1 }
0x26aa   :  { %2460 = vst [vmem:[#allocation4 + $0x6] sm:$0x3] %v2456_v32  ;;  %v2468_v36 = vsel %vm1769_vm6, %v2456_v32, -inf }
0x26ab   :  { %2469 = vmax.xlane.f32.xlu0 %v2468_v36 }
0x2738   :  { %v2470_v37 = vpop.xlane.xlu0 %2469 }
0x2739   :  { %vm2471_vm13 = vcmp.eq.f32.partialorder %v2456_v32, %v2470_v37 }
0x273a   :  { %v2472_v4 = vsel %vm2471_vm13, %v5404_v23, 128 }
0x273b   :  { %v2473_v10 = vsel %vm1769_vm6, %v2472_v4, 2147483647 }
0x273c   :  { %v2475_v39 = vshra.s32 %v2473_v10, 16  ;;  %v2474_v41 = vand.u32 65535, %v2473_v10 }
0x273e   :  { %v2477_v40 = vcvt.s32.f32 %v2475_v39  ;;  %v2476_v43 = vcvt.s32.f32 %v2474_v41 }
0x2740   :  { %2478 = vmin.xlane.f32.xlu1 %v2477_v40 }
0x27cd   :  { %v2479_v42 = vpop.xlane.xlu1 %2478 }
0x27ce   :  { %vm2480_vm14 = vcmp.eq.f32.partialorder %v2477_v40, %v2479_v42  ;;  %v2485_v46 = vcvt.f32.s32 %v2479_v42 }
0x27cf   :  { %v2481_v45 = vsel %vm2480_vm14, %v2476_v43, inf }
0x27d0   :  { %2482 = vmin.xlane.f32.xlu0 %v2481_v45  ;;  %v2486_v50 = vshll.u32 %v2485_v46, 16 }
0x285d   :  { %v2483_v48 = vpop.xlane.xlu0 %2482 }
0x285e   :  { %v2484_v51 = vcvt.f32.s32 %v2483_v48 }
0x2860   :  { %v2487_v52 = vadd.s32 %v2486_v50, %v2484_v51 }
0x2862   :  { %vm2488_vm15 = vcmp.eq.s32.totalorder %v5404_v23, %v2487_v52 }
0x2863   :  { %4549 = vmatmul.mubr.msk.f32.vlgmr.msra.gmra.mrb[26].mxu0 %vm2488_vm15, %v5266_v9 }
0x2864   :  { %5002 = vmatpush3.bf16.msra.mxu0 %v5573_v16  ;;  %4623 = vmatprep.mubr.msk.f32.mxu0 %vm5263_vm0, %v5262_v8 }
0x2865   :  { %5003 = vmatprep.subr.bf16.mxu0 %v5261_v3 }
0x2868   :  { %5005 = vmatpush3.bf16.msra.mxu0 %v5587_v21 }
0x2869   :  { %5006 = vmatprep.subr.bf16.mxu0 %v5261_v3 }
0x2936   :  { %v2557_v58 = vpop.f32.mrb[26].mxu0 }
0x2937   :  { %v2562_v60 = vmul.f32 %v2561_v56, %v2557_v58  ;;  %v4550_v61 = vpop.f32.mrb[27].mxu0  ;;  %v2814_v58 = vstv %s2811_s22 }
0x2939   :  { %v2563_v62 = vadd.f32 %v2562_v60, %v2466_v57  ;;  %v3935_v57 = vld [vmem:[%s6075_s2 + $0x8] sm:$0x3]  ;;  %v2910_v60 = vstv %s2816_s23 }
0x293a   :  { %v2815_v61 = vmul.f32 %v3935_v57, %v2814_v58  ;;  %v3943_v58 = vld [vmem:[%s6075_s2 + $0xa] sm:$0x3] }
0x293b   :  { %4567 = vmatmul.mubr.msk.f32.vlgmr.msra.gmra.mrb[30].mxu1 %vm154_vm1, %v2563_v62 }
0x293c   :  { %4972 = vmatpush3.bf16.msra.mxu1 %v5627_v47  ;;  %4577 = vmatprep.mubr.msk.f32.mxu1 %vm5263_vm0, %v5262_v8 }
0x293d   :  { %4973 = vmatprep.subr.bf16.mxu1 %v5261_v3 }
0x2940   :  { %4975 = vmatpush3.bf16.msra.mxu1 %v5633_v49 }
0x2941   :  { %4976 = vmatprep.subr.bf16.mxu1 %v5261_v3 }
0x2a0e   :  { %v2703_v63 = vpop.f32.mrb[30].mxu1 }
0x2a0f   :  { %v2704_v0 = vadd.f32 %v2703_v63, %v2630_v30  ;;  %v4568_v1 = vpop.f32.mrb[31].mxu1 }
0x2a11   :  { %v2707_v2 = vadd.f32 %v5608_v31, %v2704_v0 }
0x2a13   :  { %v3932_v5 = vmul.f32 -1.442695, %v2707_v2 }
0x2a15   :  { %5190 = vpow2.f32 %v3932_v5 }
0x2a16   :  { %5192 = vtanh.f32 %v2707_v2 }
0x2a1f   :  { %v5191_v6 = vpop.eup %5190 }
0x2a20   :  { %v2712_v59 = vadd.f32 1.0, %v5191_v6  ;;  %v5193_v11 = vpop.eup %5192 }
0x2a22   :  { %5194 = vrcp.f32 %v2712_v59 }
0x2a2c   :  { %v5195_v13 = vpop.eup %5194 }
0x2a2d   :  { %v2715_v17 = vsel %vm5408_vm4, %v5193_v11, %v5195_v13 }
0x2a2e   :  { %2718 = vrot.lane.b32.xlu0 %v2715_v17, %s5264_s6  ;;  %v2716_v25 = vmul.f32 %v2715_v17, %v5825_v22 }
0x2aa0   :  { %v2719_v18 = vpop.permute.xlu0 %2718 }
0x2aa1   :  { %v2721_v44 = vmul.f32 %v2719_v18, %v2715_v17 }
0x2aa3   :  { %2723 = vrot.lane.b32.xlu1 %v2721_v44, %s5265_s26 }
0x2b15   :  { %v2724_v27 = vpop.permute.xlu1 %2723 }
0x2b16   :  { %v5882_v28 = vadd.f32 %v2724_v27, %v2716_v25 }
0x2b18   :  { %5196 = vtanh.f32 %v5882_v28 }
0x2b22   :  { %v5197_v12 = vpop.eup %5196 }
0x2b23   :  { %2729 = vrot.lane.b32.xlu1 %v5197_v12, %s5264_s6 }
0x2b95   :  { %v2730_v30 = vpop.permute.xlu1 %2729 }
0x2b96   :  { %v2732_v32 = vmul.f32 %v2730_v30, %v2715_v17 }
0x2b98   :  { %2734 = vrot.lane.b32.xlu0 %v2732_v32, %s5265_s26 }
0x2c0a   :  { %v2735_v34 = vpop.permute.xlu0 %2734 }
0x2c0b   :  { %4578 = vmatmul.mubr.msk.f32.vlgmr.msra.gmra.mrb[32].mxu1 %vm80_vm5, %v2735_v34  ;;  %4624 = vmatmul.mubr.msk.f32.vlgmr.msra.gmra.mrb[28].mxu0 %vm80_vm5, %v2735_v34 }
0x2c0c   :  { %4978 = vmatpush3.bf16.msra.mxu1 %v5672_v7  ;;  %4612 = vmatprep.mubr.msk.f32.mxu1 %vm5263_vm0, %v5262_v8 }
0x2c0d   :  { %4979 = vmatprep.subr.bf16.mxu1 %v5261_v3  ;;  %5008 = vmatpush3.bf16.msra.mxu0 %v5584_v20 }
0x2c0e   :  { %4630 = vmatprep.mubr.msk.f32.mxu0 %vm5263_vm0, %v5262_v8  ;;  %5009 = vmatprep.subr.bf16.mxu0 %v5261_v3 }
0x2c10   :  { %4981 = vmatpush3.bf16.msra.mxu1 %v5678_v14 }
0x2c11   :  { %4982 = vmatprep.subr.bf16.mxu1 %v5261_v3 }
0x2c14   :  { %4984 = vmatpush3.bf16.msra.mxu1 %v5688_v15 }
0x2c15   :  { %4985 = vmatprep.subr.bf16.mxu1 %v5261_v3 }
0x2c18   :  { %4987 = vmatpush3.bf16.msra.mxu1 %v5698_v19 }
0x2c19   :  { %4988 = vmatprep.subr.bf16.mxu1 %v5261_v3 }
0x2c1c   :  { %4990 = vmatpush3.bf16.msra.mxu1 %v5708_v26 }
0x2c1d   :  { %4991 = vmatprep.subr.bf16.mxu1 %v5261_v3 }
0x2c20   :  { %4993 = vmatpush3.bf16.msra.mxu1 %v5718_v29 }
0x2c21   :  { %4994 = vmatprep.subr.bf16.mxu1 %v5261_v3 }
0x2c24   :  { %4996 = vmatpush3.bf16.msra.mxu1 %v5728_v33 }
0x2c25   :  { %4997 = vmatprep.subr.bf16.mxu1 %v5261_v3 }
0x2c28   :  { %4999 = vmatpush3.bf16.msra.mxu1 %v5739_v38 }
0x2c29   :  { %5039 = vmatprep.subr.bf16.mxu1 %v5261_v3 }
0x2cde   :  { %v2804_v22 = vpop.f32.mrb[32].mxu1  ;;  %v2979_v35 = vpop.f32.mrb[28].mxu0 }
0x2cdf   :  { %v2805_v36 = vadd.f32 %v5655_v54, %v2804_v22  ;;  %v4579_v37 = vpop.f32.mrb[33].mxu1  ;;  %v4625_v4 = vpop.f32.mrb[29].mxu0 }
0x2ce1   :  { %2809 = vst [vmem:[#allocation4 + $0x8] sm:$0x3] %v2805_v36  ;;  %v2817_v10 = vsel %vm1769_vm6, %v2805_v36, -inf }
0x2ce2   :  { %2818 = vmax.xlane.f32.xlu1 %v2817_v10 }
0x2d6f   :  { %v2819_v39 = vpop.xlane.xlu1 %2818 }
0x2d70   :  { %vm2820_vm2 = vcmp.eq.f32.partialorder %v2805_v36, %v2819_v39 }
0x2d71   :  { %v2821_v40 = vsel %vm2820_vm2, %v5404_v23, 128 }
0x2d72   :  { %v2822_v41 = vsel %vm1769_vm6, %v2821_v40, 2147483647 }
0x2d73   :  { %v2824_v42 = vshra.s32 %v2822_v41, 16  ;;  %v2823_v45 = vand.u32 65535, %v2822_v41 }
0x2d75   :  { %v2826_v43 = vcvt.s32.f32 %v2824_v42  ;;  %v2825_v48 = vcvt.s32.f32 %v2823_v45 }
0x2d77   :  { %2827 = vmin.xlane.f32.xlu0 %v2826_v43 }
0x2e04   :  { %v2828_v46 = vpop.xlane.xlu0 %2827 }
0x2e05   :  { %vm2829_vm3 = vcmp.eq.f32.partialorder %v2826_v43, %v2828_v46  ;;  %v2834_v51 = vcvt.f32.s32 %v2828_v46 }
0x2e06   :  { %v2830_v50 = vsel %vm2829_vm3, %v2825_v48, inf }
0x2e07   :  { %2831 = vmin.xlane.f32.xlu0 %v2830_v50  ;;  %v2835_v53 = vshll.u32 %v2834_v51, 16 }
0x2e94   :  { %v2832_v52 = vpop.xlane.xlu0 %2831 }
0x2e95   :  { %v2833_v55 = vcvt.f32.s32 %v2832_v52 }
0x2e97   :  { %v2836_v56 = vadd.s32 %v2835_v53, %v2833_v55 }
0x2e99   :  { %vm2837_vm7 = vcmp.eq.s32.totalorder %v5404_v23, %v2836_v56 }
0x2e9a   :  { %4613 = vmatmul.mubr.msk.f32.vlgmr.msra.gmra.mrb[34].mxu1 %vm2837_vm7, %v5266_v9 }
0x2e9b   :  { %5041 = vmatpush3.bf16.msra.mxu1 %v5573_v16  ;;  %4687 = vmatprep.mubr.msk.f32.mxu1 %vm5263_vm0, %v5262_v8 }
0x2e9c   :  { %5042 = vmatprep.subr.bf16.mxu1 %v5261_v3 }
0x2e9f   :  { %5044 = vmatpush3.bf16.msra.mxu1 %v5587_v21 }
0x2ea0   :  { %5045 = vmatprep.subr.bf16.mxu1 %v5261_v3 }
0x2f6d   :  { %v2906_v62 = vpop.f32.mrb[34].mxu1 }
0x2f6e   :  { %v2911_v63 = vmul.f32 %v2910_v60, %v2906_v62  ;;  %v4614_v0 = vpop.f32.mrb[35].mxu1  ;;  %v3163_v60 = vstv %s3160_s25 }
0x2f6f   :  { %v3164_v62 = vmul.f32 %v3943_v58, %v3163_v60 }
0x2f70   :  { %v2912_v1 = vadd.f32 %v2911_v63, %v2815_v61  ;;  %v3259_v61 = vstv %s3165_s27 }
0x2f72   :  { %4631 = vmatmul.mubr.msk.f32.vlgmr.msra.gmra.mrb[30].mxu0 %vm154_vm1, %v2912_v1 }
0x2f73   :  { %5011 = vmatpush3.bf16.msra.mxu0 %v5627_v47  ;;  %4641 = vmatprep.mubr.msk.f32.mxu0 %vm5263_vm0, %v5262_v8 }
0x2f74   :  { %5012 = vmatprep.subr.bf16.mxu0 %v5261_v3 }
0x2f77   :  { %5014 = vmatpush3.bf16.msra.mxu0 %v5633_v49 }
0x2f78   :  { %5015 = vmatprep.subr.bf16.mxu0 %v5261_v3 }
0x3045   :  { %v3052_v2 = vpop.f32.mrb[30].mxu0 }
0x3046   :  { %v3053_v5 = vadd.f32 %v3052_v2, %v2979_v35  ;;  %v4632_v6 = vpop.f32.mrb[31].mxu0 }
0x3047   :  { %v5993_v6 = vld [vmem:[%s6082_s9] ss:$0 sm:$0xff] }
0x3048   :  { %v3056_v59 = vadd.f32 %v5608_v31, %v3053_v5 }
0x304a   :  { %v3940_v11 = vmul.f32 -1.442695, %v3056_v59 }
0x304c   :  { %5198 = vpow2.f32 %v3940_v11 }
0x304d   :  { %5200 = vtanh.f32 %v3056_v59 }
0x3056   :  { %v5199_v13 = vpop.eup %5198 }
0x3057   :  { %v3061_v17 = vadd.f32 1.0, %v5199_v13  ;;  %v5201_v18 = vpop.eup %5200 }
0x3059   :  { %5202 = vrcp.f32 %v3061_v17 }
0x3063   :  { %v5203_v44 = vpop.eup %5202 }
0x3064   :  { %v3064_v25 = vsel %vm5408_vm4, %v5201_v18, %v5203_v44 }
0x3065   :  { %3067 = vrot.lane.b32.xlu1 %v3064_v25, %s5264_s6  ;;  %v3065_v30 = vmul.f32 %v3064_v25, %v5882_v28 }
0x30d7   :  { %v3068_v27 = vpop.permute.xlu1 %3067 }
0x30d8   :  { %v3070_v12 = vmul.f32 %v3068_v27, %v3064_v25 }
0x30da   :  { %3072 = vrot.lane.b32.xlu0 %v3070_v12, %s5265_s26 }
0x314c   :  { %v3073_v31 = vpop.permute.xlu0 %3072 }
0x314d   :  { %v5939_v32 = vadd.f32 %v3073_v31, %v3065_v30 }
0x314f   :  { %5204 = vtanh.f32 %v5939_v32 }
0x3159   :  { %v5205_v34 = vpop.eup %5204 }
0x315a   :  { %3078 = vrot.lane.b32.xlu1 %v5205_v34, %s5264_s6 }
0x31cc   :  { %v3079_v22 = vpop.permute.xlu1 %3078 }
0x31cd   :  { %v3081_v35 = vmul.f32 %v3079_v22, %v3064_v25 }
0x31cf   :  { %3083 = vrot.lane.b32.xlu1 %v3081_v35, %s5265_s26 }
0x3241   :  { %v3084_v36 = vpop.permute.xlu1 %3083 }
0x3242   :  { %4642 = vmatmul.mubr.msk.f32.vlgmr.msra.gmra.mrb[32].mxu0 %vm80_vm5, %v3084_v36  ;;  %4688 = vmatmul.mubr.msk.f32.vlgmr.msra.gmra.mrb[36].mxu1 %vm80_vm5, %v3084_v36 }
0x3243   :  { %5017 = vmatpush3.bf16.msra.mxu0 %v5672_v7  ;;  %4676 = vmatprep.mubr.msk.f32.mxu0 %vm5263_vm0, %v5262_v8 }
0x3244   :  { %5018 = vmatprep.subr.bf16.mxu0 %v5261_v3  ;;  %5047 = vmatpush3.bf16.msra.mxu1 %v5584_v20 }
0x3245   :  { %4694 = vmatprep.mubr.msk.f32.mxu1 %vm5263_vm0, %v5262_v8  ;;  %5048 = vmatprep.subr.bf16.mxu1 %v5261_v3 }
0x3247   :  { %5020 = vmatpush3.bf16.msra.mxu0 %v5678_v14 }
0x3248   :  { %5021 = vmatprep.subr.bf16.mxu0 %v5261_v3 }
0x324b   :  { %5023 = vmatpush3.bf16.msra.mxu0 %v5688_v15 }
0x324c   :  { %5024 = vmatprep.subr.bf16.mxu0 %v5261_v3 }
0x324f   :  { %5026 = vmatpush3.bf16.msra.mxu0 %v5698_v19 }
0x3250   :  { %5027 = vmatprep.subr.bf16.mxu0 %v5261_v3 }
0x3253   :  { %5029 = vmatpush3.bf16.msra.mxu0 %v5708_v26 }
0x3254   :  { %5030 = vmatprep.subr.bf16.mxu0 %v5261_v3 }
0x3257   :  { %5032 = vmatpush3.bf16.msra.mxu0 %v5718_v29 }
0x3258   :  { %5033 = vmatprep.subr.bf16.mxu0 %v5261_v3 }
0x325b   :  { %5035 = vmatpush3.bf16.msra.mxu0 %v5728_v33 }
0x325c   :  { %5036 = vmatprep.subr.bf16.mxu0 %v5261_v3 }
0x325f   :  { %5038 = vmatpush3.bf16.msra.mxu0 %v5739_v38 }
0x3260   :  { %5078 = vmatprep.subr.bf16.mxu0 %v5261_v3 }
0x3315   :  { %v3153_v28 = vpop.f32.mrb[32].mxu0  ;;  %v3328_v37 = vpop.f32.mrb[36].mxu1 }
0x3316   :  { %v3154_v4 = vadd.f32 %v5655_v54, %v3153_v28  ;;  %v4643_v10 = vpop.f32.mrb[33].mxu0  ;;  %v4689_v39 = vpop.f32.mrb[37].mxu1 }
0x3318   :  { %3158 = vst [vmem:[#allocation4 + $0xa] sm:$0x3] %v3154_v4  ;;  %v3166_v40 = vsel %vm1769_vm6, %v3154_v4, -inf }
0x3319   :  { %3167 = vmax.xlane.f32.xlu0 %v3166_v40 }
0x33a6   :  { %v3168_v41 = vpop.xlane.xlu0 %3167 }
0x33a7   :  { %vm3169_vm8 = vcmp.eq.f32.partialorder %v3154_v4, %v3168_v41 }
0x33a8   :  { %v3170_v42 = vsel %vm3169_vm8, %v5404_v23, 128 }
0x33a9   :  { %v3171_v43 = vsel %vm1769_vm6, %v3170_v42, 2147483647 }
0x33aa   :  { %v3173_v45 = vshra.s32 %v3171_v43, 16  ;;  %v3172_v48 = vand.u32 65535, %v3171_v43 }
0x33ac   :  { %v3175_v46 = vcvt.s32.f32 %v3173_v45  ;;  %v3174_v51 = vcvt.s32.f32 %v3172_v48 }
0x33ae   :  { %3176 = vmin.xlane.f32.xlu1 %v3175_v46 }
0x343b   :  { %v3177_v50 = vpop.xlane.xlu1 %3176 }
0x343c   :  { %vm3178_vm9 = vcmp.eq.f32.partialorder %v3175_v46, %v3177_v50  ;;  %v3183_v52 = vcvt.f32.s32 %v3177_v50  ;;  %v3951_v50 = vld [vmem:[%s6075_s2 + $0xc] sm:$0x3]  ;;  %s5267_s2 = smov [#allocation4]  }
0x343d   :  { %v3179_v54 = vsel %vm3178_vm9, %v3174_v51, inf  ;;  %s3862_s16 = sshll.u32 %s5267_s2, 4  ;;  %s3863_s16 = int_to_ptr.vmem [resolvable:$true] %s3862_s16 }
0x343e   :  { %3180 = vmin.xlane.f32.xlu0 %v3179_v54  ;;  %v3184_v55 = vshll.u32 %v3183_v52, 16  ;;  %s5234_s17 = scalar_lea.vmem %s3863_s16, 256  ;;  %p5239_p4 = scmp.lt.s32.totalorder %s3863_s16, %s3863_s16 }
0x343f   :  { %p5235_p3 = scmp.ne.s32.totalorder %s3863_s16, %s5234_s17  ;;  %p5240_p5 = scmp.lt.s32.totalorder %s5234_s17, %s5234_s17 }
0x3441   :  { %p5241_p6 = por %p5240_p5, %p5239_p4 }
0x3443   :  { %p5242_p7 = pnand %p5241_p6, %p5235_p3 }
0x34cb   :  { %v3181_v53 = vpop.xlane.xlu0 %3180 }
0x34cc   :  { %v3182_v56 = vcvt.f32.s32 %v3181_v53 }
0x34ce   :  { %v3185_v57 = vadd.s32 %v3184_v55, %v3182_v56 }
0x34d0   :  { %vm3186_vm10 = vcmp.eq.s32.totalorder %v5404_v23, %v3185_v57 }
0x34d1   :  { %4677 = vmatmul.mubr.msk.f32.vlgmr.msra.gmra.mrb[34].mxu0 %vm3186_vm10, %v5266_v9 }
0x34d2   :  { %5080 = vmatpush3.bf16.msra.mxu0 %v5573_v16  ;;  %4751 = vmatprep.mubr.msk.f32.mxu0 %vm5263_vm0, %v5262_v8 }
0x34d3   :  { %5081 = vmatprep.subr.bf16.mxu0 %v5261_v3 }
0x34d6   :  { %5083 = vmatpush3.bf16.msra.mxu0 %v5587_v21 }
0x34d7   :  { %5084 = vmatprep.subr.bf16.mxu0 %v5261_v3 }
0x35a4   :  { %v3255_v16 = vpop.f32.mrb[34].mxu0 }
0x35a5   :  { %v3260_v63 = vmul.f32 %v3259_v61, %v3255_v16  ;;  %v4678_v0 = vpop.f32.mrb[35].mxu0 }
0x35a7   :  { %v3261_v1 = vadd.f32 %v3260_v63, %v3164_v62 }
0x35a9   :  { %4695 = vmatmul.mubr.msk.f32.vlgmr.msra.gmra.mrb[38].mxu1 %vm154_vm1, %v3261_v1 }
0x35aa   :  { %5050 = vmatpush3.bf16.msra.mxu1 %v5627_v47  ;;  %4705 = vmatprep.mubr.msk.f32.mxu1 %vm5263_vm0, %v5262_v8 }
0x35ab   :  { %5051 = vmatprep.subr.bf16.mxu1 %v5261_v3 }
0x35ae   :  { %5053 = vmatpush3.bf16.msra.mxu1 %v5633_v49 }
0x35af   :  { %5054 = vmatprep.subr.bf16.mxu1 %v5261_v3 }
0x367c   :  { %v3401_v21 = vpop.f32.mrb[38].mxu1 }
0x367d   :  { %v3402_v2 = vadd.f32 %v3401_v21, %v3328_v37  ;;  %v4696_v5 = vpop.f32.mrb[39].mxu1 }
0x367f   :  { %v3405_v59 = vadd.f32 %v5993_v6, %v3402_v2 }
0x3681   :  { %v3948_v11 = vmul.f32 -1.442695, %v3405_v59 }
0x3683   :  { %5206 = vpow2.f32 %v3948_v11 }
0x3684   :  { %5208 = vtanh.f32 %v3405_v59 }
0x368d   :  { %v5207_v13 = vpop.eup %5206 }
0x368e   :  { %v3410_v17 = vadd.f32 1.0, %v5207_v13  ;;  %v5209_v18 = vpop.eup %5208 }
0x3690   :  { %5210 = vrcp.f32 %v3410_v17 }
0x369a   :  { %v5211_v44 = vpop.eup %5210 }
0x369b   :  { %v3413_v25 = vsel %vm5408_vm4, %v5209_v18, %v5211_v44 }
0x369c   :  { %3416 = vrot.lane.b32.xlu0 %v3413_v25, %s5264_s6  ;;  %v3414_v30 = vmul.f32 %v3413_v25, %v5939_v32 }
0x370e   :  { %v3417_v27 = vpop.permute.xlu0 %3416 }
0x370f   :  { %v3419_v12 = vmul.f32 %v3417_v27, %v3413_v25 }
0x3711   :  { %3421 = vrot.lane.b32.xlu1 %v3419_v12, %s5265_s26 }
0x3783   :  { %v3422_v31 = vpop.permute.xlu1 %3421 }
0x3784   :  { %v6001_v34 = vadd.f32 %v3422_v31, %v3414_v30 }
0x3786   :  { %5212 = vtanh.f32 %v6001_v34 }
0x3790   :  { %v5213_v22 = vpop.eup %5212 }
0x3791   :  { %3427 = vrot.lane.b32.xlu1 %v5213_v22, %s5264_s6 }
0x3803   :  { %v3428_v35 = vpop.permute.xlu1 %3427 }
0x3804   :  { %v3430_v36 = vmul.f32 %v3428_v35, %v3413_v25 }
0x3806   :  { %3432 = vrot.lane.b32.xlu0 %v3430_v36, %s5265_s26 }
0x3878   :  { %v3433_v28 = vpop.permute.xlu0 %3432 }
0x3879   :  { %4706 = vmatmul.mubr.msk.f32.vlgmr.msra.gmra.mrb[40].mxu1 %vm80_vm5, %v3433_v28  ;;  %4752 = vmatmul.mubr.msk.f32.vlgmr.msra.gmra.mrb[36].mxu0 %vm80_vm5, %v3433_v28 }
0x387a   :  { %5056 = vmatpush3.bf16.msra.mxu1 %v5672_v7  ;;  %4740 = vmatprep.mubr.msk.f32.mxu1 %vm5263_vm0, %v5262_v8 }
0x387b   :  { %5057 = vmatprep.subr.bf16.mxu1 %v5261_v3  ;;  %5086 = vmatpush3.bf16.msra.mxu0 %v5584_v20 }
0x387c   :  { %4758 = vmatprep.mubr.msk.f32.mxu0 %vm5263_vm0, %v5262_v8  ;;  %5087 = vmatprep.subr.bf16.mxu0 %v5261_v3 }
0x387e   :  { %5059 = vmatpush3.bf16.msra.mxu1 %v5678_v14  ;;  %v6032_v14 = vld [vmem:[%s6084_s11] ss:$0 sm:$0xff]  ;;  %s3950_s11 = sld [smem:[#allocation3 + $0x6]] }
0x387f   :  { %5060 = vmatprep.subr.bf16.mxu1 %v5261_v3 }
0x3882   :  { %5062 = vmatpush3.bf16.msra.mxu1 %v5688_v15 }
0x3883   :  { %5063 = vmatprep.subr.bf16.mxu1 %v5261_v3 }
0x3884   :  { %s3509_s14 = scvt.s32.f32 %s3950_s11 }
0x3886   :  { %5065 = vmatpush3.bf16.msra.mxu1 %v5698_v19  ;;  %s3514_s7 = ssub.f32 1.0, %s3509_s14  ;;  %v3512_v51 = vstv %s3509_s14 }
0x3887   :  { %5066 = vmatprep.subr.bf16.mxu1 %v5261_v3  ;;  %v3513_v52 = vmul.f32 %v3951_v50, %v3512_v51 }
0x3888   :  { %v3608_v54 = vstv %s3514_s7 }
0x388a   :  { %5068 = vmatpush3.bf16.msra.mxu1 %v5708_v26 }
0x388b   :  { %5069 = vmatprep.subr.bf16.mxu1 %v5261_v3 }
0x388e   :  { %5071 = vmatpush3.bf16.msra.mxu1 %v5718_v29 }
0x388f   :  { %5072 = vmatprep.subr.bf16.mxu1 %v5261_v3 }
0x3892   :  { %5074 = vmatpush3.bf16.msra.mxu1 %v5728_v33 }
0x3893   :  { %5075 = vmatprep.subr.bf16.mxu1 %v5261_v3 }
0x3896   :  { %5077 = vmatpush3.bf16.msra.mxu1 %v5739_v38 }
0x394c   :  { %v3502_v20 = vpop.f32.mrb[40].mxu1  ;;  %v3677_v7 = vpop.f32.mrb[36].mxu0 }
0x394d   :  { %v3503_v15 = vadd.f32 %v6032_v14, %v3502_v20  ;;  %v4707_v19 = vpop.f32.mrb[41].mxu1  ;;  %v4753_v26 = vpop.f32.mrb[37].mxu0 }
0x394f   :  { %3507 = vst [vmem:[#allocation4 + $0xc] sm:$0x3] %v3503_v15  ;;  %v3515_v29 = vsel %vm1769_vm6, %v3503_v15, -inf }
0x3950   :  { %3516 = vmax.xlane.f32.xlu1 %v3515_v29 }
0x39dd   :  { %v3517_v33 = vpop.xlane.xlu1 %3516 }
0x39de   :  { %vm3518_vm11 = vcmp.eq.f32.partialorder %v3503_v15, %v3517_v33 }
0x39df   :  { %v3519_v32 = vsel %vm3518_vm11, %v5404_v23, 128 }
0x39e0   :  { %v3520_v38 = vsel %vm1769_vm6, %v3519_v32, 2147483647 }
0x39e1   :  { %v3522_v37 = vshra.s32 %v3520_v38, 16  ;;  %v3521_v10 = vand.u32 65535, %v3520_v38 }
0x39e3   :  { %v3524_v4 = vcvt.s32.f32 %v3522_v37  ;;  %v3523_v40 = vcvt.s32.f32 %v3521_v10 }
0x39e5   :  { %3525 = vmin.xlane.f32.xlu0 %v3524_v4 }
0x3a72   :  { %v3526_v39 = vpop.xlane.xlu0 %3525 }
0x3a73   :  { %vm3527_vm12 = vcmp.eq.f32.partialorder %v3524_v4, %v3526_v39  ;;  %v3532_v42 = vcvt.f32.s32 %v3526_v39 }
0x3a74   :  { %v3528_v41 = vsel %vm3527_vm12, %v3523_v40, inf }
0x3a75   :  { %3529 = vmin.xlane.f32.xlu0 %v3528_v41  ;;  %v3533_v45 = vshll.u32 %v3532_v42, 16 }
0x3b02   :  { %v3530_v43 = vpop.xlane.xlu0 %3529 }
0x3b03   :  { %v3531_v46 = vcvt.f32.s32 %v3530_v43 }
0x3b05   :  { %v3534_v48 = vadd.s32 %v3533_v45, %v3531_v46 }
0x3b07   :  { %vm3535_vm13 = vcmp.eq.s32.totalorder %v5404_v23, %v3534_v48 }
0x3b08   :  { %4741 = vmatmul.mubr.msk.f32.vlgmr.msra.gmra.mrb[42].mxu1 %vm3535_vm13, %v5266_v9 }
0x3bdb   :  { %v3604_v53 = vpop.f32.mrb[42].mxu1 }
0x3bdc   :  { %v3609_v55 = vmul.f32 %v3608_v54, %v3604_v53  ;;  %v4742_v56 = vpop.f32.mrb[43].mxu1 }
0x3bde   :  { %v3610_v57 = vadd.f32 %v3609_v55, %v3513_v52 }
0x3be0   :  { %4759 = vmatmul.mubr.msk.f32.vlgmr.msra.gmra.mrb[38].mxu0 %vm154_vm1, %v3610_v57 }
0x3be1   :  { %5089 = vmatpush3.bf16.msra.mxu0 %v5627_v47  ;;  %4769 = vmatprep.mubr.msk.f32.mxu0 %vm5263_vm0, %v5262_v8 }
0x3be2   :  { %5090 = vmatprep.subr.bf16.mxu0 %v5261_v3 }
0x3be5   :  { %5092 = vmatpush3.bf16.msra.mxu0 %v5633_v49 }
0x3cb3   :  { %v3750_v23 = vpop.f32.mrb[38].mxu0 }
0x3cb4   :  { %v3751_v9 = vadd.f32 %v3750_v23, %v3677_v7  ;;  %v4760_v58 = vpop.f32.mrb[39].mxu0 }
0x3cb6   :  { %v3754_v60 = vadd.f32 %v5993_v6, %v3751_v9 }
0x3cb8   :  { %v3956_v61 = vmul.f32 -1.442695, %v3754_v60 }
0x3cba   :  { %5214 = vpow2.f32 %v3956_v61 }
0x3cbb   :  { %5216 = vtanh.f32 %v3754_v60 }
0x3cc4   :  { %v5215_v62 = vpop.eup %5214 }
0x3cc5   :  { %v3759_v16 = vadd.f32 1.0, %v5215_v62  ;;  %v5217_v63 = vpop.eup %5216 }
0x3cc7   :  { %5218 = vrcp.f32 %v3759_v16 }
0x3cd1   :  { %v5219_v47 = vpop.eup %5218 }
0x3cd2   :  { %v3762_v8 = vsel %vm5408_vm4, %v5217_v63, %v5219_v47 }
0x3cd3   :  { %3765 = vrot.lane.b32.xlu1 %v3762_v8, %s5264_s6  ;;  %v3763_v0 = vmul.f32 %v3762_v8, %v6001_v34 }
0x3d45   :  { %v3766_v3 = vpop.permute.xlu1 %3765 }
0x3d46   :  { %v3768_v49 = vmul.f32 %v3766_v3, %v3762_v8 }
0x3d48   :  { %3770 = vrot.lane.b32.xlu0 %v3768_v49, %s5265_s26 }
0x3dba   :  { %v3771_v1 = vpop.permute.xlu0 %3770 }
0x3dbb   :  { %v3773_v21 = vadd.f32 %v3771_v1, %v3763_v0 }
0x3dbd   :  { %5220 = vtanh.f32 %v3773_v21 }
0x3dc7   :  { %v5221_v2 = vpop.eup %5220 }
0x3dc8   :  { %3776 = vrot.lane.b32.xlu1 %v5221_v2, %s5264_s6 }
0x3e3a   :  { %v3777_v5 = vpop.permute.xlu1 %3776 }
0x3e3b   :  { %v3779_v6 = vmul.f32 %v3777_v5, %v3762_v8 }
0x3e3d   :  { %3781 = vrot.lane.b32.xlu1 %v3779_v6, %s5265_s26 }
0x3eaf   :  { %v3782_v24 = vpop.permute.xlu1 %3781 }
0x3eb0   :  { %4770 = vmatmul.mubr.msk.f32.vlgmr.msra.gmra.mrb[40].mxu0 %vm80_vm5, %v3782_v24 }
0x3f83   :  { %v3851_v59 = vpop.f32.mrb[40].mxu0 }
0x3f84   :  { %v3852_v11 = vadd.f32 %v6032_v14, %v3851_v59  ;;  %v4771_v13 = vpop.f32.mrb[41].mxu0 }
0x3f86   :  { %3856 = vst [vmem:[#allocation4 + $0xe] sm:$0x3] %v3852_v11 }
0x3f87   :  { %5245 = shalt.err (!%p5242_p7)
}
0x3f88   :  { %s5246_s0 = scalar_lea.hbm %s6085_s12, 256 }
0x3f89   :  { %p5247_p8 = scmp.ne.s32.totalorder %s6085_s12, %s5246_s0  ;;  %p5250_p9 = scmp.lt.u32.totalorder %s5246_s0, %s6085_s12 }
0x3f8b   :  { %p5252_p10 = pnand %p5250_p9, %p5247_p8 }
0x3f8d   :  { %5255 = shalt.err (!%p5252_p10)
}
0x3f8e   :  { %s5268_s10 = smov 2  }
0x3f8f   :  { %3868 = dma.vmem_to_hbm [thread:$0]  %s3863_s16, 256, %s6085_s12, [#allocation5], %s5265_s26, %s5265_s26, %s5268_s10  }
0x3f90   :  { %5258 = dma.done.wait [#allocation5], 256  }
0x3f91   :  { %5259 = vsyncadd [#allocation5], 4294967040 }
0x3f92   :  { %3872 = vsyncpa [#allocation5], 1 }

</bundles_post_ra>
